<compile_context>
chip_gen: v5e
topology: v5e:2x2
jax: 0.10.0
libtpu: 0.0.40
codegen_flags: <defaults>
</compile_context>

<pallas_src>
import functools

import numpy as np
import jax
import jax.numpy as jnp
from jax.experimental import pallas as pl
from jax.experimental.pallas import tpu as pltpu

CIN = 64          # fixed by the module
COUT = 256        # fixed by the module
R = 2             # pixel-shuffle upscale factor
K = 3             # conv kernel size
KW = K * CIN      # 192: contraction depth per ky after kx-im2col


def _pick_tile_rows(H, W):
    """Largest row-tile TH (divisor of H) with TH*W <= 2048.

    Keeps the f32 accumulator (TH*W*256*4 B), bf16 patches and double-buffered
    in/out tiles comfortably inside the scoped-VMEM defaults of v5e (16 MiB),
    v6e (32 MiB) and v7x (32 MiB scoped / 64 MiB physical)."""
    for th in (64, 32, 16, 8, 4, 2):
        if H % th == 0 and th * W <= 2048:
            return th
    return 1


# Output-channel permutation that fuses PixelShuffle into the matmul:
#   newcol = 128*i + 64*j + c  holds the original conv channel  c_conv = 4*c + 2*i + j
_PS_PERM = np.array(
    [4 * c + 2 * i + j for i in range(R) for j in range(R) for c in range(COUT // (R * R))],
    dtype=np.int32,
)


def _upsample_kernel(xp_ref, xc_ref, xn_ref, w_ref, a_ref, o_ref, pad_ref):
    # xp_ref/xc_ref/xn_ref: (1, TH, W, 64) bf16 row tiles (previous / current / next)
    # w_ref:   (3, 192, 256) bf16 matmul-ready weights (columns pixel-shuffle-permuted)
    # a_ref:   (1,) f32 PReLU alpha in SMEM
    # o_ref:   (1, TH, 2, W, 128) bf16 lane-dense fused-PixelShuffle output
    # pad_ref: (TH+2, W+2, 64) bf16 VMEM scratch: zero-padded input window
    t = pl.program_id(1)
    nt = pl.num_programs(1)
    TH = xc_ref.shape[1]
    W = xc_ref.shape[2]

    # ---- fused zero padding + row-halo assembly (no host-side jnp.pad pass) ----
    pad_ref[...] = jnp.zeros(pad_ref.shape, pad_ref.dtype)
    pad_ref[1:TH + 1, 1:W + 1, :] = xc_ref[0]

    @pl.when(t > 0)
    def _():  # top halo row from the previous row tile (else stays zero = padding)
        pad_ref[0, 1:W + 1, :] = xp_ref[0, TH - 1]

    @pl.when(t < nt - 1)
    def _():  # bottom halo row from the next row tile (else stays zero = padding)
        pad_ref[TH + 1, 1:W + 1, :] = xn_ref[0, 0]

    # ---- 3x3 conv as 3 MXU matmuls with contraction depth 192 (kx-im2col) ----
    acc = jnp.zeros((TH * W, COUT), jnp.float32)
    for ky in range(K):
        rows = pad_ref[ky:ky + TH, :, :]                      # (TH, W+2, 64), H-slice only
        taps = [rows[:, kx:kx + W, :].reshape(TH * W, CIN) for kx in range(K)]
        patch = jnp.concatenate(taps, axis=-1)                # (TH*W, 192) bf16
        acc = acc + jnp.dot(patch, w_ref[ky], preferred_element_type=jnp.float32)

    # ---- PReLU (single shared alpha => commutes with PixelShuffle) ----
    alpha = a_ref[0]
    acc = jnp.where(acc >= 0.0, acc, alpha * acc)

    # ---- fused PixelShuffle store: lanes [0:128) -> sub-row 2h+0, [128:256) -> 2h+1 ----
    half0 = acc[:, :COUT // 2].reshape(TH, W, COUT // 2)
    half1 = acc[:, COUT // 2:].reshape(TH, W, COUT // 2)
    o_ref[0, :, 0, :, :] = half0.astype(o_ref.dtype)
    o_ref[0, :, 1, :, :] = half1.astype(o_ref.dtype)


def upsample_block_nhwc(x_nhwc, w_oihw, alpha):
    """UpsampleBlock in NHWC: (N, H, W, 64) -> (N, 2H, 2W, 64) bf16 (for chaining)."""
    N, H, W, C = x_nhwc.shape
    assert C == CIN
    TH = _pick_tile_rows(H, W)
    T = H // TH

    x = x_nhwc.astype(jnp.bfloat16)
    # OIHW -> (ky, kx*CIN + cin, cout), columns permuted for the fused PixelShuffle.
    w_k = jnp.transpose(w_oihw, (2, 3, 1, 0)).reshape(K, KW, COUT)
    w_mm = w_k[:, :, _PS_PERM].astype(jnp.bfloat16)
    a = jnp.asarray(alpha, jnp.float32).reshape(1)

    y = pl.pallas_call(
        _upsample_kernel,
        out_shape=jax.ShapeDtypeStruct((N, H, R, W, COUT // R), jnp.bfloat16),
        grid=(N, T),
        in_specs=[
            # previous / current / next row tiles of the same (unpadded) input
            pl.BlockSpec((1, TH, W, CIN), lambda n, t: (n, jnp.maximum(t - 1, 0), 0, 0)),
            pl.BlockSpec((1, TH, W, CIN), lambda n, t: (n, t, 0, 0)),
            pl.BlockSpec((1, TH, W, CIN), lambda n, t: (n, jnp.minimum(t + 1, T - 1), 0, 0)),
            pl.BlockSpec((K, KW, COUT), lambda n, t: (0, 0, 0)),
            pl.BlockSpec(memory_space=pltpu.SMEM),
        ],
        out_specs=pl.BlockSpec((1, TH, R, W, COUT // R), lambda n, t: (n, t, 0, 0, 0)),
        scratch_shapes=[pltpu.VMEM((TH + 2, W + 2, CIN), jnp.bfloat16)],
        compiler_params=pltpu.CompilerParams(
            dimension_semantics=("parallel", "parallel")),
    )(x, x, x, w_mm, a)

    # Free, contiguous reshape: row-major (N, H, 2, W, 128) == NHWC (N, 2H, 2W, 64).
    return y.reshape(N, R * H, R * W, COUT // (R * R))


@jax.jit
def upsample_block(x_nchw, w_oihw, alpha):
    """PyTorch-faithful interface: (N, 64, H, W) -> (N, 64, 2H, 2W)."""
    N, C, H, W = x_nchw.shape
    assert C == CIN
    x_nhwc = jnp.transpose(x_nchw, (0, 2, 3, 1))            # boundary layout conversion
    y = upsample_block_nhwc(x_nhwc, w_oihw, alpha)
    return jnp.transpose(y, (0, 3, 1, 2)).astype(x_nchw.dtype)


if __name__ == "__main__":
    key = jax.random.PRNGKey(0)
    k_x, k_w = jax.random.split(key)

    N, H, W = 2, 24, 16          # small shapes; row tiling TH=8 -> grid (2, 3)
    x = jax.random.normal(k_x, (N, CIN, H, W), dtype=jnp.float32)
    w = jax.random.normal(k_w, (COUT, CIN, K, K), dtype=jnp.float32) * 0.05
    alpha = 0.25                 # nn.PReLU() default init

    out = upsample_block(x, w, alpha)
    out = jax.block_until_ready(out)
    assert out.shape == (N, COUT // (R * R), H * R, W * R)

    # Pure-JAX reference with the same bf16-rounded operands, f32 math.
    xb = x.astype(jnp.bfloat16).astype(jnp.float32)
    wb = w.astype(jnp.bfloat16).astype(jnp.float32)
    conv = jax.lax.conv_general_dilated(
        xb, wb, window_strides=(1, 1), padding=((1, 1), (1, 1)),
        dimension_numbers=("NCHW", "OIHW", "NCHW"),
        precision=jax.lax.Precision.HIGHEST,
    )
    ps = conv.reshape(N, COUT // 4, R, R, H, W)
    ps = jnp.transpose(ps, (0, 1, 4, 2, 5, 3)).reshape(N, COUT // 4, H * R, W * R)
    ref = jnp.where(ps > 0, ps, alpha * ps)

    np.testing.assert_allclose(
        np.asarray(out, dtype=np.float32), np.asarray(ref), rtol=2e-2, atol=2e-2)

    print("KERNEL_OK")
</pallas_src>

<mosaic_0001>
module attributes {stable_mosaic.version = 11 : i64} {
  func.func @_upsample_kernel(%arg0: i32, %arg1: i32, %arg2: memref<1x8x16x64xbf16, #tpu.memory_space<vmem>>, %arg3: memref<1x8x16x64xbf16, #tpu.memory_space<vmem>>, %arg4: memref<1x8x16x64xbf16, #tpu.memory_space<vmem>>, %arg5: memref<3x192x256xbf16, #tpu.memory_space<vmem>>, %arg6: memref<1xf32, #tpu.memory_space<smem>>, %arg7: memref<1x8x2x16x128xbf16, #tpu.memory_space<vmem>>, %arg8: memref<10x18x64xbf16, #tpu.memory_space<vmem>>) attributes {dimension_semantics = [#tpu.dimension_semantics<parallel>, #tpu.dimension_semantics<parallel>], iteration_bounds = array<i64: 2, 3>, scalar_prefetch = 0 : i64, scratch_operands = 1 : i64, tpu.core_type = #tpu.core_type<tc>, window_params = [{transform_indices = @transform_0, window_bounds = array<i64: 1, 8, 16, 64>}, {transform_indices = @transform_1, window_bounds = array<i64: 1, 8, 16, 64>}, {transform_indices = @transform_2, window_bounds = array<i64: 1, 8, 16, 64>}, {pipeline_mode = #tpu.pipeline_mode<synchronous>, transform_indices = @transform_3, window_bounds = array<i64: 3, 192, 256>}, {transform_indices = @transform_4, window_bounds = array<i64: 1>}, {transform_indices = @transform_5, window_bounds = array<i64: 1, 8, 2, 16, 128>}]} {
    %cst = arith.constant 0.000000e+00 : bf16
    %0 = vector.broadcast %cst : bf16 to vector<10x18x64xbf16>
    %c0 = arith.constant 0 : index
    %c0_0 = arith.constant 0 : index
    %c0_1 = arith.constant 0 : index
    %1 = vector.load %arg8[%c0, %c0_0, %c0_1] : memref<10x18x64xbf16, #tpu.memory_space<vmem>>, vector<10x18x64xbf16>
    tpu.vector_store %arg8[%c0, %c0_0, %c0_1], %0 {strides = array<i32>} : memref<10x18x64xbf16, #tpu.memory_space<vmem>>, vector<10x18x64xbf16>,
    %c0_2 = arith.constant 0 : index
    %c0_3 = arith.constant 0 : index
    %c0_4 = arith.constant 0 : index
    %c0_5 = arith.constant 0 : index
    %2 = vector.load %arg3[%c0_2, %c0_3, %c0_4, %c0_5] : memref<1x8x16x64xbf16, #tpu.memory_space<vmem>>, vector<1x8x16x64xbf16>
    %3 = vector.shape_cast %2 : vector<1x8x16x64xbf16> to vector<8x16x64xbf16>
    %c1 = arith.constant 1 : index
    %c1_6 = arith.constant 1 : index
    %c0_7 = arith.constant 0 : index
    %4 = vector.load %arg8[%c1, %c1_6, %c0_7] : memref<10x18x64xbf16, #tpu.memory_space<vmem>>, vector<8x16x64xbf16>
    tpu.vector_store %arg8[%c1, %c1_6, %c0_7], %3 {strides = array<i32>} : memref<10x18x64xbf16, #tpu.memory_space<vmem>>, vector<8x16x64xbf16>,
    %c0_i32 = arith.constant 0 : i32
    %5 = arith.cmpi sgt, %arg1, %c0_i32 : i32
    %6 = arith.extui %5 : i1 to i32
    %c0_i32_8 = arith.constant 0 : i32
    %7 = arith.cmpi ne, %6, %c0_i32_8 : i32
    scf.if %7 {
      %c0_43 = arith.constant 0 : index
      %c7 = arith.constant 7 : index
      %c0_44 = arith.constant 0 : index
      %c0_45 = arith.constant 0 : index
      %66 = vector.load %arg2[%c0_43, %c7, %c0_44, %c0_45] : memref<1x8x16x64xbf16, #tpu.memory_space<vmem>>, vector<1x1x16x64xbf16>
      %67 = vector.shape_cast %66 : vector<1x1x16x64xbf16> to vector<16x64xbf16>
      %c0_46 = arith.constant 0 : index
      %c1_47 = arith.constant 1 : index
      %c0_48 = arith.constant 0 : index
      %68 = vector.load %arg8[%c0_46, %c1_47, %c0_48] : memref<10x18x64xbf16, #tpu.memory_space<vmem>>, vector<1x16x64xbf16>
      %69 = vector.shape_cast %68 : vector<1x16x64xbf16> to vector<16x64xbf16>
      %70 = vector.shape_cast %67 : vector<16x64xbf16> to vector<1x16x64xbf16>
      tpu.vector_store %arg8[%c0_46, %c1_47, %c0_48], %70 {strides = array<i32>} : memref<10x18x64xbf16, #tpu.memory_space<vmem>>, vector<1x16x64xbf16>,
    } else {
    }
    %c2_i32 = arith.constant 2 : i32
    %8 = arith.cmpi slt, %arg1, %c2_i32 : i32
    %9 = arith.extui %8 : i1 to i32
    %c0_i32_9 = arith.constant 0 : i32
    %10 = arith.cmpi ne, %9, %c0_i32_9 : i32
    scf.if %10 {
      %c0_43 = arith.constant 0 : index
      %c0_44 = arith.constant 0 : index
      %c0_45 = arith.constant 0 : index
      %c0_46 = arith.constant 0 : index
      %66 = vector.load %arg4[%c0_43, %c0_44, %c0_45, %c0_46] : memref<1x8x16x64xbf16, #tpu.memory_space<vmem>>, vector<1x1x16x64xbf16>
      %67 = vector.shape_cast %66 : vector<1x1x16x64xbf16> to vector<16x64xbf16>
      %c9 = arith.constant 9 : index
      %c1_47 = arith.constant 1 : index
      %c0_48 = arith.constant 0 : index
      %68 = vector.load %arg8[%c9, %c1_47, %c0_48] : memref<10x18x64xbf16, #tpu.memory_space<vmem>>, vector<1x16x64xbf16>
      %69 = vector.shape_cast %68 : vector<1x16x64xbf16> to vector<16x64xbf16>
      %70 = vector.shape_cast %67 : vector<16x64xbf16> to vector<1x16x64xbf16>
      tpu.vector_store %arg8[%c9, %c1_47, %c0_48], %70 {strides = array<i32>} : memref<10x18x64xbf16, #tpu.memory_space<vmem>>, vector<1x16x64xbf16>,
    } else {
    }
    %cst_10 = arith.constant 0.000000e+00 : f32
    %11 = vector.broadcast %cst_10 : f32 to vector<128x256xf32>
    %c0_11 = arith.constant 0 : index
    %c0_12 = arith.constant 0 : index
    %c0_13 = arith.constant 0 : index
    %12 = vector.load %arg8[%c0_11, %c0_12, %c0_13] : memref<10x18x64xbf16, #tpu.memory_space<vmem>>, vector<8x18x64xbf16>
    %13 = vector.extract_strided_slice %12 {offsets = [0, 0, 0], sizes = [8, 16, 64], strides = [1, 1, 1]} : vector<8x18x64xbf16> to vector<8x16x64xbf16>
    %14 = vector.shape_cast %13 : vector<8x16x64xbf16> to vector<128x64xbf16>
    %15 = vector.extract_strided_slice %12 {offsets = [0, 1, 0], sizes = [8, 16, 64], strides = [1, 1, 1]} : vector<8x18x64xbf16> to vector<8x16x64xbf16>
    %16 = vector.shape_cast %15 : vector<8x16x64xbf16> to vector<128x64xbf16>
    %17 = vector.extract_strided_slice %12 {offsets = [0, 2, 0], sizes = [8, 16, 64], strides = [1, 1, 1]} : vector<8x18x64xbf16> to vector<8x16x64xbf16>
    %18 = vector.shape_cast %17 : vector<8x16x64xbf16> to vector<128x64xbf16>
    %19 = tpu.concatenate %14, %16, %18 in 1 : vector<128x64xbf16>, vector<128x64xbf16>, vector<128x64xbf16> -> vector<128x192xbf16>
    %c0_14 = arith.constant 0 : index
    %c0_15 = arith.constant 0 : index
    %c0_16 = arith.constant 0 : index
    %20 = vector.load %arg5[%c0_14, %c0_15, %c0_16] : memref<3x192x256xbf16, #tpu.memory_space<vmem>>, vector<1x192x256xbf16>
    %21 = vector.shape_cast %20 : vector<1x192x256xbf16> to vector<192x256xbf16>
    %cst_17 = arith.constant dense<0.000000e+00> : vector<128x256xf32>
    %22 = tpu.matmul %19, %21, %cst_17 {dimension_numbers = #tpu.dot_dimension_numbers<[1], [0], [0], [1], [0, 0, 1, 1], [], []>} : vector<128x192xbf16>, vector<192x256xbf16>, vector<128x256xf32> -> vector<128x256xf32>
    %23 = arith.addf %11, %22 : vector<128x256xf32>
    %c1_18 = arith.constant 1 : index
    %c0_19 = arith.constant 0 : index
    %c0_20 = arith.constant 0 : index
    %24 = vector.load %arg8[%c1_18, %c0_19, %c0_20] : memref<10x18x64xbf16, #tpu.memory_space<vmem>>, vector<8x18x64xbf16>
    %25 = vector.extract_strided_slice %24 {offsets = [0, 0, 0], sizes = [8, 16, 64], strides = [1, 1, 1]} : vector<8x18x64xbf16> to vector<8x16x64xbf16>
    %26 = vector.shape_cast %25 : vector<8x16x64xbf16> to vector<128x64xbf16>
    %27 = vector.extract_strided_slice %24 {offsets = [0, 1, 0], sizes = [8, 16, 64], strides = [1, 1, 1]} : vector<8x18x64xbf16> to vector<8x16x64xbf16>
    %28 = vector.shape_cast %27 : vector<8x16x64xbf16> to vector<128x64xbf16>
    %29 = vector.extract_strided_slice %24 {offsets = [0, 2, 0], sizes = [8, 16, 64], strides = [1, 1, 1]} : vector<8x18x64xbf16> to vector<8x16x64xbf16>
    %30 = vector.shape_cast %29 : vector<8x16x64xbf16> to vector<128x64xbf16>
    %31 = tpu.concatenate %26, %28, %30 in 1 : vector<128x64xbf16>, vector<128x64xbf16>, vector<128x64xbf16> -> vector<128x192xbf16>
    %c1_21 = arith.constant 1 : index
    %c0_22 = arith.constant 0 : index
    %c0_23 = arith.constant 0 : index
    %32 = vector.load %arg5[%c1_21, %c0_22, %c0_23] : memref<3x192x256xbf16, #tpu.memory_space<vmem>>, vector<1x192x256xbf16>
    %33 = vector.shape_cast %32 : vector<1x192x256xbf16> to vector<192x256xbf16>
    %cst_24 = arith.constant dense<0.000000e+00> : vector<128x256xf32>
    %34 = tpu.matmul %31, %33, %cst_24 {dimension_numbers = #tpu.dot_dimension_numbers<[1], [0], [0], [1], [0, 0, 1, 1], [], []>} : vector<128x192xbf16>, vector<192x256xbf16>, vector<128x256xf32> -> vector<128x256xf32>
    %35 = arith.addf %23, %34 : vector<128x256xf32>
    %c2 = arith.constant 2 : index
    %c0_25 = arith.constant 0 : index
    %c0_26 = arith.constant 0 : index
    %36 = vector.load %arg8[%c2, %c0_25, %c0_26] : memref<10x18x64xbf16, #tpu.memory_space<vmem>>, vector<8x18x64xbf16>
    %37 = vector.extract_strided_slice %36 {offsets = [0, 0, 0], sizes = [8, 16, 64], strides = [1, 1, 1]} : vector<8x18x64xbf16> to vector<8x16x64xbf16>
    %38 = vector.shape_cast %37 : vector<8x16x64xbf16> to vector<128x64xbf16>
    %39 = vector.extract_strided_slice %36 {offsets = [0, 1, 0], sizes = [8, 16, 64], strides = [1, 1, 1]} : vector<8x18x64xbf16> to vector<8x16x64xbf16>
    %40 = vector.shape_cast %39 : vector<8x16x64xbf16> to vector<128x64xbf16>
    %41 = vector.extract_strided_slice %36 {offsets = [0, 2, 0], sizes = [8, 16, 64], strides = [1, 1, 1]} : vector<8x18x64xbf16> to vector<8x16x64xbf16>
    %42 = vector.shape_cast %41 : vector<8x16x64xbf16> to vector<128x64xbf16>
    %43 = tpu.concatenate %38, %40, %42 in 1 : vector<128x64xbf16>, vector<128x64xbf16>, vector<128x64xbf16> -> vector<128x192xbf16>
    %c2_27 = arith.constant 2 : index
    %c0_28 = arith.constant 0 : index
    %c0_29 = arith.constant 0 : index
    %44 = vector.load %arg5[%c2_27, %c0_28, %c0_29] : memref<3x192x256xbf16, #tpu.memory_space<vmem>>, vector<1x192x256xbf16>
    %45 = vector.shape_cast %44 : vector<1x192x256xbf16> to vector<192x256xbf16>
    %cst_30 = arith.constant dense<0.000000e+00> : vector<128x256xf32>
    %46 = tpu.matmul %43, %45, %cst_30 {dimension_numbers = #tpu.dot_dimension_numbers<[1], [0], [0], [1], [0, 0, 1, 1], [], []>} : vector<128x192xbf16>, vector<192x256xbf16>, vector<128x256xf32> -> vector<128x256xf32>
    %47 = arith.addf %35, %46 : vector<128x256xf32>
    %c0_31 = arith.constant 0 : index
    %48 = memref.load %arg6[%c0_31] : memref<1xf32, #tpu.memory_space<smem>>
    %cst_32 = arith.constant 0.000000e+00 : f32
    %49 = vector.broadcast %cst_32 : f32 to vector<128x256xf32>
    %50 = arith.cmpf oge, %47, %49 : vector<128x256xf32>
    %51 = vector.broadcast %48 : f32 to vector<128x256xf32>
    %52 = arith.mulf %51, %47 : vector<128x256xf32>
    %53 = arith.select %50, %47, %52 : vector<128x256xi1>, vector<128x256xf32>
    %54 = vector.extract_strided_slice %53 {offsets = [0, 0], sizes = [128, 128], strides = [1, 1]} : vector<128x256xf32> to vector<128x128xf32>
    %55 = vector.shape_cast %54 : vector<128x128xf32> to vector<8x16x128xf32>
    %56 = vector.extract_strided_slice %53 {offsets = [0, 128], sizes = [128, 128], strides = [1, 1]} : vector<128x256xf32> to vector<128x128xf32>
    %57 = vector.shape_cast %56 : vector<128x128xf32> to vector<8x16x128xf32>
    %58 = arith.truncf %55 : vector<8x16x128xf32> to vector<8x16x128xbf16>
    %c0_33 = arith.constant 0 : index
    %c0_34 = arith.constant 0 : index
    %c0_35 = arith.constant 0 : index
    %c0_36 = arith.constant 0 : index
    %c0_37 = arith.constant 0 : index
    %59 = vector.load %arg7[%c0_33, %c0_34, %c0_35, %c0_36, %c0_37] : memref<1x8x2x16x128xbf16, #tpu.memory_space<vmem>>, vector<1x8x1x16x128xbf16>
    %60 = vector.shape_cast %59 : vector<1x8x1x16x128xbf16> to vector<8x16x128xbf16>
    %61 = vector.shape_cast %58 : vector<8x16x128xbf16> to vector<1x8x1x16x128xbf16>
    tpu.vector_store %arg7[%c0_33, %c0_34, %c0_35, %c0_36, %c0_37], %61 {strides = array<i32>} : memref<1x8x2x16x128xbf16, #tpu.memory_space<vmem>>, vector<1x8x1x16x128xbf16>,
    %62 = arith.truncf %57 : vector<8x16x128xf32> to vector<8x16x128xbf16>
    %c0_38 = arith.constant 0 : index
    %c0_39 = arith.constant 0 : index
    %c1_40 = arith.constant 1 : index
    %c0_41 = arith.constant 0 : index
    %c0_42 = arith.constant 0 : index
    %63 = vector.load %arg7[%c0_38, %c0_39, %c1_40, %c0_41, %c0_42] : memref<1x8x2x16x128xbf16, #tpu.memory_space<vmem>>, vector<1x8x1x16x128xbf16>
    %64 = vector.shape_cast %63 : vector<1x8x1x16x128xbf16> to vector<8x16x128xbf16>
    %65 = vector.shape_cast %62 : vector<8x16x128xbf16> to vector<1x8x1x16x128xbf16>
    tpu.vector_store %arg7[%c0_38, %c0_39, %c1_40, %c0_41, %c0_42], %65 {strides = array<i32>} : memref<1x8x2x16x128xbf16, #tpu.memory_space<vmem>>, vector<1x8x1x16x128xbf16>,
    return
  }
  func.func @transform_0(%arg0: i32, %arg1: i32) -> (i32, i32, i32, i32) {
    %c1_i32 = arith.constant 1 : i32
    %0 = arith.subi %arg1, %c1_i32 : i32
    %c0_i32 = arith.constant 0 : i32
    %1 = arith.maxsi %0, %c0_i32 : i32
    %c0_i32_0 = arith.constant 0 : i32
    %c0_i32_1 = arith.constant 0 : i32
    %c0_i32_2 = arith.constant 0 : i32
    return %arg0, %1, %c0_i32_0, %c0_i32_1 : i32, i32, i32, i32
  }
  func.func @transform_1(%arg0: i32, %arg1: i32) -> (i32, i32, i32, i32) {
    %c0_i32 = arith.constant 0 : i32
    %c0_i32_0 = arith.constant 0 : i32
    %c0_i32_1 = arith.constant 0 : i32
    return %arg0, %arg1, %c0_i32, %c0_i32_0 : i32, i32, i32, i32
  }
  func.func @transform_2(%arg0: i32, %arg1: i32) -> (i32, i32, i32, i32) {
    %c1_i32 = arith.constant 1 : i32
    %0 = arith.addi %arg1, %c1_i32 : i32
    %c2_i32 = arith.constant 2 : i32
    %1 = arith.minsi %0, %c2_i32 : i32
    %c0_i32 = arith.constant 0 : i32
    %c0_i32_0 = arith.constant 0 : i32
    %c0_i32_1 = arith.constant 0 : i32
    return %arg0, %1, %c0_i32, %c0_i32_0 : i32, i32, i32, i32
  }
  func.func @transform_3(%arg0: i32, %arg1: i32) -> (i32, i32, i32) {
    %c0_i32 = arith.constant 0 : i32
    %c0_i32_0 = arith.constant 0 : i32
    %c0_i32_1 = arith.constant 0 : i32
    %c0_i32_2 = arith.constant 0 : i32
    return %c0_i32, %c0_i32_0, %c0_i32_1 : i32, i32, i32
  }
  func.func @transform_4(%arg0: i32, %arg1: i32) -> i32 {
    %c0_i32 = arith.constant 0 : i32
    %c0_i32_0 = arith.constant 0 : i32
    return %c0_i32 : i32
  }
  func.func @transform_5(%arg0: i32, %arg1: i32) -> (i32, i32, i32, i32, i32) {
    %c0_i32 = arith.constant 0 : i32
    %c0_i32_0 = arith.constant 0 : i32
    %c0_i32_1 = arith.constant 0 : i32
    %c0_i32_2 = arith.constant 0 : i32
    return %arg0, %arg1, %c0_i32, %c0_i32_0, %c0_i32_1 : i32, i32, i32, i32, i32
  }
}

</mosaic_0001>

<bundles_post_ra>
// kernel: upsample_block.1
= control target key start
LH: loop header
LB: loop body
LE: loop exit
PB: predicated region body
PF: predicated region fallthrough
CT: control target
= control target key end

     0   :  { %s4275_s20 = smov 0   ;;  %s4277_s21 = smov 0   ;;  %s6018_s0 = inlined_call_operand.vmem [shape: bf16[2,24,16,64], index: 0, kind: input, shape index: {}, may-alias: {0,1,2}]   ;;  %s6019_s1 = inlined_call_operand.vmem [shape: bf16[2,24,16,64], index: 1, kind: input, shape index: {}, may-alias: {0,1,2}]   ;;  %s6020_s2 = inlined_call_operand.vmem [shape: bf16[2,24,16,64], index: 2, kind: input, shape index: {}, may-alias: {0,1,2}]   ;;  %s6021_s3 = inlined_call_operand.vmem [shape: bf16[3,192,256], index: 3, kind: input, shape index: {}]   ;;  %s6022_s4 = inlined_call_operand.<no memory space> [shape: f32[1], index: 4, kind: input, shape index: {}]   ;;  %s6023_s5 = inlined_call_operand.vmem [shape: bf16[2,24,2,16,128], index: 5, kind: output, shape index: {}]  }
   0x1   :  { %10 = sst [smem:[#allocation3]] %s6022_s4  ;;  %s4279_s22 = smov 0  }
   0x2   :  { %s4281_s23 = smov 0   ;;  %s4283_s24 = smov 0  }
   0x3 LB: > { %s25_s4 = sadd.s32 1, %s4230_s22  ;;  %s28_s25 = sadd.s32 1, %s4234_s23  ;;  %s4238_s24 = sphi %s4283_s24, %s16_s24   ;;  %s4234_s23 = sphi %s4281_s23, %s6102_s23   ;;  %s4230_s22 = sphi %s4279_s22, %s6101_s22   ;;  %s4226_s21 = sphi %s4277_s21, %s6100_s21   ;;  %s4222_s20 = sphi %s4275_s20, %s6099_s20  }
   0x4   : > { %p26_p0 = scmp.ge.s32.totalorder %s25_s4, 3  ;;  %p3424_p1 = scmp.ge.s32.totalorder %s4238_s24, 1 }
   0x5   : > { %p270_p2 = scmp.lt.s32.totalorder %s4238_s24, 7 }
   0x6   : > { %s6104_s4 = smov (%p26_p0, %s25_s4), 0  ;;  %s6106_s25 = smov (!%p26_p0, %s28_s25), %s4234_s23 }
   0x7   : > { %p271_p3 = pnand %p3424_p1, %p270_p2  ;;  %p30_p4 = scmp.ge.s32.totalorder %s6106_s25, 2 }
   0x9   : > { %s6108_s25 = smov (%p30_p4, %s6106_s25), 0  ;;  %274 = sbr.rel (%p271_p3) target bundleno = 751 (0x2ef), region = 40 }
   0xe   : > { %vm391_vm0 = vcmask 519168   ;;  %s3425_s26 = sadd.s32 4294967295, %s4222_s20  ;;  %p338_p5 = scmp.lt.s32.totalorder %s4226_s21, 1  ;;  %v4240_v0 = vmov 0   ;;  %vm394_vm1 = vcmask 516096  }
   0xf   : > { %396 = vst.msk [vmem:[#allocation2 + $0xc] sm:$0xf] %vm391_vm0, %v4240_v0  ;;  %p335_p6 = scmp.gt.s32.totalorder %s3425_s26, 0  ;;  %s3429_s27 = sshll.u32 %s4222_s20, 3  ;;  %vm604_vm2 = vsmask.f32 7938 }
  0x10   : > { %392 = vst.msk [vmem:[#allocation2] sm:$0xf] %vm391_vm0, %v4240_v0  ;;  %s6110_s21 = smov (!%p338_p5, %s4226_s21), 1  ;;  %p354_p7 = scmp.lt.s32.totalorder %s3429_s27, 23  ;;  %vm439_vm3 = vsmask.f32 256  ;;  %vm4404_vm5 = vmand %vm391_vm0, %vm604_vm2 }
  0x11   : > { %393 = vst.msk [vmem:[#allocation2 + $0x4] sm:$0xf] %vm391_vm0, %v4240_v0  ;;  %s6112_s26 = smov (!%p335_p6, %s3425_s26), 0  ;;  %s4320_s28 = smul.u32 48, %s6110_s21  ;;  %vm440_vm4 = vsmask.f32 4368  ;;  %vm4420_vm7 = vmand %vm394_vm1, %vm439_vm3 }
  0x12   : > { %397 = vst.msk [vmem:[#allocation2 + $0x10] sm:$0xf] %vm391_vm0, %v4240_v0  ;;  %s3426_s29 = sshll.u32 %s6112_s26, 3  ;;  %s362_s30 = sadd.s32 1, %s4222_s20  ;;  %vm4412_vm6 = vmor %vm439_vm3, %vm440_vm4 }
  0x13   : > { %399 = vst.msk [vmem:[#allocation2 + $0x18] sm:$0xf] %vm391_vm0, %v4240_v0  ;;  %p340_p8 = scmp.lt.s32.totalorder %s3426_s29, 23  ;;  %p4327_p9 = scmp.lt.s32.totalorder %s362_s30, 2 }
  0x14   : > { %400 = vst.msk [vmem:[#allocation2 + $0x1c] sm:$0xf] %vm391_vm0, %v4240_v0  ;;  %s6114_s27 = smov (!%p354_p7, %s3429_s27), 23  ;;  %s4156_s26 = smul.u32 96, %s6110_s21 }
  0x15   : > { %402 = vst.msk [vmem:[#allocation2 + $0x24] sm:$0xf] %vm391_vm0, %v4240_v0  ;;  %s6116_s29 = smov (!%p340_p8, %s3426_s29), 23  ;;  %s3430_s7 = sshll.u32 %s6114_s27, 1 }
  0x16   : > { %403 = vst.msk [vmem:[#allocation2 + $0x28] sm:$0xf] %vm391_vm0, %v4240_v0  ;;  %s3436_s8 = sshll.u32 %s6114_s27, 2  ;;  %s3427_s9 = sshll.u32 %s6116_s29, 1  ;;  %v606_v17 = vld [vmem:[#allocation2 + $0xc] sm:$0xf] }
  0x17   : > { %405 = vst.msk [vmem:[#allocation2 + $0x30] sm:$0xf] %vm391_vm0, %v4240_v0  ;;  %s358_s10 = sadd.s32 %s4320_s28, %s3430_s7  ;;  %s344_s11 = sadd.s32 %s4320_s28, %s3427_s9 }
  0x18   : > { %406 = vst.msk [vmem:[#allocation2 + $0x34] sm:$0xf] %vm391_vm0, %v4240_v0  ;;  %s3431_s12 = sshll.u32 %s358_s10, 2  ;;  %s3428_s13 = sshll.u32 %s344_s11, 2 }
  0x19   : > { %408 = vst.msk [vmem:[#allocation2 + $0x3c] sm:$0xf] %vm391_vm0, %v4240_v0  ;;  %s4348_s16 = scalar_lea.vmem %s6019_s1, %s3431_s12  ;;  %s4355_s19 = scalar_lea.vmem %s6018_s0, %s3428_s13 }
  0x1a   : > { %409 = vst.msk [vmem:[#allocation2 + $0x40] sm:$0xf] %vm391_vm0, %v4240_v0  ;;  %v423_v1 = vld [vmem:[%s4348_s16] sm:$0xf]  ;;  %s6118_s30 = smov (!%p4327_p9, %s362_s30), 2  ;;  %s386_s27 = sadd.s32 %s4156_s26, %s3436_s8 }
  0x1b   : > { %411 = vst.msk [vmem:[#allocation2 + $0x48] sm:$0xf] %vm391_vm0, %v4240_v0  ;;  %v443_v2 = vshrl.u32 %v423_v1, 16  ;;  %v424_v3 = vld [vmem:[%s4348_s16 + $0x4] sm:$0xf]  ;;  %s3432_s29 = sshll.u32 %s6118_s30, 3 }
  0x1c   : > { %412 = vst.msk [vmem:[#allocation2 + $0x4c] sm:$0xf] %vm391_vm0, %v4240_v0  ;;  %v425_v4 = vld [vmem:[%s4348_s16 + $0x8] sm:$0xf]  ;;  %s3437_s21 = sshll.u32 %s386_s27, 2  ;;  %v451_v5 = vshrl.u32 %v424_v3, 16 }
  0x1d   : > { %414 = vst.msk [vmem:[#allocation2 + $0x54] sm:$0xf] %vm391_vm0, %v4240_v0  ;;  %p368_p10 = scmp.lt.s32.totalorder %s3432_s29, 23  ;;  %s4374_s9 = scalar_lea.vmem %s6023_s5, %s3437_s21  ;;  %v460_v6 = vshrl.u32 %v425_v4, 16  ;;  %v426_v7 = vld [vmem:[%s4348_s16 + $0xc] sm:$0xf] }
  0x1e   : > { %415 = vst.msk [vmem:[#allocation2 + $0x58] sm:$0xf] %vm391_vm0, %v4240_v0  ;;  %v445_v8 = vrot.slane %v443_v2, 7  ;;  %v446_v9 = vshll.u32 %v423_v1, 16  ;;  %v468_v10 = vshrl.u32 %v426_v7, 16  ;;  %v453_v11 = vrot.slane %v451_v5, 7 }
  0x1f   : > { %417 = vst.msk [vmem:[#allocation2 + $0x60] sm:$0xf] %vm391_vm0, %v4240_v0  ;;  %s6120_s29 = smov (!%p368_p10, %s3432_s29), 23  ;;  %v454_v12 = vshll.u32 %v424_v3, 16  ;;  %v427_v13 = vld [vmem:[%s4348_s16 + $0x10] sm:$0xf] }
  0x20   : > { %418 = vst.msk [vmem:[#allocation2 + $0x64] sm:$0xf] %vm391_vm0, %v4240_v0  ;;  %s3433_s30 = sshll.u32 %s6120_s29, 1  ;;  %v462_v14 = vrot.slane %v460_v6, 7  ;;  %v463_v15 = vshll.u32 %v425_v4, 16  ;;  %v477_v16 = vshrl.u32 %v427_v13, 16  ;;  %v448_v21 = vor.u32 %v446_v9, %v445_v8 }
  0x21   : > { %420 = vst.msk [vmem:[#allocation2 + $0x6c] sm:$0xf] %vm391_vm0, %v4240_v0  ;;  %s372_s8 = sadd.s32 %s4320_s28, %s3433_s30  ;;  %v449_v18 = vrot.slane %v445_v8, 4  ;;  %v470_v19 = vrot.slane %v468_v10, 7  ;;  %v471_v20 = vshll.u32 %v426_v7, 16  ;;  %v456_v22 = vor.u32 %v454_v12, %v453_v11  ;;  %p3438_p11 = scmp.le.s32.totalorder %s4222_s20, 0 }
  0x22   : > { %421 = vst.msk [vmem:[#allocation2 + $0x70] sm:$0xf] %vm391_vm0, %v4240_v0  ;;  %s3434_s10 = sshll.u32 %s372_s8, 2  ;;  %v615_v23 = vld [vmem:[#allocation2 + $0x18] sm:$0xf]  ;;  %v458_v27 = vrot.slane %v453_v11, 4  ;;  %v465_v28 = vor.u32 %v463_v15, %v462_v14  ;;  %v607_v41 = vsel %vm4404_vm5, %v448_v21, %v606_v17 }
  0x23   : > { %398 = vst.msk [vmem:[#allocation2 + $0x14] sm:$0x1] %vm394_vm1, %v4240_v0  ;;  %s4396_s13 = scalar_lea.vmem %s6020_s2, %s3434_s10  ;;  %v428_v24 = vld [vmem:[%s4348_s16 + $0x14] sm:$0xf]  ;;  %v429_v25 = vld [vmem:[%s4348_s16 + $0x18] sm:$0xf]  ;;  %v473_v37 = vor.u32 %v471_v20, %v470_v19  ;;  %v457_v45 = vsel %vm4412_vm6, %v449_v18, %v456_v22 }
  0x24   : > { %395 = vst.msk [vmem:[#allocation2 + $0x8] sm:$0x1] %vm394_vm1, %v4240_v0  ;;  %v466_v29 = vrot.slane %v462_v14, 4  ;;  %v485_v30 = vshrl.u32 %v428_v24, 16  ;;  %v479_v32 = vrot.slane %v477_v16, 7  ;;  %v480_v33 = vshll.u32 %v427_v13, 16 }
  0x25   : > { %401 = vst.msk [vmem:[#allocation2 + $0x20] sm:$0x1] %vm394_vm1, %v4240_v0  ;;  %v488_v34 = vshll.u32 %v428_v24, 16  ;;  %v494_v35 = vshrl.u32 %v429_v25, 16  ;;  %v497_v39 = vshll.u32 %v429_v25, 16  ;;  %v616_v46 = vsel %vm4404_vm5, %v465_v28, %v615_v23 }
  0x26   : > { %404 = vst.msk [vmem:[#allocation2 + $0x2c] sm:$0x1] %vm394_vm1, %v4240_v0  ;;  %v487_v38 = vrot.slane %v485_v30, 7  ;;  %v430_v40 = vld [vmem:[%s4348_s16 + $0x1c] sm:$0xf]  ;;  %v475_v47 = vrot.slane %v470_v19, 4  ;;  %v482_v52 = vor.u32 %v480_v33, %v479_v32  ;;  %v474_v55 = vsel %vm4412_vm6, %v466_v29, %v473_v37 }
  0x27   : > { %407 = vst.msk [vmem:[#allocation2 + $0x38] sm:$0x1] %vm394_vm1, %v4240_v0  ;;  %v496_v43 = vrot.slane %v494_v35, 7  ;;  %v502_v44 = vshrl.u32 %v430_v40, 16  ;;  %v622_v48 = vld [vmem:[#allocation2 + $0x24] sm:$0xf] }
  0x28   : > { %410 = vst.msk [vmem:[#allocation2 + $0x44] sm:$0x1] %vm394_vm1, %v4240_v0  ;;  %v431_v49 = vld [vmem:[%s4348_s16 + $0x20] sm:$0xf]  ;;  %v505_v54 = vshll.u32 %v430_v40, 16  ;;  %v483_v56 = vrot.slane %v479_v32, 4  ;;  %v490_v57 = vor.u32 %v488_v34, %v487_v38  ;;  %v623_v4 = vsel %vm4404_vm5, %v482_v52, %v622_v48 }
  0x29   : > { %413 = vst.msk [vmem:[#allocation2 + $0x50] sm:$0x1] %vm394_vm1, %v4240_v0  ;;  %v504_v53 = vrot.slane %v502_v44, 7  ;;  %v629_v58 = vld [vmem:[#allocation2 + $0x30] sm:$0xf]  ;;  %v511_v59 = vshrl.u32 %v431_v49, 16  ;;  %v499_v61 = vor.u32 %v497_v39, %v496_v43 }
  0x2a   : > { %416 = vst.msk [vmem:[#allocation2 + $0x5c] sm:$0x1] %vm394_vm1, %v4240_v0  ;;  %v612_v42 = vld [vmem:[#allocation2 + $0x14] sm:$0x1]  ;;  %v492_v60 = vrot.slane %v487_v38, 4  ;;  %v500_v62 = vrot.slane %v496_v43, 4  ;;  %v491_v8 = vsel %vm4412_vm6, %v483_v56, %v490_v57 }
  0x2b   : > { %419 = vst.msk [vmem:[#allocation2 + $0x68] sm:$0x1] %vm394_vm1, %v4240_v0  ;;  %v613_v50 = vsel %vm4420_vm7, %v458_v27, %v612_v42  ;;  %v514_v63 = vshll.u32 %v431_v49, 16  ;;  %v509_v2 = vrot.slane %v504_v53, 4  ;;  %v513_v3 = vrot.slane %v511_v59, 7 }
  0x2c   : > { %422 = vst.msk [vmem:[#allocation2 + $0x74] sm:$0x1] %vm394_vm1, %v4240_v0  ;;  %v619_v51 = vld [vmem:[#allocation2 + $0x20] sm:$0x1]  ;;  %v507_v5 = vor.u32 %v505_v54, %v504_v53  ;;  %v432_v7 = vld [vmem:[%s4348_s16 + $0x24] sm:$0xf]  ;;  %v630_v13 = vsel %vm4404_vm5, %v499_v61, %v629_v58 }
  0x2d   : > { %608 = vst [vmem:[#allocation2 + $0xc] sm:$0xf] %v607_v41  ;;  %v620_v0 = vsel %vm4420_vm7, %v475_v47, %v619_v51  ;;  %v626_v1 = vld [vmem:[#allocation2 + $0x2c] sm:$0x1]  ;;  %v636_v9 = vld [vmem:[#allocation2 + $0x3c] sm:$0xf]  ;;  %v516_v14 = vor.u32 %v514_v63, %v513_v3 }
  0x2e   : > { %609 = vst.msk [vmem:[#allocation2 + $0x10] sm:$0xf] %vm391_vm0, %v457_v45  ;;  %v633_v6 = vld [vmem:[#allocation2 + $0x38] sm:$0x1]  ;;  %v519_v10 = vshrl.u32 %v432_v7, 16  ;;  %v522_v11 = vshll.u32 %v432_v7, 16  ;;  %v627_v12 = vsel %vm4420_vm7, %v492_v60, %v626_v1  ;;  %v508_v21 = vsel %vm4412_vm6, %v500_v62, %v507_v5 }
  0x2f   : > { %614 = vst [vmem:[#allocation2 + $0x14] sm:$0x1] %v613_v50  ;;  %v640_v15 = vld [vmem:[#allocation2 + $0x44] sm:$0x1]  ;;  %v433_v16 = vld [vmem:[%s4348_s16 + $0x28] sm:$0xf]  ;;  %v634_v22 = vsel %vm4420_vm7, %v509_v2, %v633_v6  ;;  %v637_v30 = vsel %vm4404_vm5, %v516_v14, %v636_v9 }
  0x30   : > { %617 = vst [vmem:[#allocation2 + $0x18] sm:$0xf] %v616_v46  ;;  %v517_v17 = vrot.slane %v513_v3, 4  ;;  %v521_v18 = vrot.slane %v519_v10, 7  ;;  %v528_v19 = vshrl.u32 %v433_v16, 16  ;;  %v531_v20 = vshll.u32 %v433_v16, 16 }
  0x31   : > { %618 = vst.msk [vmem:[#allocation2 + $0x1c] sm:$0xf] %vm391_vm0, %v474_v55  ;;  %v643_v23 = vld [vmem:[#allocation2 + $0x48] sm:$0xf]  ;;  %v434_v24 = vld [vmem:[%s4348_s16 + $0x2c] sm:$0xf] }
  0x32   : > { %621 = vst [vmem:[#allocation2 + $0x20] sm:$0x1] %v620_v0  ;;  %v524_v25 = vor.u32 %v522_v11, %v521_v18  ;;  %v526_v27 = vrot.slane %v521_v18, 4  ;;  %v530_v28 = vrot.slane %v528_v19, 7  ;;  %v536_v29 = vshrl.u32 %v434_v24, 16 }
  0x33   : > { %624 = vst [vmem:[#allocation2 + $0x24] sm:$0xf] %v623_v4  ;;  %v539_v32 = vshll.u32 %v434_v24, 16  ;;  %v435_v33 = vld [vmem:[%s4348_s16 + $0x30] sm:$0xf] }
  0x34   : > { %625 = vst.msk [vmem:[#allocation2 + $0x28] sm:$0xf] %vm391_vm0, %v491_v8  ;;  %v525_v34 = vsel %vm4412_vm6, %v517_v17, %v524_v25  ;;  %v641_v35 = vsel %vm4420_vm7, %v526_v27, %v640_v15  ;;  %v533_v37 = vor.u32 %v531_v20, %v530_v28  ;;  %v647_v38 = vld [vmem:[#allocation2 + $0x50] sm:$0x1]  ;;  %v534_v39 = vrot.slane %v530_v28, 4 }
  0x35   : > { %628 = vst [vmem:[#allocation2 + $0x2c] sm:$0x1] %v627_v12  ;;  %v538_v40 = vrot.slane %v536_v29, 7  ;;  %v545_v41 = vshrl.u32 %v435_v33, 16  ;;  %v548_v42 = vshll.u32 %v435_v33, 16 }
  0x36   : > { %631 = vst [vmem:[#allocation2 + $0x30] sm:$0xf] %v630_v13  ;;  %v644_v43 = vsel %vm4404_vm5, %v533_v37, %v643_v23  ;;  %v650_v44 = vld [vmem:[#allocation2 + $0x54] sm:$0xf]  ;;  %v437_v51 = vld [vmem:[%s4348_s16 + $0x38] sm:$0xf] }
  0x37   : > { %632 = vst.msk [vmem:[#allocation2 + $0x34] sm:$0xf] %vm391_vm0, %v508_v21  ;;  %v436_v45 = vld [vmem:[%s4348_s16 + $0x34] sm:$0xf]  ;;  %v541_v46 = vor.u32 %v539_v32, %v538_v40  ;;  %v543_v47 = vrot.slane %v538_v40, 4  ;;  %v547_v48 = vrot.slane %v545_v41, 7 }
  0x38   : > { %635 = vst [vmem:[#allocation2 + $0x38] sm:$0x1] %v634_v22  ;;  %v553_v49 = vshrl.u32 %v436_v45, 16  ;;  %v556_v50 = vshll.u32 %v436_v45, 16  ;;  %v562_v57 = vshrl.u32 %v437_v51, 16  ;;  %v565_v58 = vshll.u32 %v437_v51, 16 }
  0x39   : > { %638 = vst [vmem:[#allocation2 + $0x3c] sm:$0xf] %v637_v30  ;;  %v542_v52 = vsel %vm4412_vm6, %v534_v39, %v541_v46  ;;  %v648_v53 = vsel %vm4420_vm7, %v543_v47, %v647_v38  ;;  %v550_v54 = vor.u32 %v548_v42, %v547_v48  ;;  %v551_v55 = vrot.slane %v547_v48, 4  ;;  %v654_v60 = vld [vmem:[#allocation2 + $0x5c] sm:$0x1] }
  0x3a   : > { %639 = vst.msk [vmem:[#allocation2 + $0x40] sm:$0xf] %vm391_vm0, %v525_v34  ;;  %v555_v56 = vrot.slane %v553_v49, 7  ;;  %v438_v61 = vld [vmem:[%s4348_s16 + $0x3c] sm:$0xf]  ;;  %v564_v0 = vrot.slane %v562_v57, 7 }
  0x3b   : > { %642 = vst [vmem:[#allocation2 + $0x44] sm:$0x1] %v641_v35  ;;  %v651_v59 = vsel %vm4404_vm5, %v550_v54, %v650_v44  ;;  %v570_v1 = vshrl.u32 %v438_v61, 16  ;;  %v657_v2 = vld [vmem:[#allocation2 + $0x60] sm:$0xf]  ;;  %v573_v3 = vshll.u32 %v438_v61, 16 }
  0x3c   : > { %645 = vst [vmem:[#allocation2 + $0x48] sm:$0xf] %v644_v43  ;;  %v558_v62 = vor.u32 %v556_v50, %v555_v56  ;;  %v560_v63 = vrot.slane %v555_v56, 4  ;;  %v567_v6 = vor.u32 %v565_v58, %v564_v0  ;;  %v568_v7 = vrot.slane %v564_v0, 4  ;;  %v661_v10 = vld [vmem:[#allocation2 + $0x68] sm:$0x1] }
  0x3d   : > { %646 = vst.msk [vmem:[#allocation2 + $0x4c] sm:$0xf] %vm391_vm0, %v542_v52  ;;  %v572_v8 = vrot.slane %v570_v1, 7 }
  0x3e   : > { %649 = vst [vmem:[#allocation2 + $0x50] sm:$0x1] %v648_v53  ;;  %v559_v4 = vsel %vm4412_vm6, %v551_v55, %v558_v62  ;;  %v655_v5 = vsel %vm4420_vm7, %v560_v63, %v654_v60  ;;  %v658_v9 = vsel %vm4404_vm5, %v567_v6, %v657_v2 }
  0x3f   : > { %652 = vst [vmem:[#allocation2 + $0x54] sm:$0xf] %v651_v59  ;;  %v575_v11 = vor.u32 %v573_v3, %v572_v8  ;;  %v577_v12 = vrot.slane %v572_v8, 4 }
  0x40   : > { %653 = vst.msk [vmem:[#allocation2 + $0x58] sm:$0xf] %vm391_vm0, %v559_v4  ;;  %667 = sbr.rel (%p3438_p11) target bundleno = 80 (0x50), region = 44 }
  0x41   : > { %656 = vst [vmem:[#allocation2 + $0x5c] sm:$0x1] %v655_v5  ;;  %v576_v13 = vsel %vm4412_vm6, %v568_v7, %v575_v11  ;;  %v662_v14 = vsel %vm4420_vm7, %v577_v12, %v661_v10 }
  0x42   : > { %659 = vst [vmem:[#allocation2 + $0x60] sm:$0xf] %v658_v9 }
  0x43   : > { %660 = vst.msk [vmem:[#allocation2 + $0x64] sm:$0xf] %vm391_vm0, %v576_v13 }
  0x44   : > { %663 = vst [vmem:[#allocation2 + $0x68] sm:$0x1] %v662_v14 }
  0x45   : > { %v3439_v15 = vld [vmem:[%s4355_s19 + $0x38] sm:$0xf]  ;;  %v3440_v16 = vld [vmem:[%s4355_s19 + $0x3c] sm:$0xf]  ;;  %v691_v23 = vld [vmem:[#allocation2] sm:$0xf] }
  0x46   : > { %v672_v17 = vshrl.u32 %v3439_v15, 16  ;;  %v675_v18 = vshll.u32 %v3439_v15, 16  ;;  %v680_v19 = vshrl.u32 %v3440_v16, 16  ;;  %v683_v20 = vshll.u32 %v3440_v16, 16  ;;  %v695_v24 = vld [vmem:[#allocation2 + $0x8] sm:$0x1] }
  0x48   : > { %v674_v21 = vrot.slane %v672_v17, 7  ;;  %v682_v22 = vrot.slane %v680_v19, 7 }
  0x4a   : > { %v677_v25 = vor.u32 %v675_v18, %v674_v21  ;;  %v678_v27 = vrot.slane %v674_v21, 4  ;;  %v685_v28 = vor.u32 %v683_v20, %v682_v22  ;;  %v687_v29 = vrot.slane %v682_v22, 4 }
  0x4c   : > { %v692_v30 = vsel %vm4404_vm5, %v677_v25, %v691_v23  ;;  %v686_v32 = vsel %vm4412_vm6, %v678_v27, %v685_v28  ;;  %v696_v33 = vsel %vm4420_vm7, %v687_v29, %v695_v24 }
  0x4d   : > { %693 = vst [vmem:[#allocation2] sm:$0xf] %v692_v30 }
  0x4e   : > { %694 = vst.msk [vmem:[#allocation2 + $0x4] sm:$0xf] %vm391_vm0, %v686_v32 }
  0x4f   : > { %697 = vst [vmem:[#allocation2 + $0x8] sm:$0x1] %v696_v33 }
  0x50 PF: > { %p3441_p12 = scmp.ge.s32.totalorder %s4222_s20, 2 }
  0x52   : > { %701 = sbr.rel (%p3441_p12) target bundleno = 98 (0x62), region = 48 }
  0x57   : > { %v702_v34 = vld [vmem:[%s4396_s13] sm:$0xf]  ;;  %v703_v35 = vld [vmem:[%s4396_s13 + $0x4] sm:$0xf]  ;;  %v725_v43 = vld [vmem:[#allocation2 + $0x6c] sm:$0xf] }
  0x58   : > { %v705_v37 = vshrl.u32 %v702_v34, 16  ;;  %v708_v38 = vshll.u32 %v702_v34, 16  ;;  %v713_v39 = vshrl.u32 %v703_v35, 16  ;;  %v716_v40 = vshll.u32 %v703_v35, 16  ;;  %v729_v44 = vld [vmem:[#allocation2 + $0x74] sm:$0x1] }
  0x5a   : > { %v707_v41 = vrot.slane %v705_v37, 7  ;;  %v715_v42 = vrot.slane %v713_v39, 7 }
  0x5c   : > { %v710_v45 = vor.u32 %v708_v38, %v707_v41  ;;  %v711_v46 = vrot.slane %v707_v41, 4  ;;  %v718_v47 = vor.u32 %v716_v40, %v715_v42  ;;  %v720_v48 = vrot.slane %v715_v42, 4 }
  0x5e   : > { %v726_v49 = vsel %vm4404_vm5, %v710_v45, %v725_v43  ;;  %v719_v50 = vsel %vm4412_vm6, %v711_v46, %v718_v47  ;;  %v730_v51 = vsel %vm4420_vm7, %v720_v48, %v729_v44 }
  0x5f   : > { %727 = vst [vmem:[#allocation2 + $0x6c] sm:$0xf] %v726_v49 }
  0x60   : > { %728 = vst.msk [vmem:[#allocation2 + $0x70] sm:$0xf] %vm391_vm0, %v719_v50 }
  0x61   : > { %731 = vst [vmem:[#allocation2 + $0x74] sm:$0x1] %v730_v51 }
  0x62 PF: > { %v3636_v52 = vld [vmem:[%s6021_s3 + $0x170] sm:$0xf]  ;;  %v4027_v26 = vld [vmem:[%s6021_s3 + $0x174] sm:$0xf0]  ;;  %v4026_v31 = vld [vmem:[%s6021_s3 + $0x174] sm:$0xf] }
  0x63   : > { %v3637_v53 = vor.u32 %v4027_v26, %v3636_v52  ;;  %v3638_v36 = vld [vmem:[%s6021_s3 + $0x178] sm:$0xf0]  ;;  %v3628_v54 = vld [vmem:[%s6021_s3 + $0x160] sm:$0xf]  ;;  %v4025_v55 = vld [vmem:[%s6021_s3 + $0x164] sm:$0xf0] }
  0x64   : > { %v3641_v56 = vor.u32 %v4026_v31, %v3638_v36  ;;  %v4024_v57 = vld [vmem:[%s6021_s3 + $0x164] sm:$0xf]  ;;  %v3630_v58 = vld [vmem:[%s6021_s3 + $0x168] sm:$0xf0]  ;;  %v3629_v59 = vor.u32 %v4025_v55, %v3628_v54  ;;  %v3620_v60 = vld [vmem:[%s6021_s3 + $0x150] sm:$0xf] }
  0x65   : > { %1817 = vmatpush.bf16.msra.mxu1 %v3637_v53  ;;  %v4023_v61 = vld [vmem:[%s6021_s3 + $0x154] sm:$0xf0]  ;;  %v4022_v62 = vld [vmem:[%s6021_s3 + $0x154] sm:$0xf]  ;;  %v3633_v63 = vor.u32 %v4024_v57, %v3630_v58  ;;  %v3622_v0 = vld [vmem:[%s6021_s3 + $0x158] sm:$0xf0] }
  0x66   : > { %1915 = vmatpush.bf16.msra.mxu3 %v3641_v56  ;;  %vm756_vm8 = vsmask.f32 3328  ;;  %vm757_vm9 = vsmask.f32 7440  ;;  %v1179_v1 = vld [vmem:[#allocation2 + $0xc] sm:$0xf]  ;;  %v3621_v8 = vor.u32 %v4023_v61, %v3620_v60  ;;  %v3625_v9 = vor.u32 %v4022_v62, %v3622_v0 }
  0x67   : > { %v1180_v2 = vld [vmem:[#allocation2 + $0x10] sm:$0xf]  ;;  %vm975_vm10 = vcmask 1042432   ;;  %vm976_vm11 = vcmask 1046532   ;;  %v1181_v3 = vld [vmem:[#allocation2 + $0x14] sm:$0x1]  ;;  %vm4571_vm14 = vmor %vm756_vm8, %vm757_vm9 }
  0x68   : > { %v1204_v4 = vshrl.u32 %v1179_v1, 16  ;;  %v1207_v5 = vshll.u32 %v1179_v1, 16  ;;  %v1213_v6 = vshll.u32 %v1180_v2, 16  ;;  %v1217_v7 = vshrl.u32 %v1180_v2, 16  ;;  %v3612_v11 = vld [vmem:[%s6021_s3 + $0x140] sm:$0xf]  ;;  %vm4562_vm13 = vmor %vm975_vm10, %vm976_vm11 }
  0x69   : > { %1818 = vmatpush.bf16.msra.mxu1 %v3629_v59  ;;  %v1223_v10 = vshll.u32 %v1181_v3, 16  ;;  %v4021_v12 = vld [vmem:[%s6021_s3 + $0x144] sm:$0xf0]  ;;  %vm1122_vm12 = vcmask 523264   ;;  %v4020_v17 = vld [vmem:[%s6021_s3 + $0x144] sm:$0xf] }
  0x6a   : > { %1916 = vmatpush.bf16.msra.mxu3 %v3633_v63  ;;  %v1206_v13 = vrot.slane %v1204_v4, 4  ;;  %v1209_v14 = vrot.slane %v1207_v5, 5  ;;  %v1215_v15 = vrot.slane %v1213_v6, 5  ;;  %v1219_v16 = vrot.slane %v1217_v7, 4  ;;  %v3614_v21 = vld [vmem:[%s6021_s3 + $0x148] sm:$0xf0] }
  0x6b   : > { %v1225_v19 = vrot.slane %v1223_v10, 5  ;;  %v3613_v20 = vor.u32 %v4021_v12, %v3612_v11  ;;  %v3482_v22 = vrot.slane %v1179_v1, 9  ;;  %v1421_v23 = vrot.slane %v1180_v2, 5  ;;  %v1182_v29 = vld [vmem:[#allocation2 + $0x18] sm:$0xf]  ;;  %s4241_s6 = smov 64  }
  0x6c   : > { %v1210_v24 = vor.u32 %v1209_v14, %v1206_v13  ;;  %v1220_v25 = vor.u32 %v1219_v16, %v1215_v15  ;;  %v3617_v27 = vor.u32 %v4020_v17, %v3614_v21  ;;  %v1424_v28 = vrot.slane %v1181_v3, 5  ;;  %v1183_v30 = vld [vmem:[#allocation2 + $0x1c] sm:$0xf]  ;;  %v1184_v43 = vld [vmem:[#allocation2 + $0x20] sm:$0x1]  ;;  %s3114_s20 = sld [smem:[#allocation3]] }
  0x6d   : > { %1819 = vmatpush.bf16.msra.mxu1 %v3621_v8  ;;  %v1422_v33 = vsel %vm4562_vm13, %v3482_v22, %v1421_v23  ;;  %v1423_v34 = vrot.slane %v1421_v23, 4  ;;  %v1228_v35 = vshrl.u32 %v1182_v29, 16  ;;  %v1231_v37 = vshll.u32 %v1182_v29, 16  ;;  %v4583_v53 = vld [vmem:[#allocation2 + $0x3c] sm:$0xf] }
  0x6e   : > { %1917 = vmatpush.bf16.msra.mxu3 %v3625_v9  ;;  %v1211_v38 = vrot.slane %v1210_v24, 4  ;;  %v1221_v39 = vrot.slane %v1220_v25, 4  ;;  %v1539_v40 = vunpack.c.l.b16 %v1422_v33  ;;  %v1237_v41 = vshll.u32 %v1183_v30, 16  ;;  %v4585_v61 = vld [vmem:[#allocation2 + $0x40] sm:$0xf] }
  0x6f   : > { %v1425_v42 = vsel %vm4562_vm13, %v1423_v34, %v1424_v28  ;;  %v1230_v44 = vrot.slane %v1228_v35, 4  ;;  %v1233_v45 = vrot.slane %v1231_v37, 5  ;;  %v1241_v46 = vshrl.u32 %v1183_v30, 16  ;;  %v4595_v5 = vld [vmem:[#allocation2 + $0x44] sm:$0x1] }
  0x70   : > { %v1216_v47 = vsel %vm4571_vm14, %v1211_v38, %v1215_v15  ;;  %v1226_v48 = vsel %vm4571_vm14, %v1221_v39, %v1225_v19  ;;  %v1540_v49 = vunpack.c.l.b16 %v1425_v42  ;;  %v1239_v50 = vrot.slane %v1237_v41, 5  ;;  %v4598_v7 = vld [vmem:[#allocation2 + $0x24] sm:$0xf]  ;;  %v4606_v16 = vld [vmem:[#allocation2 + $0x28] sm:$0xf] }
  0x71   : > { %v1499_v51 = vunpack.c.l.b16 %v1216_v47  ;;  %v1500_v52 = vunpack.c.l.b16 %v1226_v48  ;;  %1820 = vmatpush.bf16.msra.mxu1 %v3613_v20  ;;  %v1234_v26 = vor.u32 %v1233_v45, %v1230_v44  ;;  %v1243_v31 = vrot.slane %v1241_v46, 4  ;;  %v4610_v25 = vld [vmem:[#allocation2 + $0x2c] sm:$0x1]  ;;  %v4613_v28 = vld [vmem:[#allocation2 + $0x54] sm:$0xf] }
  0x72   : > { %1918 = vmatpush.bf16.msra.mxu3 %v3617_v27  ;;  %v1555_v36 = vpack.c.b16 %v1540_v49, %v1539_v40  ;;  %v1247_v54 = vshll.u32 %v1184_v43, 16  ;;  %v3483_v55 = vrot.slane %v1182_v29, 9  ;;  %v1428_v56 = vrot.slane %v1183_v30, 5  ;;  %v4618_v42 = vld [vmem:[#allocation2 + $0x58] sm:$0xf] }
  0x73   : > { %v1515_v57 = vpack.c.b16 %v1500_v52, %v1499_v51  ;;  %v1235_v58 = vrot.slane %v1234_v26, 4  ;;  %v1244_v59 = vor.u32 %v1243_v31, %v1239_v50  ;;  %v1431_v60 = vrot.slane %v1184_v43, 5  ;;  %v4625_v49 = vld [vmem:[#allocation2 + $0x5c] sm:$0x1]  ;;  %v4627_v31 = vld [vmem:[#allocation2 + $0x48] sm:$0xf] }
  0x74   : > { %3642 = vmatmul.msk.bf16.vlgmr.msra.gmra.mxu1 %vm1122_vm12, %v1555_v36  ;;  %v1249_v62 = vrot.slane %v1247_v54, 5  ;;  %v1429_v63 = vsel %vm4562_vm13, %v3483_v55, %v1428_v56  ;;  %v1430_v0 = vrot.slane %v1428_v56, 4  ;;  %v1300_v1 = vshrl.u32 %v4583_v53, 16 }
  0x75   : > { %1523 = vrot.lane.b32.xlu0 %v1515_v57, %s4241_s6  ;;  %3650 = vmatmul.msk.bf16.vlgmr.msra.gmra.mxu3 %vm1122_vm12, %v1555_v36  ;;  %v1240_v2 = vsel %vm4571_vm14, %v1235_v58, %v1239_v50  ;;  %v1245_v3 = vrot.slane %v1244_v59, 4  ;;  %v1541_v4 = vunpack.c.l.b16 %v1429_v63  ;;  %v1303_v6 = vshll.u32 %v4583_v53, 16 }
  0x76   : > { %v1501_v8 = vunpack.c.l.b16 %v1240_v2  ;;  %v1432_v9 = vsel %vm4562_vm13, %v1430_v0, %v1431_v60  ;;  %v1302_v10 = vrot.slane %v1300_v1, 4  ;;  %v1309_v11 = vshll.u32 %v4585_v61, 16  ;;  %v4636_v1 = vld [vmem:[#allocation2 + $0x4c] sm:$0xf] }
  0x77   : > { %v1250_v12 = vsel %vm4571_vm14, %v1245_v3, %v1249_v62  ;;  %v1542_v13 = vunpack.c.l.b16 %v1432_v9  ;;  %v1305_v14 = vrot.slane %v1303_v6, 5  ;;  %v1313_v15 = vshrl.u32 %v4585_v61, 16  ;;  %v4639_v9 = vld [vmem:[#allocation2 + $0x50] sm:$0x1] }
  0x78   : > { %v1502_v17 = vunpack.c.l.b16 %v1250_v12  ;;  %v1311_v19 = vrot.slane %v1309_v11, 5  ;;  %v1319_v20 = vshll.u32 %v4595_v5, 16  ;;  %v1252_v21 = vshrl.u32 %v4598_v7, 16 }
  0x79   : > { %v1556_v22 = vpack.c.b16 %v1542_v13, %v1541_v4  ;;  %v1306_v23 = vor.u32 %v1305_v14, %v1302_v10  ;;  %v1315_v24 = vrot.slane %v1313_v15, 4  ;;  %v1255_v27 = vshll.u32 %v4598_v7, 16  ;;  %v4644_v14 = vld [vmem:[#allocation2 + $0x30] sm:$0xf] }
  0x7a   : > { %v1516_v29 = vpack.c.b16 %v1502_v17, %v1501_v8  ;;  %v1321_v30 = vrot.slane %v1319_v20, 5  ;;  %v1254_v33 = vrot.slane %v1252_v21, 4  ;;  %v1261_v34 = vshll.u32 %v4606_v16, 16 }
  0x7b   : > { %v1307_v35 = vrot.slane %v1306_v23, 4  ;;  %v1316_v37 = vor.u32 %v1315_v24, %v1311_v19  ;;  %v1257_v38 = vrot.slane %v1255_v27, 5  ;;  %v1265_v39 = vshrl.u32 %v4606_v16, 16 }
  0x7c   : > { %v1263_v40 = vrot.slane %v1261_v34, 5  ;;  %v1271_v41 = vshll.u32 %v4610_v25, 16  ;;  %v1348_v43 = vshrl.u32 %v4613_v28, 16  ;;  %v1351_v44 = vshll.u32 %v4613_v28, 16 }
  0x7d   : > { %1525 = vrot.lane.b32.xlu0 %v1516_v29, %s4241_s6  ;;  %v1312_v45 = vsel %vm4571_vm14, %v1307_v35, %v1311_v19  ;;  %v1317_v46 = vrot.slane %v1316_v37, 4  ;;  %v1258_v47 = vor.u32 %v1257_v38, %v1254_v33  ;;  %v1267_v48 = vrot.slane %v1265_v39, 4  ;;  %v4654_v29 = vld [vmem:[#allocation2 + $0x34] sm:$0xf]  ;;  %v4656_v35 = vld [vmem:[#allocation2 + $0x38] sm:$0x1] }
  0x7e   : > { %v1507_v50 = vunpack.c.l.b16 %v1312_v45  ;;  %v1273_v51 = vrot.slane %v1271_v41, 5  ;;  %v1350_v52 = vrot.slane %v1348_v43, 4  ;;  %v1353_v26 = vrot.slane %v1351_v44, 5  ;;  %v4660_v41 = vld [vmem:[#allocation2 + $0xc] sm:$0xf] }
  0x7f   : > { %v1322_v36 = vsel %vm4571_vm14, %v1317_v46, %v1321_v30  ;;  %v1259_v54 = vrot.slane %v1258_v47, 4  ;;  %v1268_v55 = vor.u32 %v1267_v48, %v1263_v40  ;;  %v1357_v56 = vshll.u32 %v4618_v42, 16 }
  0x80   : > { %v1508_v57 = vunpack.c.l.b16 %v1322_v36  ;;  %v1354_v58 = vor.u32 %v1353_v26, %v1350_v52  ;;  %v1361_v59 = vshrl.u32 %v4618_v42, 16  ;;  %v1367_v60 = vshll.u32 %v4625_v49, 16 }
  0x81   : > { %v1264_v62 = vsel %vm4571_vm14, %v1259_v54, %v1263_v40  ;;  %v1269_v63 = vrot.slane %v1268_v55, 4  ;;  %v1359_v0 = vrot.slane %v1357_v56, 5  ;;  %v1324_v2 = vshrl.u32 %v4627_v31, 16  ;;  %v4668_v54 = vld [vmem:[#allocation2 + $0x10] sm:$0xf] }
  0x82   : > { %v1519_v3 = vpack.c.b16 %v1508_v57, %v1507_v50  ;;  %v1503_v4 = vunpack.c.l.b16 %v1264_v62  ;;  %v1355_v6 = vrot.slane %v1354_v58, 4  ;;  %v1363_v8 = vrot.slane %v1361_v59, 4 }
  0x83   : > { %v1274_v10 = vsel %vm4571_vm14, %v1269_v63, %v1273_v51  ;;  %v1369_v11 = vrot.slane %v1367_v60, 5  ;;  %v1326_v12 = vrot.slane %v1324_v2, 4  ;;  %v1327_v13 = vshll.u32 %v4627_v31, 16  ;;  %v4673_v60 = vld [vmem:[#allocation2 + $0x14] sm:$0x1] }
  0x84   : > { %3643 = vmatmul.msk.bf16.gmra.mxu1 %vm1122_vm12, %v1556_v22  ;;  %1531 = vrot.lane.b32.xlu2 %v1519_v3, %s4241_s6  ;;  %v1504_v15 = vunpack.c.l.b16 %v1274_v10  ;;  %v1360_v17 = vsel %vm4571_vm14, %v1355_v6, %v1359_v0  ;;  %v1364_v19 = vor.u32 %v1363_v8, %v1359_v0  ;;  %v1333_v20 = vshll.u32 %v4636_v1, 16 }
  0x85   : > { %3651 = vmatmul.msk.bf16.gmra.mxu3 %vm1122_vm12, %v1556_v22  ;;  %v1511_v21 = vunpack.c.l.b16 %v1360_v17  ;;  %v1329_v23 = vrot.slane %v1327_v13, 5  ;;  %v1337_v24 = vshrl.u32 %v4636_v1, 16  ;;  %v1343_v27 = vshll.u32 %v4639_v9, 16 }
  0x86   : > { %v1517_v30 = vpack.c.b16 %v1504_v15, %v1503_v4  ;;  %v1365_v33 = vrot.slane %v1364_v19, 4  ;;  %v1335_v34 = vrot.slane %v1333_v20, 5  ;;  %v1276_v37 = vshrl.u32 %v4644_v14, 16 }
  0x87   : > { %v1330_v38 = vor.u32 %v1329_v23, %v1326_v12  ;;  %v1339_v39 = vrot.slane %v1337_v24, 4  ;;  %v1345_v40 = vrot.slane %v1343_v27, 5  ;;  %v1279_v22 = vshll.u32 %v4644_v14, 16 }
  0x88   : > { %1527 = vrot.lane.b32.xlu1 %v1517_v30, %s4241_s6  ;;  %v1370_v43 = vsel %vm4571_vm14, %v1365_v33, %v1369_v11  ;;  %v1278_v44 = vrot.slane %v1276_v37, 4  ;;  %v1285_v45 = vshll.u32 %v4654_v29, 16  ;;  %v1289_v46 = vshrl.u32 %v4654_v29, 16 }
  0x89   : > { %v1512_v47 = vunpack.c.l.b16 %v1370_v43  ;;  %v1331_v48 = vrot.slane %v1330_v38, 4  ;;  %v1340_v50 = vor.u32 %v1339_v39, %v1335_v34  ;;  %v1281_v51 = vrot.slane %v1279_v22, 5  ;;  %v4692_v22 = vld [vmem:[#allocation2 + $0x64] sm:$0xf] }
  0x8a   : > { %v1287_v52 = vrot.slane %v1285_v45, 5  ;;  %v1291_v26 = vrot.slane %v1289_v46, 4  ;;  %v1295_v36 = vshll.u32 %v4656_v35, 16  ;;  %v784_v55 = vshrl.u32 %v4660_v41, 16 }
  0x8b   : > { %v1521_v56 = vpack.c.b16 %v1512_v47, %v1511_v21  ;;  %v1336_v57 = vsel %vm4571_vm14, %v1331_v48, %v1335_v34  ;;  %v1341_v58 = vrot.slane %v1340_v50, 4  ;;  %v1282_v59 = vor.u32 %v1281_v51, %v1278_v44  ;;  %v4685_v21 = vld [vmem:[#allocation2 + $0x60] sm:$0xf] }
  0x8c   : > { %v1509_v62 = vunpack.c.l.b16 %v1336_v57  ;;  %v1292_v63 = vor.u32 %v1291_v26, %v1287_v52  ;;  %v1297_v0 = vrot.slane %v1295_v36, 5  ;;  %v786_v2 = vrot.slane %v784_v55, 4 }
  0x8d   : > { %1535 = vrot.lane.b32.xlu0 %v1521_v56, %s4241_s6  ;;  %v1346_v3 = vsel %vm4571_vm14, %v1341_v58, %v1345_v40  ;;  %v1283_v4 = vrot.slane %v1282_v59, 4  ;;  %v787_v6 = vshll.u32 %v4660_v41, 16  ;;  %v793_v8 = vshll.u32 %v4668_v54, 16  ;;  %v4707_v56 = vld [vmem:[#allocation2] sm:$0xf] }
  0x8e   : > { %v1510_v10 = vunpack.c.l.b16 %v1346_v3  ;;  %v1293_v11 = vrot.slane %v1292_v63, 4  ;;  %v797_v12 = vshrl.u32 %v4668_v54, 16  ;;  %v803_v13 = vshll.u32 %v4673_v60, 16  ;;  %v4711_v63 = vld [vmem:[#allocation2 + $0x4] sm:$0xf] }
  0x8f   : > { %v1288_v15 = vsel %vm4571_vm14, %v1283_v4, %v1287_v52  ;;  %v789_v17 = vrot.slane %v787_v6, 5  ;;  %v795_v19 = vrot.slane %v793_v8, 5  ;;  %v3484_v20 = vrot.slane %v4598_v7, 9 }
  0x90   : > { %v1520_v23 = vpack.c.b16 %v1510_v10, %v1509_v62  ;;  %v1298_v24 = vsel %vm4571_vm14, %v1293_v11, %v1297_v0  ;;  %v1505_v27 = vunpack.c.l.b16 %v1288_v15  ;;  %v799_v30 = vrot.slane %v797_v12, 4  ;;  %v4714_v10 = vld [vmem:[#allocation2 + $0x8] sm:$0x1] }
  0x91   : > { %v1506_v33 = vunpack.c.l.b16 %v1298_v24  ;;  %v790_v34 = vor.u32 %v789_v17, %v786_v2  ;;  %v805_v37 = vrot.slane %v803_v13, 5  ;;  %v1435_v38 = vrot.slane %v4606_v16, 5  ;;  %v4698_v16 = vld [vmem:[#allocation2 + $0x68] sm:$0x1] }
  0x92   : > { %1533 = vrot.lane.b32.xlu2 %v1520_v23, %s4241_s6  ;;  %v800_v39 = vor.u32 %v799_v30, %v795_v19  ;;  %v1438_v40 = vrot.slane %v4610_v25, 5  ;;  %v1372_v7 = vshrl.u32 %v4685_v21, 16  ;;  %v1375_v43 = vshll.u32 %v4685_v21, 16 }
  0x93   : > { %v1518_v44 = vpack.c.b16 %v1506_v33, %v1505_v27  ;;  %v791_v45 = vrot.slane %v790_v34, 4  ;;  %v1436_v46 = vsel %vm4562_vm13, %v3484_v20, %v1435_v38  ;;  %v1437_v47 = vrot.slane %v1435_v38, 4  ;;  %v4719_v20 = vld [vmem:[#allocation2 + $0x18] sm:$0xf]  ;;  %v4726_v33 = vld [vmem:[#allocation2 + $0x1c] sm:$0xf] }
  0x94   : > { %v801_v48 = vrot.slane %v800_v39, 4  ;;  %v1543_v50 = vunpack.c.l.b16 %v1436_v46  ;;  %v1374_v51 = vrot.slane %v1372_v7, 4  ;;  %v1377_v52 = vrot.slane %v1375_v43, 5  ;;  %v4730_v43 = vld [vmem:[#allocation2 + $0x20] sm:$0x1] }
  0x95   : > { %1529 = vrot.lane.b32.xlu1 %v1518_v44, %s4241_s6  ;;  %v796_v25 = vsel %vm4571_vm14, %v791_v45, %v795_v19  ;;  %v1439_v26 = vsel %vm4562_vm13, %v1437_v47, %v1438_v40  ;;  %v1381_v36 = vshll.u32 %v4692_v22, 16  ;;  %v1385_v55 = vshrl.u32 %v4692_v22, 16 }
  0x96   : > { %v806_v57 = vsel %vm4571_vm14, %v801_v48, %v805_v37  ;;  %v1060_v58 = vunpack.c.l.b16 %v796_v25  ;;  %v1544_v59 = vunpack.c.l.b16 %v1439_v26  ;;  %v1378_v62 = vor.u32 %v1377_v52, %v1374_v51 }
  0x97   : > { %v1061_v0 = vunpack.c.l.b16 %v806_v57  ;;  %v1383_v2 = vrot.slane %v1381_v36, 5  ;;  %v1387_v3 = vrot.slane %v1385_v55, 4  ;;  %v1391_v4 = vshll.u32 %v4698_v16, 16 }
  0x98   : > { %v1557_v6 = vpack.c.b16 %v1544_v59, %v1543_v50  ;;  %v1379_v8 = vrot.slane %v1378_v62, 4  ;;  %v760_v11 = vshrl.u32 %v4707_v56, 16  ;;  %v763_v12 = vshll.u32 %v4707_v56, 16 }
  0x99   : > { %v1075_v13 = vpack.c.b16 %v1061_v0, %v1060_v58  ;;  %v1388_v15 = vor.u32 %v1387_v3, %v1383_v2  ;;  %v1393_v17 = vrot.slane %v1391_v4, 5  ;;  %v769_v19 = vshll.u32 %v4711_v63, 16 }
  0x9a   : > { %3644 = vmatmul.msk.bf16.gmra.mxu1 %vm1122_vm12, %v1557_v6  ;;  %3652 = vmatmul.msk.bf16.gmra.mxu3 %vm1122_vm12, %v1557_v6  ;;  %v1384_v23 = vsel %vm4571_vm14, %v1379_v8, %v1383_v2  ;;  %v762_v24 = vrot.slane %v760_v11, 4  ;;  %v765_v27 = vrot.slane %v763_v12, 5  ;;  %v773_v30 = vshrl.u32 %v4711_v63, 16  ;;  %v744_v8 = vld [vmem:[#allocation2 + $0x30] sm:$0xf] }
  0x9b   : > { %1084 = vrot.lane.b32.xlu0 %v1075_v13, %s4241_s6  ;;  %v1389_v34 = vrot.slane %v1388_v15, 4  ;;  %v771_v37 = vrot.slane %v769_v19, 5  ;;  %v779_v38 = vshll.u32 %v4714_v10, 16  ;;  %v1513_v39 = vunpack.c.l.b16 %v1384_v23 }
  0x9c   : > { %v766_v40 = vor.u32 %v765_v27, %v762_v24  ;;  %v775_v7 = vrot.slane %v773_v30, 4  ;;  %v808_v44 = vshrl.u32 %v4719_v20, 16  ;;  %v811_v47 = vshll.u32 %v4719_v20, 16 }
  0x9d   : > { %v1394_v45 = vsel %vm4571_vm14, %v1389_v34, %v1393_v17  ;;  %v781_v46 = vrot.slane %v779_v38, 5  ;;  %v817_v48 = vshll.u32 %v4726_v33, 16  ;;  %v821_v55 = vshrl.u32 %v4726_v33, 16 }
  0x9e   : > { %v1514_v50 = vunpack.c.l.b16 %v1394_v45  ;;  %v767_v51 = vrot.slane %v766_v40, 4  ;;  %v776_v52 = vor.u32 %v775_v7, %v771_v37  ;;  %v810_v25 = vrot.slane %v808_v44, 4  ;;  %v4758_v7 = vld [vmem:[#allocation2 + $0x38] sm:$0x1] }
  0x9f   : > { %v813_v26 = vrot.slane %v811_v47, 5  ;;  %v819_v36 = vrot.slane %v817_v48, 5  ;;  %v827_v57 = vshll.u32 %v4730_v43, 16  ;;  %v3485_v0 = vrot.slane %v4644_v14, 9 }
  0xa0   : > { %v1522_v58 = vpack.c.b16 %v1514_v50, %v1513_v39  ;;  %v772_v59 = vsel %vm4571_vm14, %v767_v51, %v771_v37  ;;  %v777_v62 = vrot.slane %v776_v52, 4  ;;  %v823_v4 = vrot.slane %v821_v55, 4  ;;  %v4754_v39 = vld [vmem:[#allocation2 + $0x34] sm:$0xf] }
  0xa1   : > { %v1058_v2 = vunpack.c.l.b16 %v772_v59  ;;  %v814_v3 = vor.u32 %v813_v26, %v810_v25  ;;  %v829_v6 = vrot.slane %v827_v57, 5  ;;  %v1442_v12 = vrot.slane %v4654_v29, 5 }
  0xa2   : > { %1537 = vrot.lane.b32.xlu1 %v1522_v58, %s4241_s6  ;;  %v782_v11 = vsel %vm4571_vm14, %v777_v62, %v781_v46  ;;  %v1445_v13 = vrot.slane %v4656_v35, 5  ;;  %v3486_v15 = vrot.slane %v4583_v53, 9  ;;  %v824_v23 = vor.u32 %v823_v4, %v819_v36  ;;  %v4770_v58 = vld [vmem:[#allocation2 + $0x24] sm:$0xf]  ;;  %v3604_v62 = vld [vmem:[%s6021_s3 + $0x130] sm:$0xf] }
  0xa3   : > { %v1059_v17 = vunpack.c.l.b16 %v782_v11  ;;  %v815_v19 = vrot.slane %v814_v3, 4  ;;  %v1449_v14 = vrot.slane %v4585_v61, 5  ;;  %v1443_v24 = vsel %vm4562_vm13, %v3485_v0, %v1442_v12  ;;  %v4777_v0 = vld [vmem:[#allocation2 + $0x28] sm:$0xf]  ;;  %v4018_v11 = vld [vmem:[%s6021_s3 + $0x134] sm:$0xf] }
  0xa4   : > { %v1444_v27 = vrot.slane %v1442_v12, 4  ;;  %v1452_v30 = vrot.slane %v4595_v5, 5  ;;  %v856_v34 = vshrl.u32 %v744_v8, 16  ;;  %v825_v38 = vrot.slane %v824_v23, 4 }
  0xa5   : > { %v1074_v37 = vpack.c.b16 %v1059_v17, %v1058_v2  ;;  %v820_v29 = vsel %vm4571_vm14, %v815_v19, %v819_v36  ;;  %v1545_v35 = vunpack.c.l.b16 %v1443_v24  ;;  %v1451_v61 = vrot.slane %v1449_v14, 4  ;;  %v4789_v17 = vld [vmem:[#allocation2 + $0x2c] sm:$0x1] }
  0xa6   : > { %v1062_v53 = vunpack.c.l.b16 %v820_v29  ;;  %v1446_v40 = vsel %vm4562_vm13, %v1444_v27, %v1445_v13  ;;  %v830_v5 = vsel %vm4571_vm14, %v825_v38, %v829_v6  ;;  %v1450_v45 = vsel %vm4562_vm13, %v3486_v15, %v1449_v14  ;;  %v3606_v15 = vld [vmem:[%s6021_s3 + $0x138] sm:$0xf0]  ;;  %v3596_v27 = vld [vmem:[%s6021_s3 + $0x120] sm:$0xf] }
  0xa7   : > { %1082 = vrot.lane.b32.xlu2 %v1074_v37, %s4241_s6  ;;  %v1546_v44 = vunpack.c.l.b16 %v1446_v40  ;;  %v1063_v46 = vunpack.c.l.b16 %v830_v5  ;;  %v858_v47 = vrot.slane %v856_v34, 4  ;;  %v859_v48 = vshll.u32 %v744_v8, 16  ;;  %v4019_v8 = vld [vmem:[%s6021_s3 + $0x134] sm:$0xf0]  ;;  %v3598_v5 = vld [vmem:[%s6021_s3 + $0x128] sm:$0xf0] }
  0xa8   : > { %v865_v50 = vshll.u32 %v4754_v39, 16  ;;  %v1453_v52 = vsel %vm4562_vm13, %v1451_v61, %v1452_v30  ;;  %v869_v25 = vshrl.u32 %v4754_v39, 16  ;;  %v875_v26 = vshll.u32 %v4758_v7, 16  ;;  %v4017_v30 = vld [vmem:[%s6021_s3 + $0x124] sm:$0xf0] }
  0xa9   : > { %v1558_v51 = vpack.c.b16 %v1546_v44, %v1545_v35  ;;  %v1076_v36 = vpack.c.b16 %v1063_v46, %v1062_v53  ;;  %v861_v55 = vrot.slane %v859_v48, 5  ;;  %v1547_v2 = vunpack.c.l.b16 %v1450_v45  ;;  %v4016_v35 = vld [vmem:[%s6021_s3 + $0x124] sm:$0xf]  ;;  %v3588_v44 = vld [vmem:[%s6021_s3 + $0x110] sm:$0xf] }
  0xaa   : > { %v867_v57 = vrot.slane %v865_v50, 5  ;;  %v871_v59 = vrot.slane %v869_v25, 4  ;;  %v1548_v3 = vunpack.c.l.b16 %v1453_v52  ;;  %v877_v6 = vrot.slane %v875_v26, 5  ;;  %v4015_v50 = vld [vmem:[%s6021_s3 + $0x114] sm:$0xf0] }
  0xab   : > { %3645 = vmatmul.msk.bf16.gmra.mxu1 %vm1122_vm12, %v1558_v51  ;;  %3653 = vmatmul.msk.bf16.gmra.mxu3 %vm1122_vm12, %v1558_v51  ;;  %v862_v4 = vor.u32 %v861_v55, %v858_v47  ;;  %v3605_v13 = vor.u32 %v4019_v8, %v3604_v62  ;;  %v832_v19 = vshrl.u32 %v4770_v58, 16  ;;  %v835_v23 = vshll.u32 %v4770_v58, 16  ;;  %v4014_v51 = vld [vmem:[%s6021_s3 + $0x114] sm:$0xf]  ;;  %v3590_v52 = vld [vmem:[%s6021_s3 + $0x118] sm:$0xf0] }
  0xac   : > { %1086 = vrot.lane.b32.xlu1 %v1076_v36, %s4241_s6  ;;  %v872_v12 = vor.u32 %v871_v59, %v867_v57  ;;  %v3609_v24 = vor.u32 %v4018_v11, %v3606_v15  ;;  %v3487_v37 = vrot.slane %v4627_v31, 9  ;;  %v841_v40 = vshll.u32 %v4777_v0, 16  ;;  %v3580_v15 = vld [vmem:[%s6021_s3 + $0x100] sm:$0xf]  ;;  %v3983_v31 = vld [vmem:[%s6021_s3 + $0x54] sm:$0xf0] }
  0xad   : > { %v863_v14 = vrot.slane %v862_v4, 4  ;;  %1764 = vmatpush.bf16.msra.mxu0 %v3605_v13  ;;  %v834_v29 = vrot.slane %v832_v19, 4  ;;  %v837_v38 = vrot.slane %v835_v23, 5  ;;  %v845_v61 = vshrl.u32 %v4777_v0, 16  ;;  %v4828_v4 = vld [vmem:[#allocation2 + $0x40] sm:$0xf] }
  0xae   : > { %v873_v34 = vrot.slane %v872_v12, 4  ;;  %1862 = vmatpush.bf16.msra.mxu2 %v3609_v24  ;;  %v1559_v45 = vpack.c.b16 %v1548_v3, %v1547_v2  ;;  %v843_v26 = vrot.slane %v841_v40, 5  ;;  %v851_v55 = vshll.u32 %v4789_v17, 16  ;;  %v4830_v13 = vld [vmem:[#allocation2 + $0x44] sm:$0x1] }
  0xaf   : > { %v868_v53 = vsel %vm4571_vm14, %v863_v14, %v867_v57  ;;  %v838_v48 = vor.u32 %v837_v38, %v834_v29  ;;  %v847_v36 = vrot.slane %v845_v61, 4  ;;  %v4825_v57 = vld [vmem:[#allocation2 + $0x3c] sm:$0xf]  ;;  %v1456_v59 = vrot.slane %v4636_v1, 5 }
  0xb0   : > { %v878_v46 = vsel %vm4571_vm14, %v873_v34, %v877_v6  ;;  %v1066_v47 = vunpack.c.l.b16 %v868_v53  ;;  %v3597_v2 = vor.u32 %v4017_v30, %v3596_v27  ;;  %v3601_v3 = vor.u32 %v4016_v35, %v3598_v5  ;;  %v4013_v27 = vld [vmem:[%s6021_s3 + $0x104] sm:$0xf0]  ;;  %v4012_v30 = vld [vmem:[%s6021_s3 + $0x104] sm:$0xf]  ;;  %v3582_v53 = vld [vmem:[%s6021_s3 + $0x108] sm:$0xf0] }
  0xb1   : > { %v1067_v25 = vunpack.c.l.b16 %v878_v46  ;;  %v839_v62 = vrot.slane %v838_v48, 4  ;;  %v848_v8 = vor.u32 %v847_v36, %v843_v26  ;;  %v853_v11 = vrot.slane %v851_v55, 5 }
  0xb2   : > { %v3589_v12 = vor.u32 %v4015_v50, %v3588_v44  ;;  %1765 = vmatpush.bf16.msra.mxu0 %v3597_v2  ;;  %1863 = vmatpush.bf16.msra.mxu2 %v3601_v3  ;;  %v3593_v23 = vor.u32 %v4014_v51, %v3590_v52  ;;  %v880_v14 = vshrl.u32 %v4825_v57, 16  ;;  %v883_v24 = vshll.u32 %v4825_v57, 16 }
  0xb3   : > { %v1078_v6 = vpack.c.b16 %v1067_v25, %v1066_v47  ;;  %v844_v19 = vsel %vm4571_vm14, %v839_v62, %v843_v26  ;;  %v1459_v34 = vrot.slane %v4639_v9, 5  ;;  %v849_v29 = vrot.slane %v848_v8, 4  ;;  %v3572_v8 = vld [vmem:[%s6021_s3 + $0xf0] sm:$0xf] }
  0xb4   : > { %v889_v38 = vshll.u32 %v4828_v4, 16  ;;  %v893_v35 = vshrl.u32 %v4828_v4, 16  ;;  %v1064_v40 = vunpack.c.l.b16 %v844_v19  ;;  %v882_v61 = vrot.slane %v880_v14, 4 }
  0xb5   : > { %1090 = vrot.lane.b32.xlu0 %v1078_v6, %s4241_s6  ;;  %v885_v5 = vrot.slane %v883_v24, 5  ;;  %v899_v44 = vshll.u32 %v4830_v13, 16  ;;  %v854_v46 = vsel %vm4571_vm14, %v849_v29, %v853_v11  ;;  %v3581_v9 = vor.u32 %v4013_v27, %v3580_v15  ;;  %v3716_v24 = vld [vmem:[%s6021_s3 + $0x70] sm:$0xf]  ;;  %v3987_v27 = vld [vmem:[%s6021_s3 + $0x74] sm:$0xf0] }
  0xb6   : > { %v891_v47 = vrot.slane %v889_v38, 5  ;;  %v895_v48 = vrot.slane %v893_v35, 4  ;;  %v1065_v50 = vunpack.c.l.b16 %v854_v46  ;;  %1766 = vmatpush.bf16.msra.mxu0 %v3589_v12  ;;  %1864 = vmatpush.bf16.msra.mxu2 %v3593_v23  ;;  %v3585_v25 = vor.u32 %v4012_v30, %v3582_v53  ;;  %v3574_v12 = vld [vmem:[%s6021_s3 + $0xf8] sm:$0xf0]  ;;  %v3564_v53 = vld [vmem:[%s6021_s3 + $0xe0] sm:$0xf] }
  0xb7   : > { %v886_v51 = vor.u32 %v885_v5, %v882_v61  ;;  %v901_v52 = vrot.slane %v899_v44, 5  ;;  %v3488_v36 = vrot.slane %v4613_v28, 9  ;;  %v1463_v55 = vrot.slane %v4618_v42, 5  ;;  %v4011_v28 = vld [vmem:[%s6021_s3 + $0xf4] sm:$0xf0] }
  0xb8   : > { %v896_v26 = vor.u32 %v895_v48, %v891_v47  ;;  %v1466_v62 = vrot.slane %v4625_v49, 5  ;;  %v1458_v2 = vrot.slane %v1456_v59, 4  ;;  %v1077_v3 = vpack.c.b16 %v1065_v50, %v1064_v40  ;;  %v4009_v40 = vld [vmem:[%s6021_s3 + $0xe4] sm:$0xf0]  ;;  %v4008_v61 = vld [vmem:[%s6021_s3 + $0xe4] sm:$0xf] }
  0xb9   : > { %v887_v6 = vrot.slane %v886_v51, 4  ;;  %v1464_v49 = vsel %vm4562_vm13, %v3488_v36, %v1463_v55  ;;  %v1465_v11 = vrot.slane %v1463_v55, 4  ;;  %v3573_v23 = vor.u32 %v4011_v28, %v3572_v8  ;;  %v3566_v46 = vld [vmem:[%s6021_s3 + $0xe8] sm:$0xf0]  ;;  %v3985_v48 = vld [vmem:[%s6021_s3 + $0x64] sm:$0xf0] }
  0xba   : > { %v897_v42 = vrot.slane %v896_v26, 4  ;;  %1088 = vrot.lane.b32.xlu2 %v1077_v3, %s4241_s6  ;;  %1767 = vmatpush.bf16.msra.mxu0 %v3581_v9  ;;  %v1551_v19 = vunpack.c.l.b16 %v1464_v49  ;;  %v3717_v35 = vor.u32 %v3987_v27, %v3716_v24  ;;  %v1457_v9 = vsel %vm4562_vm13, %v3487_v37, %v1456_v59  ;;  %v3700_v36 = vld [vmem:[%s6021_s3 + $0x50] sm:$0xf]  ;;  %v4007_v59 = vld [vmem:[%s6021_s3 + $0xd4] sm:$0xf0] }
  0xbb   : > { %3646 = vmatmul.msk.bf16.gmra.mxu1 %vm1122_vm12, %v1559_v45  ;;  %3654 = vmatmul.msk.bf16.gmra.mxu3 %vm1122_vm12, %v1559_v45  ;;  %v4010_v45 = vld [vmem:[%s6021_s3 + $0xf4] sm:$0xf]  ;;  %v892_v15 = vsel %vm4571_vm14, %v887_v6, %v891_v47  ;;  %v1467_v38 = vsel %vm4562_vm13, %v1465_v11, %v1466_v62  ;;  %v3708_v47 = vld [vmem:[%s6021_s3 + $0x60] sm:$0xf]  ;;  %v1460_v50 = vsel %vm4562_vm13, %v1458_v2, %v1459_v34  ;;  %v3556_v37 = vld [vmem:[%s6021_s3 + $0xd0] sm:$0xf]  ;;  %v1549_v34 = vunpack.c.l.b16 %v1457_v9 }
  0xbc   : > { %v3577_v14 = vor.u32 %v4010_v45, %v3574_v12  ;;  %v902_v30 = vsel %vm4571_vm14, %v897_v42, %v901_v52  ;;  %v1068_v29 = vunpack.c.l.b16 %v892_v15  ;;  %1865 = vmatpush.bf16.msra.mxu2 %v3585_v25  ;;  %v1552_v44 = vunpack.c.l.b16 %v1467_v38  ;;  %2104 = vmatpush.bf16.msrb.mxu1 %v3717_v35  ;;  %v4006_v62 = vld [vmem:[%s6021_s3 + $0xd4] sm:$0xf]  ;;  %v3558_v2 = vld [vmem:[%s6021_s3 + $0xd8] sm:$0xf0]  ;;  %v3692_v8 = vld [vmem:[%s6021_s3 + $0x40] sm:$0xf] }
  0xbd   : > { %v1069_v5 = vunpack.c.l.b16 %v902_v30  ;;  %v3709_v51 = vor.u32 %v3985_v48, %v3708_v47  ;;  %v3565_v26 = vor.u32 %v4009_v40, %v3564_v53  ;;  %v3569_v1 = vor.u32 %v4008_v61, %v3566_v46  ;;  %v3981_v28 = vld [vmem:[%s6021_s3 + $0x44] sm:$0xf0]  ;;  %v3548_v49 = vld [vmem:[%s6021_s3 + $0xc0] sm:$0xf]  ;;  %v4004_v12 = vld [vmem:[%s6021_s3 + $0xc4] sm:$0xf] }
  0xbe   : > { %v4915_v25 = vpack.c.b16 %v1552_v44, %v1551_v19  ;;  %1768 = vmatpush.bf16.msra.mxu0 %v3573_v23  ;;  %v1550_v55 = vunpack.c.l.b16 %v1460_v50  ;;  %v3701_v3 = vor.u32 %v3983_v31, %v3700_v36  ;;  %v3557_v6 = vor.u32 %v4007_v59, %v3556_v37  ;;  %v4005_v11 = vld [vmem:[%s6021_s3 + $0xc4] sm:$0xf0]  ;;  %v3550_v15 = vld [vmem:[%s6021_s3 + $0xc8] sm:$0xf0]  ;;  %v3748_v35 = vld [vmem:[%s6021_s3 + $0xb0] sm:$0xf] }
  0xbf   : > { %v1079_v52 = vpack.c.b16 %v1069_v5, %v1068_v29  ;;  %v3561_v42 = vor.u32 %v4006_v62, %v3558_v2  ;;  %v3693_v19 = vor.u32 %v3981_v28, %v3692_v8  ;;  %v3549_v23 = vor.u32 %v4005_v11, %v3548_v49  ;;  %v3994_v53 = vld [vmem:[%s6021_s3 + $0xb4] sm:$0xf]  ;;  %v3750_v40 = vld [vmem:[%s6021_s3 + $0xb8] sm:$0xf0]  ;;  %v3684_v61 = vld [vmem:[%s6021_s3 + $0x30] sm:$0xf] }
  0xc0   : > { %1866 = vmatpush.bf16.msra.mxu2 %v3577_v14  ;;  %2105 = vmatpush.bf16.msrb.mxu1 %v3709_v51  ;;  %v1560_v45 = vpack.c.b16 %v1550_v55, %v1549_v34  ;;  %v3489_v14 = vrot.slane %v4685_v21, 9  ;;  %v1470_v24 = vrot.slane %v4692_v22, 5  ;;  %v1473_v27 = vrot.slane %v4698_v16, 5  ;;  %v3995_v21 = vld [vmem:[%s6021_s3 + $0xb4] sm:$0xf0] }
  0xc1   : > { %1092 = vrot.lane.b32.xlu1 %v1079_v52, %s4241_s6  ;;  %v3553_v30 = vor.u32 %v4004_v12, %v3550_v15  ;;  %v3749_v16 = vor.u32 %v3995_v21, %v3748_v35  ;;  %v3753_v44 = vor.u32 %v3994_v53, %v3750_v40  ;;  %v3979_v46 = vld [vmem:[%s6021_s3 + $0x34] sm:$0xf0]  ;;  %v3676_v47 = vld [vmem:[%s6021_s3 + $0x20] sm:$0xf]  ;;  %v3977_v48 = vld [vmem:[%s6021_s3 + $0x24] sm:$0xf0] }
  0xc2   : > { %1769 = vmatpush.bf16.msra.mxu0 %v3565_v26  ;;  %v1471_v29 = vsel %vm4562_vm13, %v3489_v14, %v1470_v24  ;;  %v1472_v38 = vrot.slane %v1470_v24, 4  ;;  %v3685_v50 = vor.u32 %v3979_v46, %v3684_v61  ;;  %v3740_v51 = vld [vmem:[%s6021_s3 + $0xa0] sm:$0xf]  ;;  %v3993_v52 = vld [vmem:[%s6021_s3 + $0xa4] sm:$0xf0]  ;;  %v3677_v34 = vor.u32 %v3977_v48, %v3676_v47 }
  0xc3   : > { %v1553_v22 = vunpack.c.l.b16 %v1471_v29  ;;  %2157 = vmatpush.bf16.msrb.mxu3 %v3749_v16  ;;  %v3986_v26 = vld [vmem:[%s6021_s3 + $0x74] sm:$0xf]  ;;  %v3741_v36 = vor.u32 %v3993_v52, %v3740_v51  ;;  %v3718_v31 = vld [vmem:[%s6021_s3 + $0x78] sm:$0xf0]  ;;  %v3975_v37 = vld [vmem:[%s6021_s3 + $0x14] sm:$0xf0] }
  0xc4   : > { %1867 = vmatpush.bf16.msra.mxu2 %v3569_v1  ;;  %2106 = vmatpush.bf16.msrb.mxu1 %v3701_v3  ;;  %v1474_v5 = vsel %vm4562_vm13, %v1472_v38, %v1473_v27  ;;  %v3668_v1 = vld [vmem:[%s6021_s3 + $0x10] sm:$0xf]  ;;  %v3721_v55 = vor.u32 %v3986_v26, %v3718_v31  ;;  %v3991_v2 = vld [vmem:[%s6021_s3 + $0x94] sm:$0xf0]  ;;  %v5013_v3 = vld [vmem:[#allocation2 + $0x54] sm:$0xf] }
  0xc5   : > { %v1554_v9 = vunpack.c.l.b16 %v1474_v5  ;;  %v3732_v62 = vld [vmem:[%s6021_s3 + $0x90] sm:$0xf]  ;;  %v5017_v8 = vld [vmem:[#allocation2 + $0x5c] sm:$0x1]  ;;  %v928_v28 = vshrl.u32 %v5013_v3, 16  ;;  %v3669_v14 = vor.u32 %v3975_v37, %v3668_v1 }
  0xc6   : > { %1770 = vmatpush.bf16.msra.mxu0 %v3557_v6  ;;  %v5015_v6 = vld [vmem:[#allocation2 + $0x58] sm:$0xf]  ;;  %v3733_v49 = vor.u32 %v3991_v2, %v3732_v62  ;;  %v947_v12 = vshll.u32 %v5017_v8, 16  ;;  %v3660_v38 = vld [vmem:[%s6021_s3] sm:$0xf] }
  0xc7   : > { %v5005_v59 = vpack.c.b16 %v1554_v9, %v1553_v22  ;;  %2158 = vmatpush.bf16.msrb.mxu3 %v3741_v36  ;;  %v937_v11 = vshll.u32 %v5015_v6, 16  ;;  %v930_v15 = vrot.slane %v928_v28, 4  ;;  %v3973_v35 = vld [vmem:[%s6021_s3 + $0x4] sm:$0xf0]  ;;  %v5040_v46 = vld [vmem:[#allocation2 + $0x4c] sm:$0xf] }
  0xc8   : > { %1868 = vmatpush.bf16.msra.mxu2 %v3561_v42  ;;  %2107 = vmatpush.bf16.msrb.mxu1 %v3693_v19  ;;  %v931_v42 = vshll.u32 %v5013_v3, 16  ;;  %v949_v22 = vrot.slane %v947_v12, 5  ;;  %v3661_v61 = vor.u32 %v3973_v35, %v3660_v38  ;;  %v913_v52 = vshll.u32 %v5040_v46, 16  ;;  %v5052_v1 = vld [vmem:[#allocation2 + $0x50] sm:$0x1] }
  0xc9   : > { %v939_v24 = vrot.slane %v937_v11, 5  ;;  %v917_v26 = vshrl.u32 %v5040_v46, 16  ;;  %v923_v62 = vshll.u32 %v5052_v1, 16  ;;  %v3984_v12 = vld [vmem:[%s6021_s3 + $0x64] sm:$0xf] }
  0xca   : > { %1771 = vmatpush.bf16.msra.mxu0 %v3549_v23  ;;  %v933_v19 = vrot.slane %v931_v42, 5  ;;  %v3724_v23 = vld [vmem:[%s6021_s3 + $0x80] sm:$0xf]  ;;  %v5067_v38 = vld [vmem:[#allocation2 + $0x18] sm:$0xf] }
  0xcb   : > { %3647 = vmatmul.msk.bf16.gmra.mxu1 %vm1122_vm12, %v1560_v45  ;;  %3655 = vmatmul.msk.bf16.gmra.mxu3 %vm1122_vm12, %v1560_v45  ;;  %v941_v45 = vshrl.u32 %v5015_v6, 16  ;;  %v925_v28 = vrot.slane %v923_v62, 5  ;;  %v5069_v35 = vld [vmem:[#allocation2 + $0x1c] sm:$0xf] }
  0xcc   : > { %1869 = vmatpush.bf16.msra.mxu2 %v3553_v30  ;;  %2108 = vmatpush.bf16.msrb.mxu1 %v3685_v50  ;;  %v3989_v30 = vld [vmem:[%s6021_s3 + $0x84] sm:$0xf0]  ;;  %v934_v29 = vor.u32 %v933_v19, %v930_v15  ;;  %v3710_v15 = vld [vmem:[%s6021_s3 + $0x68] sm:$0xf0] }
  0xcd   : > { %v943_v27 = vrot.slane %v941_v45, 4  ;;  %2159 = vmatpush.bf16.msrb.mxu3 %v3733_v49  ;;  %v3725_v16 = vor.u32 %v3989_v30, %v3724_v23  ;;  %v3996_v19 = vld [vmem:[#allocation2 + $0xc] sm:$0xff] }
  0xce   : > { %2202 = vmatpush.bf16.msrb.mxu0 %v3721_v55  ;;  %v935_v53 = vrot.slane %v934_v29, 4  ;;  %v919_v55 = vrot.slane %v917_v26, 4  ;;  %v980_v29 = vrot.slane %v4711_v63, 5 }
  0xcf   : > { %v944_v21 = vor.u32 %v943_v27, %v939_v24 }
  0xd0   : > { %2255 = vmatpush.bf16.msrb.mxu2 %v3753_v44  ;;  %2109 = vmatpush.bf16.msrb.mxu1 %v3677_v34  ;;  %v940_v5 = vsel %vm4571_vm14, %v935_v53, %v939_v24  ;;  %v5038_v44 = vld [vmem:[#allocation2 + $0x48] sm:$0xf]  ;;  %v915_v34 = vrot.slane %v913_v52, 5  ;;  %v3713_v24 = vor.u32 %v3984_v12, %v3710_v15  ;;  %v2335_v53 = vshll.u32 %v5069_v35, 16  ;;  %v3992_v12 = vld [vmem:[%s6021_s3 + $0xa4] sm:$0xf] }
  0xd1   : > { %v945_v40 = vrot.slane %v944_v21, 4  ;;  %v1072_v48 = vunpack.c.l.b16 %v940_v5  ;;  %2160 = vmatpush.bf16.msrb.mxu3 %v3725_v16  ;;  %v904_v9 = vshrl.u32 %v5038_v44, 16  ;;  %v907_v51 = vshll.u32 %v5038_v44, 16  ;;  %v3742_v15 = vld [vmem:[%s6021_s3 + $0xa8] sm:$0xf0] }
  0xd2   : > { %v920_v2 = vor.u32 %v919_v55, %v915_v34  ;;  %2203 = vmatpush.bf16.msrb.mxu0 %v3713_v24  ;;  %v2329_v16 = vshll.u32 %v5067_v38, 16  ;;  %v2337_v5 = vrot.slane %v2335_v53, 5 }
  0xd3   : > { %v950_v47 = vsel %vm4571_vm14, %v945_v40, %v949_v22  ;;  %v906_v36 = vrot.slane %v904_v9, 4  ;;  %v909_v37 = vrot.slane %v907_v51, 5  ;;  %v2326_v22 = vshrl.u32 %v5067_v38, 16 }
  0xd4   : > { %2110 = vmatpush.bf16.msrb.mxu1 %v3669_v14  ;;  %v1073_v50 = vunpack.c.l.b16 %v950_v47  ;;  %v921_v49 = vrot.slane %v920_v2, 4  ;;  %v2339_v40 = vshrl.u32 %v5069_v35, 16  ;;  %v2331_v63 = vrot.slane %v2329_v16, 5  ;;  %v2303_v47 = vld [vmem:[#allocation2 + $0x20] sm:$0x1] }
  0xd5   : > { %v983_v9 = vrot.slane %v4714_v10, 5  ;;  %v982_v51 = vrot.slane %v980_v29, 4 }
  0xd6   : > { %v1081_v31 = vpack.c.b16 %v1073_v50, %v1072_v48  ;;  %v926_v45 = vsel %vm4571_vm14, %v921_v49, %v925_v28  ;;  %v2341_v48 = vrot.slane %v2339_v40, 4  ;;  %v3442_v50 = vrot.slane %v4707_v56, 9  ;;  %v3997_v28 = vld [vmem:[#allocation2 + $0x18] sm:$0xff] }
  0xd7   : > { %v1071_v14 = vunpack.c.l.b16 %v926_v45 }
  0xd8   : > { %2111 = vmatpush.bf16.msrb.mxu1 %v3661_v61  ;;  %1096 = vrot.lane.b32.xlu0 %v1081_v31, %s4241_s6  ;;  %v2328_v61 = vrot.slane %v2326_v22, 4  ;;  %v2345_v31 = vshll.u32 %v2303_v47, 16  ;;  %v981_v62 = vsel %vm4562_vm13, %v3442_v50, %v980_v29  ;;  %v3964_v50 = vld [vmem:[#allocation2] sm:$0xff] }
  0xda   : > { %v2332_v52 = vor.u32 %v2331_v63, %v2328_v61  ;;  %v2347_v55 = vrot.slane %v2345_v31, 5  ;;  %v987_v63 = vrot.slane %v4668_v54, 5 }
  0xdb   : > { %3648 = vmatmul.msk.bf16.gmra.mxu1 %vm1122_vm12, %v4915_v25  ;;  %3656 = vmatmul.msk.bf16.gmra.mxu3 %vm1122_vm12, %v4915_v25  ;;  %v910_v25 = vor.u32 %v909_v37, %v906_v36  ;;  %v2342_v36 = vor.u32 %v2341_v48, %v2337_v5 }
  0xdc   : > { %v2333_v37 = vrot.slane %v2332_v52, 4  ;;  %v989_v48 = vrot.slane %v987_v63, 4 }
  0xdd   : > { %v911_v42 = vrot.slane %v910_v25, 4 }
  0xde   : > { %v5083_v26 = vpop.permute.xlu2 %1531  ;;  %v2338_v10 = vsel %vm4571_vm14, %v2333_v37, %v2337_v5 }
  0xdf   : > { %v916_v11 = vsel %vm4571_vm14, %v911_v42, %v915_v34  ;;  %v2343_v34 = vrot.slane %v2342_v36, 4  ;;  %v2621_v2 = vunpack.c.l.b16 %v2338_v10  ;;  %v3694_v10 = vld [vmem:[%s6021_s3 + $0x48] sm:$0xf0] }
  0xe0   : > { %v1070_v23 = vunpack.c.l.b16 %v916_v11  ;;  %v1098_v11 = vunpack.c.l.b16 %v981_v62 }
  0xe1   : > { %v2348_v56 = vsel %vm4571_vm14, %v2343_v34, %v2347_v55  ;;  %v3998_v34 = vld [vmem:[#allocation2 + $0x24] sm:$0xff] }
  0xe2   : > { %v1080_v27 = vpack.c.b16 %v1071_v14, %v1070_v23  ;;  %v2622_v42 = vunpack.c.l.b16 %v2348_v56  ;;  %v3745_v23 = vor.u32 %v3992_v12, %v3742_v15  ;;  %v2546_v14 = vrot.slane %v2303_v47, 5 }
  0xe3   : > { %v3443_v47 = vrot.slane %v4660_v41, 9 }
  0xe4   : > { %1094 = vrot.lane.b32.xlu2 %v1080_v27, %s4241_s6  ;;  %v2637_v24 = vpack.c.b16 %v2622_v42, %v2621_v2  ;;  %v3982_v27 = vld [vmem:[%s6021_s3 + $0x54] sm:$0xf]  ;;  %2256 = vmatpush.bf16.msrb.mxu2 %v3745_v23  ;;  %v994_v42 = vrot.slane %v4726_v33, 5  ;;  %v3444_v33 = vrot.slane %v4719_v20, 9 }
  0xe5   : > { %v988_v36 = vsel %vm4562_vm13, %v3443_v47, %v987_v63  ;;  %v5167_v63 = vld [vmem:[#allocation2 + $0x38] sm:$0x1] }
  0xe6   : > { %2645 = vrot.lane.b32.xlu1 %v2637_v24, %s4241_s6  ;;  %v1100_v55 = vunpack.c.l.b16 %v988_v36  ;;  %v995_v20 = vsel %vm4562_vm13, %v3444_v33, %v994_v42 }
  0xe7   : > { %v1524_v30 = vpop.permute.xlu0 %1523 }
  0xe8   : > { %v1565_v21 = vsel %vm1122_vm12, %v3996_v19, %v1524_v30  ;;  %v6024_v19 = vrot.slane %v5069_v35, 5  ;;  %v3702_v30 = vld [vmem:[%s6021_s3 + $0x58] sm:$0xf0] }
  0xe9   : > { %1772 = vmatmul.bf16.vlgmr.msra.gmra.mxu0 %v1565_v21  ;;  %1870 = vmatmul.bf16.vlgmr.msra.gmra.mxu2 %v1565_v21  ;;  %v3705_v21 = vor.u32 %v3982_v27, %v3702_v30  ;;  %v3965_v27 = vld [vmem:[#allocation2 + $0xc] sm:$0xff] }
  0xea   : > { %v2545_v29 = vrot.slane %v6024_v19, 4  ;;  %v5217_v19 = vld [vmem:[#allocation2 + $0x3c] sm:$0xf] }
  0xeb   : > { %3649 = vmatmul.msk.bf16.gmra.mxu1 %vm1122_vm12, %v5005_v59  ;;  %3657 = vmatmul.msk.bf16.gmra.mxu3 %vm1122_vm12, %v5005_v59  ;;  %v984_v59 = vsel %vm4562_vm13, %v982_v51, %v983_v9  ;;  %v990_v9 = vrot.slane %v4673_v60, 5 }
  0xec   : > { %v1099_v45 = vunpack.c.l.b16 %v984_v59  ;;  %v5112_v16 = vpop.permute.xlu2 %1533  ;;  %v5118_v40 = vsel %vm4562_vm13, %v2545_v29, %v2546_v14  ;;  %2204 = vmatpush.bf16.msrb.mxu0 %v3705_v21  ;;  %v3980_v59 = vld [vmem:[%s6021_s3 + $0x44] sm:$0xf]  ;;  %v996_v21 = vrot.slane %v994_v42, 4 }
  0xed   : > { %v991_v54 = vsel %vm4562_vm13, %v989_v48, %v990_v9  ;;  %v3697_v56 = vor.u32 %v3980_v59, %v3694_v10  ;;  %v5179_v59 = vld [vmem:[#allocation2 + $0x24] sm:$0xf]  ;;  %v5181_v10 = vld [vmem:[#allocation2 + $0x28] sm:$0xf] }
  0xee   : > { %v5114_v53 = vpack.c.b16 %v1099_v45, %v1098_v11  ;;  %v1101_v62 = vunpack.c.l.b16 %v991_v54  ;;  %v5155_v11 = vld [vmem:[#allocation2 + $0x34] sm:$0xf]  ;;  %v2393_v54 = vshll.u32 %v5167_v63, 16  ;;  %v2353_v42 = vshll.u32 %v5179_v59, 16 }
  0xef   : > { %v1526_v49 = vpop.permute.xlu0 %1525  ;;  %v2383_v15 = vshll.u32 %v5155_v11, 16  ;;  %v2387_v14 = vshrl.u32 %v5155_v11, 16 }
  0xf0   : > { %v1569_v22 = vsel %vm1122_vm12, %v3997_v28, %v1526_v49  ;;  %2205 = vmatpush.bf16.msrb.mxu0 %v3697_v56  ;;  %v5150_v28 = vpack.c.b16 %v1101_v62, %v1100_v55  ;;  %v5153_v49 = vld [vmem:[#allocation2 + $0x30] sm:$0xf]  ;;  %v2395_v62 = vrot.slane %v2393_v54, 5 }
  0xf1   : > { %v5091_v25 = vpop.f32.mrf.mxu1  ;;  %v2374_v45 = vshrl.u32 %v5153_v49, 16  ;;  %v2377_v12 = vshll.u32 %v5153_v49, 16  ;;  %v2385_v47 = vrot.slane %v2383_v15, 5  ;;  %v2389_v48 = vrot.slane %v2387_v14, 4 }
  0xf2   : > { %v2363_v14 = vshrl.u32 %v5181_v10, 16 }
  0xf3   : > { %v2376_v30 = vrot.slane %v2374_v45, 4  ;;  %v2379_v29 = vrot.slane %v2377_v12, 5  ;;  %v2390_v36 = vor.u32 %v2389_v48, %v2385_v47  ;;  %v2359_v45 = vshll.u32 %v5181_v10, 16 }
  0xf5   : > { %v2380_v9 = vor.u32 %v2379_v29, %v2376_v30  ;;  %v2391_v55 = vrot.slane %v2390_v36, 4  ;;  %v2355_v29 = vrot.slane %v2353_v42, 5  ;;  %v2365_v36 = vrot.slane %v2363_v14, 4 }
  0xf7   : > { %v2396_v12 = vsel %vm4571_vm14, %v2391_v55, %v2395_v62  ;;  %v3978_v62 = vld [vmem:[%s6021_s3 + $0x34] sm:$0xf] }
  0xf8   : > { %v5120_v61 = vpop.f32.mrf.mxu3  ;;  %v2626_v33 = vunpack.c.l.b16 %v2396_v12 }
  0xf9   : > { %6040 = vst [vmem:[#allocation4_spill] sm:$0xff] %v5120_v61  ;;  %1777 = vmatmul.bf16.gmra.mxu0 %v1569_v22  ;;  %1875 = vmatmul.bf16.gmra.mxu2 %v1569_v22  ;;  %v5123_v5 = vpop.f32.mrf.mxu1  ;;  %v997_v22 = vrot.slane %v4730_v43, 5 }
  0xfa   : > { %v1528_v51 = vpop.permute.xlu1 %1527 }
  0xfb   : > { %3754 = vmatmul.msk.bf16.vlgmr.msrb.gmra.mxu3 %vm1122_vm12, %v5114_v53  ;;  %v1573_v2 = vsel %vm1122_vm12, %v3998_v34, %v1528_v51  ;;  %v998_v43 = vsel %vm4562_vm13, %v996_v21, %v997_v22  ;;  %v2361_v21 = vrot.slane %v2359_v45, 5 }
  0xfc   : > { %v1103_v48 = vunpack.c.l.b16 %v998_v43  ;;  %v5208_v43 = vld [vmem:[#allocation2 + $0x2c] sm:$0x1] }
  0xfd   : > { %v2366_v42 = vor.u32 %v2365_v36, %v2361_v21  ;;  %v2369_v45 = vshll.u32 %v5208_v43, 16  ;;  %v2401_v36 = vshll.u32 %v5217_v19, 16 }
  0xff   : > { %v5139_v41 = vpop.permute.xlu0 %1535 }
 0x100   : > { %v5129_v52 = vpop.f32.mrf.mxu3 }
 0x101   : > { %6041 = vst [vmem:[#allocation5_spill] sm:$0xff] %v5129_v52  ;;  %v1083_v31 = vpop.permute.xlu2 %1082  ;;  %v5141_v60 = vpop.f32.mrf.mxu1 }
 0x102   : > { %v5136_v37 = vsel %vm1122_vm12, %v3964_v50, %v1083_v31  ;;  %v2381_v31 = vrot.slane %v2380_v9, 4  ;;  %v3990_v9 = vld [vmem:[%s6021_s3 + $0x94] sm:$0xf] }
 0x103   : > { %2112 = vmatmul.bf16.vlgmr.msrb.gmra.mxu1 %v5136_v37 }
 0x104   : > { %v2386_v56 = vsel %vm4571_vm14, %v2381_v31, %v2385_v47  ;;  %v1102_v47 = vunpack.c.l.b16 %v995_v20  ;;  %v3686_v20 = vld [vmem:[%s6021_s3 + $0x38] sm:$0xf0] }
 0x105   : > { %v2625_v15 = vunpack.c.l.b16 %v2386_v56 }
 0x107   : > { %v1530_v24 = vpop.permute.xlu1 %1529  ;;  %v2639_v55 = vpack.c.b16 %v2626_v33, %v2625_v15  ;;  %v5215_v33 = vpack.c.b16 %v1103_v48, %v1102_v47 }
 0x108   : > { %v5160_v23 = vpop.f32.mrf.mxu3 }
 0x109   : > { %1782 = vmatmul.bf16.gmra.mxu0 %v1573_v2  ;;  %1880 = vmatmul.bf16.gmra.mxu2 %v1573_v2  ;;  %6042 = vst [vmem:[#allocation6_spill] sm:$0xff] %v5160_v23  ;;  %v5169_v51 = vpop.f32.mrf.mxu1  ;;  %v2350_v2 = vshrl.u32 %v5179_v59, 16 }
 0x10a   : > { %2649 = vrot.lane.b32.xlu0 %v2639_v55, %s4241_s6 }
 0x10b   : > { %3755 = vmatmul.msk.bf16.gmra.mxu3 %vm1122_vm12, %v5150_v28  ;;  %v2352_v30 = vrot.slane %v2350_v2, 4  ;;  %v3689_v2 = vor.u32 %v3978_v62, %v3686_v20 }
 0x10d   : > { %v1085_v50 = vpop.permute.xlu0 %1084  ;;  %v2356_v56 = vor.u32 %v2355_v29, %v2352_v30  ;;  %2206 = vmatpush.bf16.msrb.mxu0 %v3689_v2  ;;  %v5219_v30 = vld [vmem:[#allocation2 + $0x40] sm:$0xf]  ;;  %v1001_v29 = vrot.slane %v4777_v0, 5  ;;  %v3445_v0 = vrot.slane %v4770_v58, 9 }
 0x10e   : > { %v5175_v34 = vsel %vm1122_vm12, %v3965_v27, %v1085_v50  ;;  %v3999_v27 = vld [vmem:[#allocation2 + $0x30] sm:$0xff]  ;;  %v3734_v50 = vld [vmem:[%s6021_s3 + $0x98] sm:$0xf0]  ;;  %v2411_v55 = vshrl.u32 %v5219_v30, 16 }
 0x10f   : > { %v3737_v31 = vor.u32 %v3990_v9, %v3734_v50  ;;  %v1577_v12 = vsel %vm1122_vm12, %v3999_v27, %v1530_v24  ;;  %v2357_v15 = vrot.slane %v2356_v56, 4  ;;  %v2367_v9 = vrot.slane %v2366_v42, 4 }
 0x110   : > { %v5192_v22 = vpop.f32.mrf.mxu3  ;;  %v2371_v50 = vrot.slane %v2369_v45, 5  ;;  %v2398_v27 = vshrl.u32 %v5217_v19, 16  ;;  %v2403_v56 = vrot.slane %v2401_v36, 5  ;;  %v2413_v42 = vrot.slane %v2411_v55, 4  ;;  %v3966_v45 = vld [vmem:[#allocation2 + $0x18] sm:$0xff] }
 0x111   : > { %6043 = vst [vmem:[#allocation7_spill] sm:$0xff] %v5192_v22  ;;  %2257 = vmatpush.bf16.msrb.mxu2 %v3737_v31  ;;  %v2362_v24 = vsel %vm4571_vm14, %v2357_v15, %v2361_v21  ;;  %v2407_v31 = vshll.u32 %v5219_v30, 16  ;;  %v5233_v21 = vld [vmem:[#allocation2 + $0x44] sm:$0x1]  ;;  %v1004_v15 = vrot.slane %v4789_v17, 5  ;;  %v1002_v17 = vsel %vm4562_vm13, %v3445_v0, %v1001_v29 }
 0x112   : > { %v2372_v47 = vsel %vm4571_vm14, %v2367_v9, %v2371_v50  ;;  %v2623_v48 = vunpack.c.l.b16 %v2362_v24  ;;  %v2400_v20 = vrot.slane %v2398_v27, 4  ;;  %v2417_v50 = vshll.u32 %v5233_v21, 16  ;;  %v3678_v0 = vld [vmem:[%s6021_s3 + $0x28] sm:$0xf0] }
 0x113   : > { %2117 = vmatmul.bf16.gmra.mxu1 %v5175_v34  ;;  %v2624_v62 = vunpack.c.l.b16 %v2372_v47  ;;  %v2409_v2 = vrot.slane %v2407_v31, 5 }
 0x114   : > { %v5200_v54 = vpop.permute.xlu1 %1537  ;;  %v2404_v27 = vor.u32 %v2403_v56, %v2400_v20  ;;  %v2419_v58 = vrot.slane %v2417_v50, 5  ;;  %v4000_v20 = vld [vmem:[#allocation2 + $0x3c] sm:$0xff] }
 0x115   : > { %v2638_v9 = vpack.c.b16 %v2624_v62, %v2623_v48  ;;  %v2414_v47 = vor.u32 %v2413_v42, %v2409_v2  ;;  %v1581_v50 = vsel %vm1122_vm12, %v4000_v20, %v5083_v26 }
 0x116   : > { %v2405_v36 = vrot.slane %v2404_v27, 4 }
 0x117   : > { %v5213_v14 = vpop.f32.mrf.mxu1  ;;  %2647 = vrot.lane.b32.xlu2 %v2638_v9, %s4241_s6  ;;  %v2415_v55 = vrot.slane %v2414_v47, 4  ;;  %v1104_v9 = vunpack.c.l.b16 %v1002_v17  ;;  %v3967_v17 = vld [vmem:[#allocation2 + $0x24] sm:$0xff] }
 0x118   : > { %v2410_v62 = vsel %vm4571_vm14, %v2405_v36, %v2409_v2  ;;  %v1011_v36 = vrot.slane %v4758_v7, 5 }
 0x119   : > { %1787 = vmatmul.bf16.gmra.mxu0 %v1577_v12  ;;  %1885 = vmatmul.bf16.gmra.mxu2 %v1577_v12  ;;  %v1003_v12 = vrot.slane %v1001_v29, 4  ;;  %v2420_v56 = vsel %vm4571_vm14, %v2415_v55, %v2419_v58  ;;  %v2627_v42 = vunpack.c.l.b16 %v2410_v62  ;;  %v3976_v29 = vld [vmem:[%s6021_s3 + $0x24] sm:$0xf]  ;;  %v1008_v58 = vrot.slane %v4754_v39, 5  ;;  %v1089_v62 = vpop.permute.xlu2 %1088 }
 0x11b   : > { %3756 = vmatmul.msk.bf16.gmra.mxu3 %vm1122_vm12, %v5215_v33  ;;  %v1005_v48 = vsel %vm4562_vm13, %v1003_v12, %v1004_v15  ;;  %v3681_v12 = vor.u32 %v3976_v29, %v3678_v0  ;;  %v1010_v26 = vrot.slane %v1008_v58, 4  ;;  %v3988_v29 = vld [vmem:[%s6021_s3 + $0x84] sm:$0xf]  ;;  %v3726_v0 = vld [vmem:[%s6021_s3 + $0x88] sm:$0xf0] }
 0x11d   : > { %v5237_v24 = vpop.f32.mrf.mxu3  ;;  %2207 = vmatpush.bf16.msrb.mxu0 %v3681_v12  ;;  %v3974_v12 = vld [vmem:[%s6021_s3 + $0x14] sm:$0xf] }
 0x11e   : > { %6044 = vst [vmem:[#allocation8_spill] sm:$0xff] %v5237_v24  ;;  %v1087_v22 = vpop.permute.xlu1 %1086 }
 0x11f   : > { %v5240_v23 = vpop.f32.mrf.mxu1  ;;  %v5243_v31 = vsel %vm1122_vm12, %v3966_v45, %v1087_v22  ;;  %v1105_v22 = vunpack.c.l.b16 %v1005_v48  ;;  %v2628_v45 = vunpack.c.l.b16 %v2420_v56  ;;  %v4199_v48 = vld [vmem:[#allocation2 + $0x30] sm:$0xf]  ;;  %v5276_v56 = vsel %vm1122_vm12, %v3967_v17, %v1089_v62  ;;  %v5306_v62 = vld [vmem:[#allocation2 + $0x58] sm:$0xf] }
 0x120   : > { %v3446_v55 = vrot.slane %v4199_v48, 9  ;;  %6051 = vst [vmem:[#allocation15_spill] sm:$0xff] %v5306_v62 }
 0x121   : > { %v2640_v15 = vpack.c.b16 %v2628_v45, %v2627_v42  ;;  %v5264_v27 = vpack.c.b16 %v1105_v22, %v1104_v9  ;;  %v1012_v9 = vsel %vm4562_vm13, %v1010_v26, %v1011_v36  ;;  %v4001_v22 = vld [vmem:[#allocation2 + $0x48] sm:$0xff]  ;;  %v5304_v26 = vld [vmem:[#allocation2 + $0x54] sm:$0xf] }
 0x122   : > { %v1009_v39 = vsel %vm4562_vm13, %v3446_v55, %v1008_v58  ;;  %v1107_v45 = vunpack.c.l.b16 %v1012_v9  ;;  %v1585_v17 = vsel %vm1122_vm12, %v4001_v22, %v5112_v16  ;;  %v1015_v55 = vrot.slane %v4828_v4, 5  ;;  %6050 = vst [vmem:[#allocation14_spill] sm:$0xff] %v5304_v26  ;;  %v3968_v4 = vld [vmem:[#allocation2 + $0x30] sm:$0xff] }
 0x123   : > { %2122 = vmatmul.bf16.gmra.mxu1 %v5243_v31  ;;  %2651 = vrot.lane.b32.xlu1 %v2640_v15, %s4241_s6  ;;  %v1106_v7 = vunpack.c.l.b16 %v1009_v39  ;;  %v3729_v15 = vor.u32 %v3988_v29, %v3726_v0  ;;  %v2446_v9 = vshrl.u32 %v5304_v26, 16  ;;  %v2449_v29 = vshll.u32 %v5304_v26, 16 }
 0x124   : > { %v2455_v0 = vshll.u32 %v5306_v62, 16  ;;  %v2459_v16 = vshrl.u32 %v5306_v62, 16  ;;  %v1018_v22 = vrot.slane %v4830_v13, 5 }
 0x125   : > { %v5260_v2 = vpop.f32.mrf.mxu3  ;;  %2258 = vmatpush.bf16.msrb.mxu2 %v3729_v15  ;;  %v5301_v48 = vpack.c.b16 %v1107_v45, %v1106_v7  ;;  %v2448_v7 = vrot.slane %v2446_v9, 4  ;;  %v2451_v45 = vrot.slane %v2449_v29, 5  ;;  %v1017_v15 = vrot.slane %v1015_v55, 4 }
 0x126   : > { %6045 = vst [vmem:[#allocation9_spill] sm:$0xff] %v5260_v2 }
 0x127   : > { %v2452_v2 = vor.u32 %v2451_v45, %v2448_v7  ;;  %v1019_v61 = vsel %vm4562_vm13, %v1017_v15, %v1018_v22  ;;  %v5332_v7 = vld [vmem:[#allocation2 + $0x4c] sm:$0xf] }
 0x128   : > { %v5267_v47 = vpop.f32.mrf.mxu1 }
 0x129   : > { %6046 = vst [vmem:[#allocation10_spill] sm:$0xff] %v5267_v47  ;;  %1792 = vmatmul.bf16.gmra.mxu0 %v1581_v50  ;;  %1890 = vmatmul.bf16.gmra.mxu2 %v1581_v50  ;;  %v3670_v50 = vld [vmem:[%s6021_s3 + $0x18] sm:$0xf0]  ;;  %v2453_v13 = vrot.slane %v2452_v2, 4 }
 0x12a   : > { %v3673_v58 = vor.u32 %v3974_v12, %v3670_v50  ;;  %v3447_v12 = vrot.slane %v4825_v57, 9  ;;  %v5318_v50 = vld [vmem:[#allocation2 + $0x5c] sm:$0x1] }
 0x12b   : > { %3757 = vmatmul.msk.bf16.gmra.mxu3 %vm1122_vm12, %v5264_v27  ;;  %6053 = vst [vmem:[#allocation17_spill] sm:$0xff] %v5318_v50  ;;  %v2465_v24 = vshll.u32 %v5318_v50, 16 }
 0x12c   : > { %2208 = vmatpush.bf16.msrb.mxu0 %v3673_v58  ;;  %v2457_v58 = vrot.slane %v2455_v0, 5  ;;  %v1016_v57 = vsel %vm4562_vm13, %v3447_v12, %v1015_v55  ;;  %v4002_v12 = vld [vmem:[#allocation2 + $0x54] sm:$0xff] }
 0x12d   : > { %v2467_v9 = vrot.slane %v2465_v24, 5 }
 0x12e   : > { %v5273_v20 = vpop.f32.mrf.mxu3  ;;  %v2458_v2 = vsel %vm4571_vm14, %v2453_v13, %v2457_v58  ;;  %v1109_v13 = vunpack.c.l.b16 %v1019_v61  ;;  %v5357_v61 = vld [vmem:[#allocation2 + $0x50] sm:$0x1] }
 0x12f   : > { %6047 = vst [vmem:[#allocation11_spill] sm:$0xff] %v5273_v20  ;;  %v1091_v20 = vpop.permute.xlu0 %1090  ;;  %v2631_v22 = vunpack.c.l.b16 %v2458_v2  ;;  %v2441_v50 = vshll.u32 %v5357_v61, 16 }
 0x130   : > { %v5278_v42 = vpop.f32.mrf.mxu1  ;;  %v5324_v29 = vsel %vm1122_vm12, %v3968_v4, %v1091_v20  ;;  %v2435_v4 = vshrl.u32 %v5332_v7, 16 }
 0x131   : > { %6048 = vst [vmem:[#allocation12_spill] sm:$0xff] %v5278_v42 }
 0x133   : > { %2127 = vmatmul.bf16.gmra.mxu1 %v5276_v56 }
 0x136   : > { %v5297_v36 = vpop.f32.mrf.mxu3 }
 0x137   : > { %6049 = vst [vmem:[#allocation13_spill] sm:$0xff] %v5297_v36  ;;  %v2461_v36 = vrot.slane %v2459_v16, 4  ;;  %v5330_v16 = vld [vmem:[#allocation2 + $0x48] sm:$0xf] }
 0x138   : > { %v5308_v39 = vpop.f32.mrf.mxu1  ;;  %v2422_v24 = vshrl.u32 %v5330_v16, 16  ;;  %v2425_v20 = vshll.u32 %v5330_v16, 16 }
 0x139   : > { %6052 = vst [vmem:[#allocation16_spill] sm:$0xff] %v5308_v39  ;;  %1797 = vmatmul.bf16.gmra.mxu0 %v1585_v17  ;;  %1895 = vmatmul.bf16.gmra.mxu2 %v1585_v17  ;;  %v2462_v17 = vor.u32 %v2461_v36, %v2457_v58  ;;  %v2431_v36 = vshll.u32 %v5332_v7, 16  ;;  %v1108_v58 = vunpack.c.l.b16 %v1016_v57  ;;  %v3972_v39 = vld [vmem:[%s6021_s3 + $0x4] sm:$0xf]  ;;  %v4051_v57 = vld [vmem:[%s6021_s3 + $0x1f4] sm:$0xf0] }
 0x13b   : > { %3758 = vmatmul.msk.bf16.gmra.mxu3 %vm1122_vm12, %v5301_v48  ;;  %v2463_v0 = vrot.slane %v2462_v17, 4  ;;  %v2424_v17 = vrot.slane %v2422_v24, 4  ;;  %v3892_v24 = vld [vmem:[%s6021_s3 + $0x1f0] sm:$0xf] }
 0x13d   : > { %v2468_v55 = vsel %vm4571_vm14, %v2463_v0, %v2467_v9  ;;  %v3662_v9 = vld [vmem:[%s6021_s3 + $0x8] sm:$0xf0]  ;;  %v2437_v0 = vrot.slane %v2435_v4, 4  ;;  %v3884_v4 = vld [vmem:[%s6021_s3 + $0x1e0] sm:$0xf] }
 0x13e   : > { %v5321_v52 = vpop.f32.mrf.mxu3  ;;  %v2632_v15 = vunpack.c.l.b16 %v2468_v55  ;;  %v3665_v26 = vor.u32 %v3972_v39, %v3662_v9  ;;  %v1589_v39 = vsel %vm1122_vm12, %v4002_v12, %v5139_v41  ;;  %v2443_v9 = vrot.slane %v2441_v50, 5  ;;  %v5375_v41 = vld [vmem:[#allocation2 + $0x64] sm:$0xf]  ;;  %v4047_v50 = vld [vmem:[%s6021_s3 + $0x1d4] sm:$0xf0] }
 0x13f   : > { %6054 = vst [vmem:[#allocation18_spill] sm:$0xff] %v5321_v52  ;;  %v2427_v52 = vrot.slane %v2425_v20, 5  ;;  %v1022_v12 = vrot.slane %v5040_v46, 5 }
 0x140   : > { %v5334_v45 = vpop.f32.mrf.mxu1  ;;  %v2642_v2 = vpack.c.b16 %v2632_v15, %v2631_v22  ;;  %2209 = vmatpush.bf16.msrb.mxu0 %v3665_v26  ;;  %v5371_v15 = vpack.c.b16 %v1109_v13, %v1108_v58  ;;  %v3876_v58 = vld [vmem:[%s6021_s3 + $0x1d0] sm:$0xf] }
 0x141   : > { %6055 = vst [vmem:[#allocation19_spill] sm:$0xff] %v5334_v45  ;;  %v2433_v45 = vrot.slane %v2431_v36, 5  ;;  %v2428_v20 = vor.u32 %v2427_v52, %v2424_v17  ;;  %v3893_v36 = vor.u32 %v4051_v57, %v3892_v24  ;;  %v4049_v52 = vld [vmem:[%s6021_s3 + $0x1e4] sm:$0xf0]  ;;  %v5373_v24 = vld [vmem:[#allocation2 + $0x60] sm:$0xf] }
 0x142   : > { %2655 = vrot.lane.b32.xlu0 %v2642_v2, %s4241_s6  ;;  %6057 = vst [vmem:[#allocation21_spill] sm:$0xff] %v5373_v24  ;;  %v2470_v13 = vshrl.u32 %v5373_v24, 16  ;;  %v2473_v46 = vshll.u32 %v5373_v24, 16 }
 0x143   : > { %2132 = vmatmul.bf16.gmra.mxu1 %v5324_v29  ;;  %v2438_v55 = vor.u32 %v2437_v0, %v2433_v45  ;;  %v2429_v22 = vrot.slane %v2428_v20, 4  ;;  %v3885_v0 = vor.u32 %v4049_v52, %v3884_v4  ;;  %v3877_v4 = vor.u32 %v4047_v50, %v3876_v58  ;;  %v5396_v52 = vld [vmem:[#allocation2 + $0x68] sm:$0x1] }
 0x144   : > { %2886 = vmatpush.bf16.msra.mxu1 %v3893_v36 }
 0x145   : > { %v2439_v17 = vrot.slane %v2438_v55, 4  ;;  %v2434_v2 = vsel %vm4571_vm14, %v2429_v22, %v2433_v45  ;;  %v2472_v45 = vrot.slane %v2470_v13, 4  ;;  %v2479_v55 = vshll.u32 %v5375_v41, 16 }
 0x146   : > { %v5360_v62 = vpop.f32.mrf.mxu3  ;;  %v2629_v20 = vunpack.c.l.b16 %v2434_v2  ;;  %v1025_v22 = vrot.slane %v5052_v1, 5  ;;  %v1024_v2 = vrot.slane %v1022_v12, 4  ;;  %v2489_v1 = vshll.u32 %v5396_v52, 16 }
 0x147   : > { %6056 = vst [vmem:[#allocation20_spill] sm:$0xff] %v5360_v62  ;;  %v2444_v57 = vsel %vm4571_vm14, %v2439_v17, %v2443_v9  ;;  %v2483_v62 = vshrl.u32 %v5375_v41, 16  ;;  %v3969_v17 = vld [vmem:[#allocation2 + $0x3c] sm:$0xff]  ;;  %v3448_v9 = vrot.slane %v5038_v44, 9  ;;  %v2481_v13 = vrot.slane %v2479_v55, 5 }
 0x148   : > { %v5377_v26 = vpop.f32.mrf.mxu1  ;;  %v2630_v36 = vunpack.c.l.b16 %v2444_v57  ;;  %2887 = vmatpush.bf16.msra.mxu1 %v3885_v0 }
 0x149   : > { %6058 = vst [vmem:[#allocation22_spill] sm:$0xff] %v5377_v26  ;;  %1802 = vmatmul.bf16.gmra.mxu0 %v1589_v39  ;;  %1900 = vmatmul.bf16.gmra.mxu2 %v1589_v39  ;;  %v2475_v39 = vrot.slane %v2473_v46, 5  ;;  %v1093_v26 = vpop.permute.xlu1 %1092  ;;  %v2485_v42 = vrot.slane %v2483_v62, 4  ;;  %v1023_v44 = vsel %vm4562_vm13, %v3448_v9, %v1022_v12  ;;  %v1026_v62 = vsel %vm4562_vm13, %v1024_v2, %v1025_v22 }
 0x14a   : > { %v2641_v57 = vpack.c.b16 %v2630_v36, %v2629_v20  ;;  %v5405_v50 = vsel %vm1122_vm12, %v3969_v17, %v1093_v26  ;;  %v2491_v20 = vrot.slane %v2489_v1, 5  ;;  %v3924_v36 = vld [vmem:[%s6021_s3 + $0x230] sm:$0xf]  ;;  %v1110_v12 = vunpack.c.l.b16 %v1023_v44  ;;  %v3926_v17 = vld [vmem:[%s6021_s3 + $0x238] sm:$0xf0] }
 0x14b   : > { %3759 = vmatmul.msk.bf16.gmra.mxu3 %vm1122_vm12, %v5371_v15  ;;  %v2476_v24 = vor.u32 %v2475_v39, %v2472_v45  ;;  %v2486_v58 = vor.u32 %v2485_v42, %v2481_v13  ;;  %v4059_v42 = vld [vmem:[%s6021_s3 + $0x234] sm:$0xf0]  ;;  %v4003_v45 = vld [vmem:[#allocation2 + $0x60] sm:$0xff]  ;;  %v1111_v22 = vunpack.c.l.b16 %v1026_v62  ;;  %v4058_v39 = vld [vmem:[%s6021_s3 + $0x234] sm:$0xf] }
 0x14c   : > { %2653 = vrot.lane.b32.xlu2 %v2641_v57, %s4241_s6  ;;  %2888 = vmatpush.bf16.msra.mxu1 %v3877_v4  ;;  %v3925_v55 = vor.u32 %v4059_v42, %v3924_v36  ;;  %v3929_v2 = vor.u32 %v4058_v39, %v3926_v17  ;;  %v4045_v1 = vld [vmem:[%s6021_s3 + $0x1c4] sm:$0xf0]  ;;  %v4050_v62 = vld [vmem:[%s6021_s3 + $0x1f4] sm:$0xf]  ;;  %v1593_v42 = vsel %vm1122_vm12, %v4003_v45, %v5200_v54  ;;  %v3860_v39 = vld [vmem:[%s6021_s3 + $0x1b0] sm:$0xf] }
 0x14d   : > { %v2477_v0 = vrot.slane %v2476_v24, 4  ;;  %v2487_v26 = vrot.slane %v2486_v58, 4  ;;  %v4057_v44 = vld [vmem:[%s6021_s3 + $0x224] sm:$0xf0]  ;;  %v4043_v17 = vld [vmem:[%s6021_s3 + $0x1b4] sm:$0xf0] }
 0x14e   : > { %v5401_v47 = vpop.f32.mrf.mxu3  ;;  %2939 = vmatpush.bf16.msra.mxu3 %v3925_v55  ;;  %3037 = vmatpush.bf16.msra.mxu2 %v3929_v2  ;;  %v3861_v54 = vor.u32 %v4043_v17, %v3860_v39  ;;  %v4055_v45 = vld [vmem:[%s6021_s3 + $0x214] sm:$0xf0]  ;;  %v1029_v2 = vrot.slane %v5015_v6, 5 }
 0x14f   : > { %6059 = vst [vmem:[#allocation23_spill] sm:$0xff] %v5401_v47  ;;  %v2482_v24 = vsel %vm4571_vm14, %v2477_v0, %v2481_v13  ;;  %v2492_v9 = vsel %vm4571_vm14, %v2487_v26, %v2491_v20  ;;  %v3868_v13 = vld [vmem:[%s6021_s3 + $0x1c0] sm:$0xf]  ;;  %v3894_v20 = vld [vmem:[%s6021_s3 + $0x1f8] sm:$0xf0] }
 0x150   : > { %v5407_v46 = vpop.f32.mrf.mxu1  ;;  %v2633_v4 = vunpack.c.l.b16 %v2482_v24  ;;  %v2634_v57 = vunpack.c.l.b16 %v2492_v9  ;;  %v3916_v0 = vld [vmem:[%s6021_s3 + $0x220] sm:$0xf]  ;;  %v3869_v58 = vor.u32 %v4045_v1, %v3868_v13  ;;  %v3897_v55 = vor.u32 %v4050_v62, %v3894_v20  ;;  %v3908_v9 = vld [vmem:[%s6021_s3 + $0x210] sm:$0xf]  ;;  %v4039_v39 = vld [vmem:[%s6021_s3 + $0x194] sm:$0xf0] }
 0x151   : > { %v3917_v26 = vor.u32 %v4057_v44, %v3916_v0  ;;  %v5461_v13 = vpack.c.b16 %v1111_v22, %v1110_v12  ;;  %v3852_v1 = vld [vmem:[%s6021_s3 + $0x1a0] sm:$0xf]  ;;  %v4041_v12 = vld [vmem:[%s6021_s3 + $0x1a4] sm:$0xf0]  ;;  %v3770_v22 = vrot.slane %v5067_v38, 9  ;;  %v1032_v0 = vrot.slane %v5017_v8, 5 }
 0x152   : > { %v2643_v24 = vpack.c.b16 %v2634_v57, %v2633_v4  ;;  %2889 = vmatpush.bf16.msra.mxu1 %v3869_v58  ;;  %v3909_v57 = vor.u32 %v4055_v45, %v3908_v9  ;;  %2984 = vmatpush.bf16.msra.mxu0 %v3897_v55  ;;  %v3853_v6 = vor.u32 %v4041_v12, %v3852_v1  ;;  %v3970_v58 = vld [vmem:[#allocation2 + $0x48] sm:$0xff]  ;;  %v3449_v44 = vrot.slane %v5013_v3, 9  ;;  %v3900_v38 = vld [vmem:[%s6021_s3 + $0x200] sm:$0xf] }
 0x153   : > { %2137 = vmatmul.bf16.gmra.mxu1 %v5405_v50  ;;  %2940 = vmatpush.bf16.msra.mxu3 %v3917_v26  ;;  %v1031_v62 = vrot.slane %v1029_v2, 4  ;;  %v2662_v20 = vunpack.c.l.b16 %v5118_v40  ;;  %v6062_v8 = vrot.slane %v5069_v35, 5  ;;  %v3844_v40 = vld [vmem:[%s6021_s3 + $0x190] sm:$0xf] }
 0x154   : > { %2657 = vrot.lane.b32.xlu1 %v2643_v24, %s4241_s6  ;;  %v1095_v24 = vpop.permute.xlu2 %1094  ;;  %v3845_v45 = vor.u32 %v4039_v39, %v3844_v40  ;;  %v5546_v39 = vld [vmem:[#allocation2 + $0x6c] sm:$0xf] }
 0x155   : > { %v2544_v3 = vsel %vm4562_vm13, %v3770_v22, %v6062_v8  ;;  %v5501_v9 = vsel %vm1122_vm12, %v3970_v58, %v1095_v24  ;;  %v1033_v35 = vsel %vm4562_vm13, %v1031_v62, %v1032_v0  ;;  %v3886_v24 = vld [vmem:[%s6021_s3 + $0x1e8] sm:$0xf0]  ;;  %v1097_v8 = vpop.permute.xlu0 %1096 }
 0x156   : > { %v5448_v36 = vpop.f32.mrf.mxu3  ;;  %2890 = vmatpush.bf16.msra.mxu1 %v3861_v54  ;;  %v2661_v17 = vunpack.c.l.b16 %v2544_v3  ;;  %v1030_v54 = vsel %vm4562_vm13, %v3449_v44, %v1029_v2  ;;  %v1113_v22 = vunpack.c.l.b16 %v1033_v35  ;;  %v4037_v2 = vld [vmem:[%s6021_s3 + $0x184] sm:$0xf0]  ;;  %v2497_v35 = vshll.u32 %v5546_v39, 16 }
 0x157   : > { %6060 = vst [vmem:[#allocation24_spill] sm:$0xff] %v5448_v36  ;;  %2941 = vmatpush.bf16.msra.mxu3 %v3909_v57  ;;  %v1112_v12 = vunpack.c.l.b16 %v1030_v54  ;;  %v2494_v54 = vshrl.u32 %v5546_v39, 16 }
 0x158   : > { %v5466_v4 = vpop.f32.mrf.mxu1  ;;  %v5509_v1 = vpack.c.b16 %v2662_v20, %v2661_v17  ;;  %v4048_v20 = vld [vmem:[%s6021_s3 + $0x1e4] sm:$0xf]  ;;  %v5548_v17 = vld [vmem:[#allocation2 + $0x70] sm:$0xf] }
 0x159   : > { %1807 = vmatmul.bf16.gmra.mxu0 %v1593_v42  ;;  %1905 = vmatmul.bf16.gmra.mxu2 %v1593_v42  ;;  %v4053_v42 = vld [vmem:[%s6021_s3 + $0x204] sm:$0xf0]  ;;  %v5522_v62 = vpack.c.b16 %v1113_v22, %v1112_v12  ;;  %v2507_v12 = vshrl.u32 %v5548_v17, 16  ;;  %v4056_v22 = vld [vmem:[%s6021_s3 + $0x224] sm:$0xf] }
 0x15a   : > { %v3901_v55 = vor.u32 %v4053_v42, %v3900_v38  ;;  %2891 = vmatpush.bf16.msra.mxu1 %v3853_v6  ;;  %v3836_v6 = vld [vmem:[%s6021_s3 + $0x180] sm:$0xf]  ;;  %v3889_v38 = vor.u32 %v4048_v20, %v3886_v24  ;;  %v2499_v20 = vrot.slane %v2497_v35, 5 }
 0x15b   : > { %3760 = vmatmul.msk.bf16.gmra.mxu3 %vm1122_vm12, %v5461_v13  ;;  %v3837_v0 = vor.u32 %v4037_v2, %v3836_v6  ;;  %v3918_v6 = vld [vmem:[%s6021_s3 + $0x228] sm:$0xf0] }
 0x15c   : > { %2942 = vmatpush.bf16.msra.mxu3 %v3901_v55  ;;  %v3971_v55 = vld [vmem:[#allocation2 + $0x54] sm:$0xff]  ;;  %2985 = vmatpush.bf16.msra.mxu0 %v3889_v38  ;;  %v3921_v2 = vor.u32 %v4056_v22, %v3918_v6  ;;  %v2550_v6 = vrot.slane %v5181_v10, 5 }
 0x15d   : > { %v5544_v40 = vsel %vm1122_vm12, %v3971_v55, %v1097_v8  ;;  %v5561_v38 = vld [vmem:[#allocation2 + $0x74] sm:$0x1]  ;;  %v2509_v55 = vrot.slane %v2507_v12, 4 }
 0x15e   : > { %v5488_v26 = vpop.f32.mrf.mxu3  ;;  %2892 = vmatpush.bf16.msra.mxu1 %v3845_v45  ;;  %v2503_v45 = vshll.u32 %v5548_v17, 16  ;;  %3038 = vmatpush.bf16.msra.mxu2 %v3921_v2  ;;  %v4046_v2 = vld [vmem:[%s6021_s3 + $0x1d4] sm:$0xf] }
 0x15f   : > { %6061 = vst [vmem:[#allocation25_spill] sm:$0xff] %v5488_v26 }
 0x160   : > { %v5507_v57 = vpop.f32.mrf.mxu1  ;;  %v2505_v24 = vrot.slane %v2503_v45, 5 }
 0x162   : > { %2893 = vmatpush.bf16.msra.mxu1 %v3837_v0  ;;  %v2496_v0 = vrot.slane %v2494_v54, 4  ;;  %v2510_v36 = vor.u32 %v2509_v55, %v2505_v24  ;;  %v2552_v55 = vrot.slane %v2550_v6, 4 }
 0x163   : > { %2142 = vmatmul.bf16.gmra.mxu1 %v5501_v9 }
 0x164   : > { %v2511_v45 = vrot.slane %v2510_v36, 4 }
 0x166   : > { %v5518_v58 = vpop.f32.mrf.mxu3  ;;  %v5520_v44 = vpop.f32.mrf.mxu0 }
 0x167   : > { %6063 = vst [vmem:[#allocation26_spill] sm:$0xff] %v5518_v58  ;;  %v2513_v58 = vshll.u32 %v5561_v38, 16 }
 0x168   : > { %v5533_v42 = vpop.f32.mrf.mxu1 }
 0x169   : > { %2210 = vmatmul.bf16.vlgmr.msrb.gmra.mxu0 %v5136_v37  ;;  %3762 = vmatmul.msk.bf16.vlgmr.msrb.gmra.mxu2 %vm1122_vm12, %v5114_v53  ;;  %v2515_v35 = vrot.slane %v2513_v58, 5 }
 0x16b   : > { %3761 = vmatmul.msk.bf16.gmra.mxu3 %vm1122_vm12, %v5522_v62  ;;  %v2516_v36 = vsel %vm4571_vm14, %v2511_v45, %v2515_v35  ;;  %v1823_v35 = vadd.f32 %v5091_v25, %v5520_v44 }
 0x16c   : > { %v5537_v37 = vpop.f32.mrf.mxu2 }
 0x16e   : > { %v5539_v53 = vpop.f32.mrf.mxu3  ;;  %v5541_v3 = vpop.f32.mrf.mxu0 }
 0x16f   : > { %6064 = vst [vmem:[#allocation27_spill] sm:$0xff] %v5539_v53  ;;  %v2500_v53 = vor.u32 %v2499_v20, %v2496_v0  ;;  %v2636_v0 = vunpack.c.l.b16 %v2516_v36  ;;  %v4028_v20 = vld [vmem:[#allocation2 + $0x18] sm:$0xff] }
 0x170   : > { %v5566_v26 = vpop.f32.mrf.mxu1 }
 0x171   : > { %6065 = vst [vmem:[#allocation28_spill] sm:$0xff] %v5566_v26  ;;  %v2501_v54 = vrot.slane %v2500_v53, 4  ;;  %v3878_v53 = vld [vmem:[%s6021_s3 + $0x1d8] sm:$0xf0] }
 0x172   : > { %v3881_v58 = vor.u32 %v4046_v2, %v3878_v53 }
 0x173   : > { %2147 = vmatmul.bf16.gmra.mxu1 %v5544_v40  ;;  %v2506_v12 = vsel %vm4571_vm14, %v2501_v54, %v2505_v24  ;;  %v3771_v24 = vrot.slane %v5179_v59, 9 }
 0x174   : > { %v5563_v8 = vpop.f32.mrf.mxu2  ;;  %v2635_v10 = vunpack.c.l.b16 %v2506_v12  ;;  %2986 = vmatpush.bf16.msra.mxu0 %v3881_v58 }
 0x176   : > { %v5568_v47 = vpop.f32.mrf.mxu3  ;;  %v1778_v22 = vpop.f32.mrf.mxu0  ;;  %v2644_v54 = vpack.c.b16 %v2636_v0, %v2635_v10 }
 0x177   : > { %6066 = vst [vmem:[#allocation29_spill] sm:$0xff] %v5568_v47  ;;  %v2646_v47 = vpop.permute.xlu1 %2645 }
 0x178   : > { %2659 = vrot.lane.b32.xlu2 %v2644_v54, %s4241_s6  ;;  %v5594_v12 = vsel %vm1122_vm12, %v4028_v20, %v2646_v47  ;;  %v1825_v47 = vadd.f32 %v5123_v5, %v5541_v3  ;;  %v2557_v20 = vrot.slane %v5155_v11, 5  ;;  %v2560_v11 = vrot.slane %v5167_v63, 5 }
 0x179   : > { %2215 = vmatmul.bf16.gmra.mxu0 %v5175_v34  ;;  %3763 = vmatmul.msk.bf16.gmra.mxu2 %vm1122_vm12, %v5150_v28  ;;  %v2553_v34 = vrot.slane %v5208_v43, 5  ;;  %v2551_v43 = vsel %vm4562_vm13, %v3771_v24, %v2550_v6  ;;  %v3870_v24 = vld [vmem:[%s6021_s3 + $0x1c8] sm:$0xf0] }
 0x17a   : > { %v2663_v36 = vunpack.c.l.b16 %v2551_v43  ;;  %v2559_v54 = vrot.slane %v2557_v20, 4 }
 0x17b   : > { %3930 = vmatmul.msk.bf16.vlgmr.msra.gmra.mxu3 %vm1122_vm12, %v5509_v1  ;;  %v2554_v59 = vsel %vm4562_vm13, %v2552_v55, %v2553_v34  ;;  %v4029_v55 = vld [vmem:[#allocation2 + $0x24] sm:$0xff] }
 0x17c   : > { %v5587_v28 = vpop.f32.mrf.mxu2  ;;  %v2664_v10 = vunpack.c.l.b16 %v2554_v59  ;;  %v1828_v59 = vadd.f32 %v5141_v60, %v1778_v22  ;;  %v2561_v63 = vsel %vm4562_vm13, %v2559_v54, %v2560_v11 }
 0x17e   : > { %v2162_v26 = vpop.f32.mrf.mxu3  ;;  %v1780_v32 = vpop.f32.mrf.mxu0  ;;  %v5607_v0 = vpack.c.b16 %v2664_v10, %v2663_v36 }
 0x180   : > { %v2113_v45 = vpop.f32.mrf.mxu1 }
 0x181   : > { %v2114_v2 = vadd.f32 %v2113_v45, %v1823_v35  ;;  %v2648_v35 = vpop.permute.xlu2 %2647 }
 0x182   : > { %v5629_v36 = vsel %vm1122_vm12, %v4029_v55, %v2648_v35  ;;  %v4042_v35 = vld [vmem:[%s6021_s3 + $0x1b4] sm:$0xf] }
 0x183   : > { %v5600_v53 = vadd.f32 %v2162_v26, %v2114_v2  ;;  %2894 = vmatmul.bf16.vlgmr.msra.gmra.mxu1 %v5594_v12  ;;  %v4044_v26 = vld [vmem:[%s6021_s3 + $0x1c4] sm:$0xf] }
 0x184   : > { %v5603_v58 = vpop.f32.mrf.mxu2  ;;  %v3873_v5 = vor.u32 %v4044_v26, %v3870_v24 }
 0x186   : > { %v2164_v25 = vpop.f32.mrf.mxu3  ;;  %v1783_v44 = vpop.f32.mrf.mxu0  ;;  %2987 = vmatpush.bf16.msra.mxu0 %v3873_v5  ;;  %v1830_v5 = vadd.f32 %v5169_v51, %v1780_v32 }
 0x188   : > { %v2115_v6 = vpop.f32.mrf.mxu1 }
 0x189   : > { %v2116_v34 = vadd.f32 %v2115_v6, %v1825_v47  ;;  %2220 = vmatmul.bf16.gmra.mxu0 %v5243_v31  ;;  %3764 = vmatmul.msk.bf16.gmra.mxu2 %vm1122_vm12, %v5215_v33  ;;  %v3772_v33 = vrot.slane %v5153_v49, 9  ;;  %v4054_v49 = vld [vmem:[%s6021_s3 + $0x214] sm:$0xf]  ;;  %v3910_v47 = vld [vmem:[%s6021_s3 + $0x218] sm:$0xf0] }
 0x18a   : > { %v3913_v60 = vor.u32 %v4054_v49, %v3910_v47  ;;  %v1833_v49 = vadd.f32 %v5213_v14, %v1783_v44 }
 0x18b   : > { %v5619_v3 = vadd.f32 %v2164_v25, %v2116_v34  ;;  %3931 = vmatmul.msk.bf16.gmra.mxu3 %vm1122_vm12, %v5607_v0  ;;  %v2558_v10 = vsel %vm4562_vm13, %v3772_v33, %v2557_v20  ;;  %v2666_v34 = vunpack.c.l.b16 %v2561_v63  ;;  %v2564_v33 = vrot.slane %v5219_v30, 5 }
 0x18c   : > { %v5624_v31 = vpop.f32.mrf.mxu2  ;;  %v2665_v6 = vunpack.c.l.b16 %v2558_v10  ;;  %3039 = vmatpush.bf16.msra.mxu2 %v3913_v60  ;;  %v2567_v30 = vrot.slane %v5233_v21, 5  ;;  %v2650_v10 = vpop.permute.xlu0 %2649 }
 0x18e   : > { %v2167_v45 = vpop.f32.mrf.mxu3  ;;  %v1785_v43 = vpop.f32.mrf.mxu0  ;;  %v5647_v11 = vpack.c.b16 %v2666_v34, %v2665_v6 }
 0x190   : > { %v2118_v2 = vpop.f32.mrf.mxu1 }
 0x191   : > { %v2119_v25 = vadd.f32 %v2118_v2, %v1828_v59  ;;  %v4030_v59 = vld [vmem:[#allocation2 + $0x30] sm:$0xff]  ;;  %v2566_v2 = vrot.slane %v2564_v33, 4 }
 0x192   : > { %v5669_v60 = vsel %vm1122_vm12, %v4030_v59, %v2650_v10  ;;  %v3854_v59 = vld [vmem:[%s6021_s3 + $0x1a8] sm:$0xf0] }
 0x193   : > { %v5641_v22 = vadd.f32 %v2167_v45, %v2119_v25  ;;  %2899 = vmatmul.bf16.gmra.mxu1 %v5629_v36  ;;  %v3862_v45 = vld [vmem:[%s6021_s3 + $0x1b8] sm:$0xf0]  ;;  %v2568_v21 = vsel %vm4562_vm13, %v2566_v2, %v2567_v30  ;;  %v4040_v30 = vld [vmem:[%s6021_s3 + $0x1a4] sm:$0xf] }
 0x194   : > { %v5644_v20 = vpop.f32.mrf.mxu2  ;;  %v3865_v51 = vor.u32 %v4042_v35, %v3862_v45 }
 0x195   : > { %v2652_v10 = vpop.permute.xlu1 %2651 }
 0x196   : > { %v2169_v26 = vpop.f32.mrf.mxu3  ;;  %v1788_v24 = vpop.f32.mrf.mxu0  ;;  %2988 = vmatpush.bf16.msra.mxu0 %v3865_v51 }
 0x198   : > { %v2120_v55 = vpop.f32.mrf.mxu1 }
 0x199   : > { %v2121_v54 = vadd.f32 %v2120_v55, %v1830_v5  ;;  %2225 = vmatmul.bf16.gmra.mxu0 %v5276_v56  ;;  %3765 = vmatmul.msk.bf16.gmra.mxu2 %vm1122_vm12, %v5264_v27  ;;  %v3773_v27 = vrot.slane %v5217_v19, 9  ;;  %v2668_v5 = vunpack.c.l.b16 %v2568_v21 }
 0x19b   : > { %v5659_v32 = vadd.f32 %v2169_v26, %v2121_v54  ;;  %3932 = vmatmul.msk.bf16.gmra.mxu3 %vm1122_vm12, %v5647_v11  ;;  %v2565_v6 = vsel %vm4562_vm13, %v3773_v27, %v2564_v33  ;;  %v1835_v54 = vadd.f32 %v5240_v23, %v1785_v43  ;;  %v2571_v33 = vrot.slane %v5332_v7, 5  ;;  %v4031_v27 = vld [vmem:[#allocation2 + $0x3c] sm:$0xff] }
 0x19c   : > { %v5664_v56 = vpop.f32.mrf.mxu2  ;;  %v2667_v19 = vunpack.c.l.b16 %v2565_v6  ;;  %v3857_v23 = vor.u32 %v4040_v30, %v3854_v59  ;;  %v2574_v7 = vrot.slane %v5357_v61, 5 }
 0x19d   : > { %v2573_v2 = vrot.slane %v2571_v33, 4 }
 0x19e   : > { %v2172_v63 = vpop.f32.mrf.mxu3  ;;  %v1790_v25 = vpop.f32.mrf.mxu0  ;;  %v5681_v35 = vpack.c.b16 %v2668_v5, %v2667_v19  ;;  %2989 = vmatpush.bf16.msra.mxu0 %v3857_v23  ;;  %v6069_v23 = vld [vmem:[#allocation12_spill] sm:$0xff] }
 0x19f   : > { %v2575_v61 = vsel %vm4562_vm13, %v2573_v2, %v2574_v7  ;;  %v1840_v7 = vadd.f32 %v6069_v23, %v1790_v25  ;;  %v6070_v2 = vld [vmem:[#allocation15_spill] sm:$0xff]  ;;  %v6074_v23 = vld [vmem:[#allocation16_spill] sm:$0xff] }
 0x1a0   : > { %v2123_v47 = vpop.f32.mrf.mxu1 }
 0x1a1   : > { %v2124_v34 = vadd.f32 %v2123_v47, %v1833_v49  ;;  %v6067_v47 = vld [vmem:[#allocation10_spill] sm:$0xff] }
 0x1a2   : > { %v1838_v6 = vadd.f32 %v6067_v47, %v1788_v24 }
 0x1a3   : > { %v5675_v26 = vadd.f32 %v2172_v63, %v2124_v34  ;;  %2904 = vmatmul.bf16.gmra.mxu1 %v5669_v60  ;;  %v5703_v34 = vsel %vm1122_vm12, %v4031_v27, %v2652_v10  ;;  %v2578_v10 = vrot.slane %v6070_v2, 5 }
 0x1a4   : > { %v5678_v55 = vpop.f32.mrf.mxu2 }
 0x1a6   : > { %v2174_v14 = vpop.f32.mrf.mxu3  ;;  %v1793_v44 = vpop.f32.mrf.mxu0 }
 0x1a8   : > { %v2125_v45 = vpop.f32.mrf.mxu1 }
 0x1a9   : > { %v2126_v51 = vadd.f32 %v2125_v45, %v1835_v54  ;;  %2230 = vmatmul.bf16.gmra.mxu0 %v5324_v29  ;;  %3766 = vmatmul.msk.bf16.gmra.mxu2 %vm1122_vm12, %v5301_v48  ;;  %v3774_v48 = vrot.slane %v5330_v16, 9  ;;  %v4052_v16 = vld [vmem:[%s6021_s3 + $0x204] sm:$0xf] }
 0x1ab   : > { %v5693_v43 = vadd.f32 %v2174_v14, %v2126_v51  ;;  %3933 = vmatmul.msk.bf16.gmra.mxu3 %vm1122_vm12, %v5681_v35  ;;  %v2572_v19 = vsel %vm4562_vm13, %v3774_v48, %v2571_v33  ;;  %v3902_v14 = vld [vmem:[%s6021_s3 + $0x208] sm:$0xf0]  ;;  %v2670_v51 = vunpack.c.l.b16 %v2575_v61 }
 0x1ac   : > { %v5698_v29 = vpop.f32.mrf.mxu2  ;;  %v3905_v24 = vor.u32 %v4052_v16, %v3902_v14  ;;  %v2669_v45 = vunpack.c.l.b16 %v2572_v19  ;;  %v6072_v19 = vld [vmem:[#allocation17_spill] sm:$0xff]  ;;  %v2580_v14 = vrot.slane %v2578_v10, 4 }
 0x1ad   : > { %v2581_v61 = vrot.slane %v6072_v19, 5 }
 0x1ae   : > { %v2177_v63 = vpop.f32.mrf.mxu3  ;;  %v1795_v49 = vpop.f32.mrf.mxu0  ;;  %3040 = vmatpush.bf16.msra.mxu2 %v3905_v24  ;;  %v5721_v27 = vpack.c.b16 %v2670_v51, %v2669_v45 }
 0x1af   : > { %v2654_v24 = vpop.permute.xlu2 %2653 }
 0x1b0   : > { %v2128_v21 = vpop.f32.mrf.mxu1 }
 0x1b1   : > { %v2129_v5 = vadd.f32 %v2128_v21, %v1838_v6  ;;  %v3846_v6 = vld [vmem:[%s6021_s3 + $0x198] sm:$0xf0] }
 0x1b3   : > { %v5715_v54 = vadd.f32 %v2177_v63, %v2129_v5  ;;  %2909 = vmatmul.bf16.gmra.mxu1 %v5703_v34  ;;  %v4038_v63 = vld [vmem:[%s6021_s3 + $0x194] sm:$0xf]  ;;  %v4032_v5 = vld [vmem:[#allocation2 + $0x48] sm:$0xff] }
 0x1b4   : > { %v5718_v33 = vpop.f32.mrf.mxu2  ;;  %v3849_v25 = vor.u32 %v4038_v63, %v3846_v6 }
 0x1b5   : > { %6068 = vst [vmem:[#allocation10_spill] sm:$0xff] %v5715_v54 }
 0x1b6   : > { %v2179_v30 = vpop.f32.mrf.mxu3  ;;  %v1798_v59 = vpop.f32.mrf.mxu0  ;;  %2990 = vmatpush.bf16.msra.mxu0 %v3849_v25 }
 0x1b8   : > { %v2130_v48 = vpop.f32.mrf.mxu1 }
 0x1b9   : > { %v2131_v47 = vadd.f32 %v2130_v48, %v1840_v7  ;;  %2235 = vmatmul.bf16.gmra.mxu0 %v5405_v50  ;;  %3767 = vmatmul.msk.bf16.gmra.mxu2 %vm1122_vm12, %v5371_v15  ;;  %v6073_v15 = vld [vmem:[#allocation14_spill] sm:$0xff]  ;;  %v1843_v7 = vadd.f32 %v6074_v23, %v1793_v44 }
 0x1ba   : > { %v3775_v16 = vrot.slane %v6073_v15, 9 }
 0x1bb   : > { %v5733_v21 = vadd.f32 %v2179_v30, %v2131_v47  ;;  %3934 = vmatmul.msk.bf16.gmra.mxu3 %vm1122_vm12, %v5721_v27  ;;  %v5743_v30 = vsel %vm1122_vm12, %v4032_v5, %v2654_v24  ;;  %v2582_v47 = vsel %vm4562_vm13, %v2580_v14, %v2581_v61  ;;  %v4036_v61 = vld [vmem:[%s6021_s3 + $0x184] sm:$0xf]  ;;  %v3838_v14 = vld [vmem:[%s6021_s3 + $0x188] sm:$0xf0] }
 0x1bc   : > { %v5738_v50 = vpop.f32.mrf.mxu2  ;;  %v2579_v2 = vsel %vm4562_vm13, %v3775_v16, %v2578_v10  ;;  %v2672_v19 = vunpack.c.l.b16 %v2582_v47  ;;  %v2585_v10 = vrot.slane %v5375_v41, 5  ;;  %v2588_v41 = vrot.slane %v5396_v52, 5 }
 0x1bd   : > { %6071 = vst [vmem:[#allocation12_spill] sm:$0xff] %v5733_v21  ;;  %v2671_v25 = vunpack.c.l.b16 %v2579_v2  ;;  %v6075_v21 = vld [vmem:[#allocation19_spill] sm:$0xff] }
 0x1be   : > { %v2182_v45 = vpop.f32.mrf.mxu3  ;;  %v1800_v51 = vpop.f32.mrf.mxu0  ;;  %v1845_v5 = vadd.f32 %v6075_v21, %v1795_v49  ;;  %v3841_v49 = vor.u32 %v4036_v61, %v3838_v14 }
 0x1bf   : > { %v5755_v24 = vpack.c.b16 %v2672_v19, %v2671_v25 }
 0x1c0   : > { %v2133_v48 = vpop.f32.mrf.mxu1  ;;  %2991 = vmatpush.bf16.msra.mxu0 %v3841_v49 }
 0x1c1   : > { %v2134_v63 = vadd.f32 %v2133_v48, %v1843_v7  ;;  %v2587_v7 = vrot.slane %v2585_v10, 4  ;;  %v2656_v48 = vpop.permute.xlu0 %2655 }
 0x1c3   : > { %v5749_v6 = vadd.f32 %v2182_v45, %v2134_v63  ;;  %2914 = vmatmul.bf16.gmra.mxu1 %v5743_v30  ;;  %v6078_v63 = vld [vmem:[#allocation22_spill] sm:$0xff]  ;;  %v2589_v52 = vsel %vm4562_vm13, %v2587_v7, %v2588_v41  ;;  %v2595_v7 = vrot.slane %v5561_v38, 5 }
 0x1c4   : > { %v5752_v15 = vpop.f32.mrf.mxu2  ;;  %v1848_v25 = vadd.f32 %v6078_v63, %v1798_v59  ;;  %v2674_v49 = vunpack.c.l.b16 %v2589_v52 }
 0x1c6   : > { %v2184_v44 = vpop.f32.mrf.mxu3  ;;  %v1803_v23 = vpop.f32.mrf.mxu0 }
 0x1c8   : > { %v2135_v54 = vpop.f32.mrf.mxu1 }
 0x1c9   : > { %v2136_v16 = vadd.f32 %v2135_v54, %v1845_v5  ;;  %2240 = vmatmul.bf16.gmra.mxu0 %v5501_v9  ;;  %3768 = vmatmul.msk.bf16.gmra.mxu2 %vm1122_vm12, %v5461_v13  ;;  %v4033_v54 = vld [vmem:[#allocation2 + $0x54] sm:$0xff]  ;;  %v6077_v13 = vld [vmem:[#allocation21_spill] sm:$0xff] }
 0x1ca   : > { %v3776_v45 = vrot.slane %v6077_v13, 9 }
 0x1cb   : > { %v5767_v21 = vadd.f32 %v2184_v44, %v2136_v16  ;;  %3935 = vmatmul.msk.bf16.gmra.mxu3 %vm1122_vm12, %v5755_v24  ;;  %v5777_v44 = vsel %vm1122_vm12, %v4033_v54, %v2656_v48  ;;  %v1850_v54 = vadd.f32 %v5407_v46, %v1800_v51  ;;  %v4034_v46 = vld [vmem:[#allocation2 + $0x60] sm:$0xff]  ;;  %v3777_v51 = vrot.slane %v5546_v39, 9 }
 0x1cc   : > { %v5772_v9 = vpop.f32.mrf.mxu2  ;;  %v2586_v5 = vsel %vm4562_vm13, %v3776_v45, %v2585_v10  ;;  %v2592_v10 = vrot.slane %v5548_v17, 5  ;;  %v2658_v17 = vpop.permute.xlu1 %2657 }
 0x1cd   : > { %6076 = vst [vmem:[#allocation15_spill] sm:$0xff] %v5767_v21  ;;  %v2673_v14 = vunpack.c.l.b16 %v2586_v5 }
 0x1ce   : > { %v2187_v2 = vpop.f32.mrf.mxu3  ;;  %v1805_v47 = vpop.f32.mrf.mxu0  ;;  %v2593_v52 = vsel %vm4562_vm13, %v3777_v51, %v2592_v10 }
 0x1cf   : > { %v5789_v48 = vpack.c.b16 %v2674_v49, %v2673_v14  ;;  %v2675_v39 = vunpack.c.l.b16 %v2593_v52 }
 0x1d0   : > { %v2138_v19 = vpop.f32.mrf.mxu1 }
 0x1d1   : > { %v2139_v16 = vadd.f32 %v2138_v19, %v1848_v25  ;;  %v2594_v25 = vrot.slane %v2592_v10, 4 }
 0x1d3   : > { %v5783_v61 = vadd.f32 %v2187_v2, %v2139_v16  ;;  %2919 = vmatmul.bf16.gmra.mxu1 %v5777_v44  ;;  %v2596_v38 = vsel %vm4562_vm13, %v2594_v25, %v2595_v7 }
 0x1d4   : > { %v5786_v13 = vpop.f32.mrf.mxu2  ;;  %v2676_v49 = vunpack.c.l.b16 %v2596_v38 }
 0x1d6   : > { %v2189_v59 = vpop.f32.mrf.mxu3  ;;  %v1808_v63 = vpop.f32.mrf.mxu0  ;;  %v5819_v51 = vpack.c.b16 %v2676_v49, %v2675_v39 }
 0x1d8   : > { %v2140_v21 = vpop.f32.mrf.mxu1 }
 0x1d9   : > { %v2141_v45 = vadd.f32 %v2140_v21, %v1850_v54  ;;  %2245 = vmatmul.bf16.gmra.mxu0 %v5544_v40  ;;  %3769 = vmatmul.msk.bf16.gmra.mxu2 %vm1122_vm12, %v5522_v62  ;;  %v1853_v40 = vadd.f32 %v5466_v4, %v1803_v23  ;;  %v5805_v62 = vsel %vm1122_vm12, %v4034_v46, %v2658_v17  ;;  %v6079_v4 = vld [vmem:[#allocation4_spill] sm:$0xff]  ;;  %v4035_v17 = vld [vmem:[#allocation2 + $0x6c] sm:$0xff] }
 0x1da   : > { %v1921_v23 = vadd.f32 %v6079_v4, %v5537_v37  ;;  %v1855_v46 = vadd.f32 %v5507_v57, %v1805_v47 }
 0x1db   : > { %v5795_v41 = vadd.f32 %v2189_v59, %v2141_v45  ;;  %3936 = vmatmul.msk.bf16.gmra.mxu3 %vm1122_vm12, %v5789_v48 }
 0x1dc   : > { %v5800_v2 = vpop.f32.mrf.mxu2 }
 0x1de   : > { %v2192_v21 = vpop.f32.mrf.mxu3  ;;  %v1810_v19 = vpop.f32.mrf.mxu0 }
 0x1e0   : > { %v2143_v5 = vpop.f32.mrf.mxu1 }
 0x1e1   : > { %v2144_v16 = vadd.f32 %v2143_v5, %v1853_v40  ;;  %v2660_v40 = vpop.permute.xlu2 %2659 }
 0x1e3   : > { %v5811_v14 = vadd.f32 %v2192_v21, %v2144_v16  ;;  %2924 = vmatmul.bf16.gmra.mxu1 %v5805_v62  ;;  %v6080_v21 = vld [vmem:[#allocation5_spill] sm:$0xff] }
 0x1e4   : > { %v5814_v59 = vpop.f32.mrf.mxu2  ;;  %v1923_v57 = vadd.f32 %v6080_v21, %v5563_v8  ;;  %v6081_v8 = vld [vmem:[#allocation6_spill] sm:$0xff]  ;;  %v6083_v21 = vld [vmem:[#allocation7_spill] sm:$0xff] }
 0x1e6   : > { %v2194_v54 = vpop.f32.mrf.mxu3  ;;  %v2211_v45 = vpop.f32.mrf.mxu0 }
 0x1e7   : > { %v2212_v10 = vadd.f32 %v2211_v45, %v1921_v23  ;;  %v1926_v23 = vadd.f32 %v6081_v8, %v5587_v28  ;;  %v1928_v28 = vadd.f32 %v6083_v21, %v5603_v58  ;;  %v5858_v58 = vstv %s3114_s20 }
 0x1e8   : > { %v2145_v18 = vpop.f32.mrf.mxu1 }
 0x1e9   : > { %v2146_v7 = vadd.f32 %v2145_v18, %v1855_v46  ;;  %2992 = vmatmul.bf16.vlgmr.msra.gmra.mxu0 %v5594_v12  ;;  %3938 = vmatmul.msk.bf16.vlgmr.msra.gmra.mxu2 %vm1122_vm12, %v5509_v1  ;;  %v1858_v12 = vadd.f32 %v5533_v42, %v1808_v63  ;;  %v5834_v1 = vsel %vm1122_vm12, %v4035_v17, %v2660_v40 }
 0x1eb   : > { %v5824_v25 = vadd.f32 %v2194_v54, %v2146_v7  ;;  %3937 = vmatmul.msk.bf16.gmra.mxu3 %vm1122_vm12, %v5819_v51 }
 0x1ec   : > { %v2260_v37 = vpop.f32.mrf.mxu2 }
 0x1ed   : > { %v5830_v47 = vadd.f32 %v2260_v37, %v2212_v10  ;;  %v6082_v10 = vld [vmem:[#allocation28_spill] sm:$0xff] }
 0x1ee   : > { %v2197_v5 = vpop.f32.mrf.mxu3  ;;  %v2213_v52 = vpop.f32.mrf.mxu0  ;;  %v1860_v42 = vadd.f32 %v6082_v10, %v1810_v19 }
 0x1ef   : > { %v2214_v38 = vadd.f32 %v2213_v52, %v1923_v57 }
 0x1f0   : > { %v2148_v16 = vpop.f32.mrf.mxu1 }
 0x1f1   : > { %v2149_v39 = vadd.f32 %v2148_v16, %v1858_v12 }
 0x1f3   : > { %v5836_v49 = vadd.f32 %v2197_v5, %v2149_v39  ;;  %2929 = vmatmul.bf16.gmra.mxu1 %v5834_v1 }
 0x1f4   : > { %v2262_v4 = vpop.f32.mrf.mxu2 }
 0x1f5   : > { %v5841_v54 = vadd.f32 %v2262_v4, %v2214_v38 }
 0x1f6   : > { %v2199_v45 = vpop.f32.mrf.mxu3  ;;  %v2216_v46 = vpop.f32.mrf.mxu0 }
 0x1f7   : > { %v2217_v63 = vadd.f32 %v2216_v46, %v1926_v23 }
 0x1f8   : > { %v2150_v18 = vpop.f32.mrf.mxu1 }
 0x1f9   : > { %v2151_v7 = vadd.f32 %v2150_v18, %v1860_v42  ;;  %2997 = vmatmul.bf16.gmra.mxu0 %v5629_v36  ;;  %3939 = vmatmul.msk.bf16.gmra.mxu2 %vm1122_vm12, %v5607_v0  ;;  %v6084_v36 = vld [vmem:[#allocation8_spill] sm:$0xff] }
 0x1fa   : > { %v1931_v16 = vadd.f32 %v6084_v36, %v5624_v31 }
 0x1fb   : > { %v5847_v37 = vadd.f32 %v2199_v45, %v2151_v7 }
 0x1fc   : > { %v2265_v17 = vpop.f32.mrf.mxu2 }
 0x1fd   : > { %v5851_v57 = vadd.f32 %v2265_v17, %v2217_v63  ;;  %v6085_v63 = vld [vmem:[#allocation9_spill] sm:$0xff] }
 0x1fe   : > { %v2944_v40 = vpop.f32.mrf.mxu3  ;;  %v2218_v5 = vpop.f32.mrf.mxu0 }
 0x1ff   : > { %v2219_v52 = vadd.f32 %v2218_v5, %v1928_v28 }
 0x200   : > { %v2895_v19 = vpop.f32.mrf.mxu1 }
 0x201   : > { %v2945_v12 = vadd.f32 %v2944_v40, %v2895_v19  ;;  %v6086_v19 = vld [vmem:[#allocation11_spill] sm:$0xff] }
 0x203   : > { %v3082_v8 = vadd.f32 %v2945_v12, %v5600_v53  ;;  %v1933_v53 = vadd.f32 %v6085_v63, %v5644_v20  ;;  %v1936_v12 = vadd.f32 %v6086_v19, %v5664_v56 }
 0x204   : > { %v2267_v38 = vpop.f32.mrf.mxu2 }
 0x205   : > { %v5855_v39 = vadd.f32 %v2267_v38, %v2219_v52  ;;  %v3148_v10 = vmul.f32 %v5858_v58, %v3082_v8  ;;  %vm3115_vm15 = vcmp.ge.f32.partialorder %v3082_v8, 0.0 }
 0x206   : > { %v2946_v0 = vpop.f32.mrf.mxu3  ;;  %v2221_v4 = vpop.f32.mrf.mxu0 }
 0x207   : > { %v2222_v23 = vadd.f32 %v2221_v4, %v1931_v16  ;;  %v3180_v21 = vsel %vm3115_vm15, %v3082_v8, %v3148_v10 }
 0x208   : > { %v2897_v45 = vpop.f32.mrf.mxu1 }
 0x209   : > { %v2947_v46 = vadd.f32 %v2946_v0, %v2897_v45  ;;  %3002 = vmatmul.bf16.gmra.mxu0 %v5669_v60  ;;  %3940 = vmatmul.msk.bf16.gmra.mxu2 %vm1122_vm12, %v5647_v11 }
 0x20b   : > { %v3084_v31 = vadd.f32 %v2947_v46, %v5619_v3  ;;  %v6087_v46 = vld [vmem:[#allocation13_spill] sm:$0xff] }
 0x20c   : > { %v2270_v42 = vpop.f32.mrf.mxu2  ;;  %v1938_v10 = vadd.f32 %v6087_v46, %v5678_v55 }
 0x20d   : > { %vm3117_vm0 = vcmp.ge.f32.partialorder %v3084_v31, 0.0  ;;  %v3150_v18 = vmul.f32 %v5858_v58, %v3084_v31  ;;  %v5868_v7 = vadd.f32 %v2270_v42, %v2222_v23 }
 0x20e   : > { %v2949_v17 = vpop.f32.mrf.mxu3  ;;  %v2223_v60 = vpop.f32.mrf.mxu0 }
 0x20f   : > { %v3182_v28 = vsel %vm3117_vm0, %v3084_v31, %v3150_v18  ;;  %v2224_v11 = vadd.f32 %v2223_v60, %v1933_v53 }
 0x210   : > { %v4063_v40 = vpack.c.bf16 %v3182_v28, %v3180_v21  ;;  %v2900_v5 = vpop.f32.mrf.mxu1  ;;  %v6088_v21 = vld [vmem:[#allocation18_spill] sm:$0xff] }
 0x211   : > { %v2950_v52 = vadd.f32 %v2949_v17, %v2900_v5  ;;  %v1941_v28 = vadd.f32 %v6088_v21, %v5698_v29 }
 0x212   : > { %4064 = vst [vmem:[%s4374_s9] sm:$0xff] %v4063_v40  }
 0x213   : > { %v3086_v16 = vadd.f32 %v2950_v52, %v5641_v22 }
 0x214   : > { %v2272_v3 = vpop.f32.mrf.mxu2 }
 0x215   : > { %v5873_v38 = vadd.f32 %v2272_v3, %v2224_v11  ;;  %v3152_v8 = vmul.f32 %v5858_v58, %v3086_v16  ;;  %vm3119_vm1 = vcmp.ge.f32.partialorder %v3086_v16, 0.0 }
 0x216   : > { %v2951_v20 = vpop.f32.mrf.mxu3  ;;  %v2226_v36 = vpop.f32.mrf.mxu0 }
 0x217   : > { %v2227_v0 = vadd.f32 %v2226_v36, %v1936_v12  ;;  %v3184_v63 = vsel %vm3119_vm1, %v3086_v16, %v3152_v8  ;;  %v6089_v36 = vld [vmem:[#allocation20_spill] sm:$0xff] }
 0x218   : > { %v2902_v4 = vpop.f32.mrf.mxu1  ;;  %v1943_v16 = vadd.f32 %v6089_v36, %v5718_v33 }
 0x219   : > { %v2952_v23 = vadd.f32 %v2951_v20, %v2902_v4  ;;  %3007 = vmatmul.bf16.gmra.mxu0 %v5703_v34  ;;  %3941 = vmatmul.msk.bf16.gmra.mxu2 %vm1122_vm12, %v5681_v35 }
 0x21b   : > { %v3088_v45 = vadd.f32 %v2952_v23, %v5659_v32 }
 0x21c   : > { %v2275_v56 = vpop.f32.mrf.mxu2 }
 0x21d   : > { %vm3121_vm2 = vcmp.ge.f32.partialorder %v3088_v45, 0.0  ;;  %v3154_v22 = vmul.f32 %v5858_v58, %v3088_v45  ;;  %v5884_v31 = vadd.f32 %v2275_v56, %v2227_v0 }
 0x21e   : > { %v2954_v42 = vpop.f32.mrf.mxu3  ;;  %v2228_v34 = vpop.f32.mrf.mxu0 }
 0x21f   : > { %v3186_v53 = vsel %vm3121_vm2, %v3088_v45, %v3154_v22  ;;  %v2229_v35 = vadd.f32 %v2228_v34, %v1938_v10  ;;  %v6090_v10 = vld [vmem:[#allocation23_spill] sm:$0xff] }
 0x220   : > { %v4068_v18 = vpack.c.bf16 %v3186_v53, %v3184_v63  ;;  %v2905_v17 = vpop.f32.mrf.mxu1  ;;  %v1946_v22 = vadd.f32 %v6090_v10, %v5738_v50  ;;  %v6091_v63 = vld [vmem:[#allocation10_spill] sm:$0xff] }
 0x221   : > { %v2955_v60 = vadd.f32 %v2954_v42, %v2905_v17  ;;  %v6096_v10 = vld [vmem:[#allocation26_spill] sm:$0xff] }
 0x222   : > { %4140 = vst [vmem:[%s4374_s9 + $0x10] sm:$0xff] %v4068_v18  }
 0x223   : > { %v3090_v5 = vadd.f32 %v2955_v60, %v5675_v26 }
 0x224   : > { %v2277_v32 = vpop.f32.mrf.mxu2 }
 0x225   : > { %v5889_v11 = vadd.f32 %v2277_v32, %v2229_v35  ;;  %v3156_v12 = vmul.f32 %v5858_v58, %v3090_v5  ;;  %vm3123_vm3 = vcmp.ge.f32.partialorder %v3090_v5, 0.0  ;;  %v6092_v32 = vld [vmem:[#allocation12_spill] sm:$0xff] }
 0x226   : > { %v2956_v55 = vpop.f32.mrf.mxu3  ;;  %v2231_v40 = vpop.f32.mrf.mxu0 }
 0x227   : > { %v2232_v52 = vadd.f32 %v2231_v40, %v1941_v28  ;;  %v3188_v23 = vsel %vm3123_vm3, %v3090_v5, %v3156_v12  ;;  %v6093_v28 = vld [vmem:[#allocation24_spill] sm:$0xff] }
 0x228   : > { %v2907_v3 = vpop.f32.mrf.mxu1 }
 0x229   : > { %v2957_v19 = vadd.f32 %v2956_v55, %v2907_v3  ;;  %3012 = vmatmul.bf16.gmra.mxu0 %v5743_v30  ;;  %3942 = vmatmul.msk.bf16.gmra.mxu2 %vm1122_vm12, %v5721_v27  ;;  %v1948_v55 = vadd.f32 %v6093_v28, %v5752_v15 }
 0x22b   : > { %v3092_v20 = vadd.f32 %v2957_v19, %v5693_v43 }
 0x22c   : > { %v2280_v29 = vpop.f32.mrf.mxu2 }
 0x22d   : > { %vm3125_vm4 = vcmp.ge.f32.partialorder %v3092_v20, 0.0  ;;  %v3158_v26 = vmul.f32 %v5858_v58, %v3092_v20  ;;  %v5900_v0 = vadd.f32 %v2280_v29, %v2232_v52 }
 0x22e   : > { %v2959_v4 = vpop.f32.mrf.mxu3  ;;  %v2233_v30 = vpop.f32.mrf.mxu0 }
 0x22f   : > { %v3190_v8 = vsel %vm3125_vm4, %v3092_v20, %v3158_v26  ;;  %v2234_v27 = vadd.f32 %v2233_v30, %v1943_v16  ;;  %v6094_v16 = vld [vmem:[#allocation25_spill] sm:$0xff] }
 0x230   : > { %v4073_v45 = vpack.c.bf16 %v3190_v8, %v3188_v23  ;;  %v2910_v56 = vpop.f32.mrf.mxu1  ;;  %v1951_v26 = vadd.f32 %v6094_v16, %v5772_v9 }
 0x231   : > { %v2960_v46 = vadd.f32 %v2959_v4, %v2910_v56 }
 0x232   : > { %4141 = vst [vmem:[%s4374_s9 + $0x20] sm:$0xff] %v4073_v45  }
 0x233   : > { %v3094_v53 = vadd.f32 %v2960_v46, %v6091_v63  ;;  %v6095_v46 = vld [vmem:[#allocation15_spill] sm:$0xff] }
 0x234   : > { %v2282_v43 = vpop.f32.mrf.mxu2 }
 0x235   : > { %v5905_v42 = vadd.f32 %v2282_v43, %v2234_v27  ;;  %v3160_v60 = vmul.f32 %v5858_v58, %v3094_v53  ;;  %vm3127_vm5 = vcmp.ge.f32.partialorder %v3094_v53, 0.0 }
 0x236   : > { %v2961_v33 = vpop.f32.mrf.mxu3  ;;  %v2236_v34 = vpop.f32.mrf.mxu0 }
 0x237   : > { %v2237_v35 = vadd.f32 %v2236_v34, %v1946_v22  ;;  %v3192_v3 = vsel %vm3127_vm5, %v3094_v53, %v3160_v60  ;;  %v1953_v22 = vadd.f32 %v6096_v10, %v5786_v13 }
 0x238   : > { %v2912_v18 = vpop.f32.mrf.mxu1 }
 0x239   : > { %v2962_v17 = vadd.f32 %v2961_v33, %v2912_v18  ;;  %3017 = vmatmul.bf16.gmra.mxu0 %v5777_v44  ;;  %3943 = vmatmul.msk.bf16.gmra.mxu2 %vm1122_vm12, %v5755_v24 }
 0x23b   : > { %v3096_v21 = vadd.f32 %v2962_v17, %v6092_v32  ;;  %v6097_v32 = vld [vmem:[#allocation27_spill] sm:$0xff] }
 0x23c   : > { %v2285_v50 = vpop.f32.mrf.mxu2 }
 0x23d   : > { %vm3129_vm6 = vcmp.ge.f32.partialorder %v3096_v21, 0.0  ;;  %v3162_v40 = vmul.f32 %v5858_v58, %v3096_v21  ;;  %v5916_v5 = vadd.f32 %v2285_v50, %v2237_v35 }
 0x23e   : > { %v2964_v52 = vpop.f32.mrf.mxu3  ;;  %v2238_v44 = vpop.f32.mrf.mxu0 }
 0x23f   : > { %v3194_v19 = vsel %vm3129_vm6, %v3096_v21, %v3162_v40  ;;  %v2239_v24 = vadd.f32 %v2238_v44, %v1948_v55  ;;  %v1956_v21 = vadd.f32 %v6097_v32, %v5800_v2 }
 0x240   : > { %v4078_v12 = vpack.c.bf16 %v3194_v19, %v3192_v3  ;;  %v2915_v20 = vpop.f32.mrf.mxu1 }
 0x241   : > { %v2965_v29 = vadd.f32 %v2964_v52, %v2915_v20 }
 0x242   : > { %4142 = vst [vmem:[%s4374_s9 + $0x30] sm:$0xff] %v4078_v12  }
 0x243   : > { %v3098_v23 = vadd.f32 %v2965_v29, %v5749_v6 }
 0x244   : > { %v2287_v36 = vpop.f32.mrf.mxu2 }
 0x245   : > { %v5921_v4 = vadd.f32 %v2287_v36, %v2239_v24  ;;  %v3164_v56 = vmul.f32 %v5858_v58, %v3098_v23  ;;  %vm3131_vm7 = vcmp.ge.f32.partialorder %v3098_v23, 0.0  ;;  %v6098_v24 = vld [vmem:[#allocation29_spill] sm:$0xff] }
 0x246   : > { %v2966_v15 = vpop.f32.mrf.mxu3  ;;  %v2241_v30 = vpop.f32.mrf.mxu0  ;;  %v1958_v12 = vadd.f32 %v6098_v24, %v5814_v59 }
 0x247   : > { %v2242_v8 = vadd.f32 %v2241_v30, %v1951_v26  ;;  %v3196_v63 = vsel %vm3131_vm7, %v3098_v23, %v3164_v56 }
 0x248   : > { %v2917_v27 = vpop.f32.mrf.mxu1 }
 0x249   : > { %v2967_v45 = vadd.f32 %v2966_v15, %v2917_v27  ;;  %3022 = vmatmul.bf16.gmra.mxu0 %v5805_v62  ;;  %3944 = vmatmul.msk.bf16.gmra.mxu2 %vm1122_vm12, %v5789_v48 }
 0x24b   : > { %v3100_v43 = vadd.f32 %v2967_v45, %v6095_v46 }
 0x24c   : > { %v2290_v9 = vpop.f32.mrf.mxu2 }
 0x24d   : > { %vm3133_vm8 = vcmp.ge.f32.partialorder %v3100_v43, 0.0  ;;  %v3166_v6 = vmul.f32 %v5858_v58, %v3100_v43  ;;  %v5932_v33 = vadd.f32 %v2290_v9, %v2242_v8 }
 0x24e   : > { %v2969_v34 = vpop.f32.mrf.mxu3  ;;  %v2243_v62 = vpop.f32.mrf.mxu0 }
 0x24f   : > { %v3198_v53 = vsel %vm3133_vm8, %v3100_v43, %v3166_v6  ;;  %v2244_v48 = vadd.f32 %v2243_v62, %v1953_v22 }
 0x250   : > { %v4083_v35 = vpack.c.bf16 %v3198_v53, %v3196_v63  ;;  %v2920_v18 = vpop.f32.mrf.mxu1 }
 0x251   : > { %v2970_v17 = vadd.f32 %v2969_v34, %v2920_v18 }
 0x252   : > { %4143 = vst [vmem:[%s4374_s9 + $0x40] sm:$0xff] %v4083_v35  }
 0x253   : > { %v3102_v55 = vadd.f32 %v2970_v17, %v5783_v61 }
 0x254   : > { %v2292_v60 = vpop.f32.mrf.mxu2 }
 0x255   : > { %v5937_v50 = vadd.f32 %v2292_v60, %v2244_v48  ;;  %v3168_v3 = vmul.f32 %v5858_v58, %v3102_v55  ;;  %vm3135_vm9 = vcmp.ge.f32.partialorder %v3102_v55, 0.0 }
 0x256   : > { %v2971_v13 = vpop.f32.mrf.mxu3  ;;  %v2246_v28 = vpop.f32.mrf.mxu0 }
 0x257   : > { %v2247_v40 = vadd.f32 %v2246_v28, %v1956_v21  ;;  %v3200_v36 = vsel %vm3135_vm9, %v3102_v55, %v3168_v3 }
 0x258   : > { %v2922_v52 = vpop.f32.mrf.mxu1 }
 0x259   : > { %v2972_v44 = vadd.f32 %v2971_v13, %v2922_v52  ;;  %3027 = vmatmul.bf16.gmra.mxu0 %v5834_v1  ;;  %3945 = vmatmul.msk.bf16.gmra.mxu2 %vm1122_vm12, %v5819_v51 }
 0x25b   : > { %v3104_v19 = vadd.f32 %v2972_v44, %v5795_v41 }
 0x25c   : > { %v2295_v2 = vpop.f32.mrf.mxu2 }
 0x25d   : > { %vm3137_vm10 = vcmp.ge.f32.partialorder %v3104_v19, 0.0  ;;  %v3170_v61 = vmul.f32 %v5858_v58, %v3104_v19  ;;  %v5948_v20 = vadd.f32 %v2295_v2, %v2247_v40 }
 0x25e   : > { %v2974_v29 = vpop.f32.mrf.mxu3  ;;  %v2248_v1 = vpop.f32.mrf.mxu0 }
 0x25f   : > { %v3202_v16 = vsel %vm3137_vm10, %v3104_v19, %v3170_v61  ;;  %v2249_v51 = vadd.f32 %v2248_v1, %v1958_v12 }
 0x260   : > { %v4088_v26 = vpack.c.bf16 %v3202_v16, %v3200_v36  ;;  %v2925_v15 = vpop.f32.mrf.mxu1 }
 0x261   : > { %v2975_v30 = vadd.f32 %v2974_v29, %v2925_v15 }
 0x262   : > { %4144 = vst [vmem:[%s4374_s9 + $0x50] sm:$0xff] %v4088_v26  }
 0x263   : > { %v3106_v59 = vadd.f32 %v2975_v30, %v5811_v14 }
 0x264   : > { %v2297_v41 = vpop.f32.mrf.mxu2 }
 0x265   : > { %v5951_v23 = vadd.f32 %v2297_v41, %v2249_v51  ;;  %v3172_v46 = vmul.f32 %v5858_v58, %v3106_v59  ;;  %vm3139_vm11 = vcmp.ge.f32.partialorder %v3106_v59, 0.0 }
 0x266   : > { %v2976_v8 = vpop.f32.mrf.mxu3  ;;  %v2993_v27 = vpop.f32.mrf.mxu0 }
 0x267   : > { %v3204_v34 = vsel %vm3139_vm11, %v3106_v59, %v3172_v46 }
 0x268   : > { %v2927_v45 = vpop.f32.mrf.mxu1 }
 0x269   : > { %v2977_v56 = vadd.f32 %v2976_v8, %v2927_v45 }
 0x26b   : > { %v3108_v43 = vadd.f32 %v2977_v56, %v5824_v25 }
 0x26c   : > { %v3042_v9 = vpop.f32.mrf.mxu2 }
 0x26d   : > { %vm3141_vm12 = vcmp.ge.f32.partialorder %v3108_v43, 0.0  ;;  %v3174_v10 = vmul.f32 %v5858_v58, %v3108_v43  ;;  %v3043_v63 = vadd.f32 %v3042_v9, %v2993_v27 }
 0x26e   : > { %v2979_v22 = vpop.f32.mrf.mxu3  ;;  %v2995_v6 = vpop.f32.mrf.mxu0 }
 0x26f   : > { %v3206_v62 = vsel %vm3141_vm12, %v3108_v43, %v3174_v10  ;;  %v3083_v35 = vadd.f32 %v3043_v63, %v5830_v47 }
 0x270   : > { %v4093_v53 = vpack.c.bf16 %v3206_v62, %v3204_v34  ;;  %v2930_v48 = vpop.f32.mrf.mxu1 }
 0x271   : > { %v2980_v14 = vadd.f32 %v2979_v22, %v2930_v48  ;;  %v3149_v21 = vmul.f32 %v5858_v58, %v3083_v35  ;;  %vm3116_vm13 = vcmp.ge.f32.partialorder %v3083_v35, 0.0 }
 0x272   : > { %4145 = vst [vmem:[%s4374_s9 + $0x60] sm:$0xff] %v4093_v53  }
 0x273   : > { %v3110_v32 = vadd.f32 %v2980_v14, %v5836_v49  ;;  %v3181_v52 = vsel %vm3116_vm13, %v3083_v35, %v3149_v21 }
 0x274   : > { %v3044_v18 = vpop.f32.mrf.mxu2 }
 0x275   : > { %v3045_v17 = vadd.f32 %v3044_v18, %v2995_v6  ;;  %v3176_v47 = vmul.f32 %v5858_v58, %v3110_v32  ;;  %vm3143_vm15 = vcmp.ge.f32.partialorder %v3110_v32, 0.0 }
 0x276   : > { %v2981_v60 = vpop.f32.mrf.mxu3  ;;  %v2998_v25 = vpop.f32.mrf.mxu0 }
 0x277   : > { %v3085_v13 = vadd.f32 %v3045_v17, %v5841_v54  ;;  %v3208_v24 = vsel %vm3143_vm15, %v3110_v32, %v3176_v47 }
 0x278   : > { %v2932_v28 = vpop.f32.mrf.mxu1 }
 0x279   : > { %v2982_v55 = vadd.f32 %v2981_v60, %v2932_v28  ;;  %vm3118_vm14 = vcmp.ge.f32.partialorder %v3085_v13, 0.0  ;;  %v3151_v40 = vmul.f32 %v5858_v58, %v3085_v13 }
 0x27b   : > { %v3112_v44 = vadd.f32 %v2982_v55, %v5847_v37  ;;  %v3183_v3 = vsel %vm3118_vm14, %v3085_v13, %v3151_v40 }
 0x27c   : > { %v4103_v49 = vpack.c.bf16 %v3183_v3, %v3181_v52  ;;  %v3047_v19 = vpop.f32.mrf.mxu2 }
 0x27d   : > { %vm3145_vm0 = vcmp.ge.f32.partialorder %v3112_v44, 0.0  ;;  %v3178_v2 = vmul.f32 %v5858_v58, %v3112_v44  ;;  %v3048_v61 = vadd.f32 %v3047_v19, %v2998_v25 }
 0x27e   : > { %4147 = vst [vmem:[%s4374_s9 + $0x8] sm:$0xff] %v4103_v49   ;;  %v3000_v54 = vpop.f32.mrf.mxu0 }
 0x27f   : > { %v3210_v12 = vsel %vm3145_vm0, %v3112_v44, %v3178_v2  ;;  %v3087_v1 = vadd.f32 %v3048_v61, %v5851_v57 }
 0x280   : > { %v4098_v29 = vpack.c.bf16 %v3210_v12, %v3208_v24 }
 0x281   : > { %v3153_v51 = vmul.f32 %v5858_v58, %v3087_v1  ;;  %vm3120_vm1 = vcmp.ge.f32.partialorder %v3087_v1, 0.0 }
 0x282   : > { %4146 = vst [vmem:[%s4374_s9 + $0x70] sm:$0xff] %v4098_v29  }
 0x283   : > { %v3185_v30 = vsel %vm3120_vm1, %v3087_v1, %v3153_v51 }
 0x284   : > { %v3049_v36 = vpop.f32.mrf.mxu2 }
 0x285   : > { %v3050_v16 = vadd.f32 %v3049_v36, %v3000_v54 }
 0x286   : > { %v3003_v37 = vpop.f32.mrf.mxu0 }
 0x287   : > { %v3089_v26 = vadd.f32 %v3050_v16, %v5855_v39 }
 0x289   : > { %vm3122_vm2 = vcmp.ge.f32.partialorder %v3089_v26, 0.0  ;;  %v3155_v15 = vmul.f32 %v5858_v58, %v3089_v26 }
 0x28b   : > { %v3187_v41 = vsel %vm3122_vm2, %v3089_v26, %v3155_v15 }
 0x28c   : > { %v4108_v8 = vpack.c.bf16 %v3187_v41, %v3185_v30  ;;  %v3052_v27 = vpop.f32.mrf.mxu2 }
 0x28d   : > { %v3053_v45 = vadd.f32 %v3052_v27, %v3003_v37 }
 0x28e   : > { %4148 = vst [vmem:[%s4374_s9 + $0x18] sm:$0xff] %v4108_v8   ;;  %v3005_v59 = vpop.f32.mrf.mxu0 }
 0x28f   : > { %v3091_v57 = vadd.f32 %v3053_v45, %v5868_v7 }
 0x291   : > { %v3157_v9 = vmul.f32 %v5858_v58, %v3091_v57  ;;  %vm3124_vm3 = vcmp.ge.f32.partialorder %v3091_v57, 0.0 }
 0x293   : > { %v3189_v22 = vsel %vm3124_vm3, %v3091_v57, %v3157_v9 }
 0x294   : > { %v3054_v56 = vpop.f32.mrf.mxu2 }
 0x295   : > { %v3055_v46 = vadd.f32 %v3054_v56, %v3005_v59 }
 0x296   : > { %v3008_v43 = vpop.f32.mrf.mxu0 }
 0x297   : > { %v3093_v39 = vadd.f32 %v3055_v46, %v5873_v38 }
 0x299   : > { %vm3126_vm4 = vcmp.ge.f32.partialorder %v3093_v39, 0.0  ;;  %v3159_v10 = vmul.f32 %v5858_v58, %v3093_v39 }
 0x29b   : > { %v3191_v6 = vsel %vm3126_vm4, %v3093_v39, %v3159_v10 }
 0x29c   : > { %v4113_v34 = vpack.c.bf16 %v3191_v6, %v3189_v22  ;;  %v3057_v62 = vpop.f32.mrf.mxu2 }
 0x29d   : > { %v3058_v53 = vadd.f32 %v3057_v62, %v3008_v43 }
 0x29e   : > { %4149 = vst [vmem:[%s4374_s9 + $0x28] sm:$0xff] %v4113_v34   ;;  %v3010_v63 = vpop.f32.mrf.mxu0 }
 0x29f   : > { %v3095_v7 = vadd.f32 %v3058_v53, %v5884_v31 }
 0x2a1   : > { %v3161_v18 = vmul.f32 %v5858_v58, %v3095_v7  ;;  %vm3128_vm5 = vcmp.ge.f32.partialorder %v3095_v7, 0.0 }
 0x2a3   : > { %v3193_v60 = vsel %vm3128_vm5, %v3095_v7, %v3161_v18 }
 0x2a4   : > { %v3059_v48 = vpop.f32.mrf.mxu2 }
 0x2a5   : > { %v3060_v14 = vadd.f32 %v3059_v48, %v3010_v63 }
 0x2a6   : > { %v3013_v35 = vpop.f32.mrf.mxu0 }
 0x2a7   : > { %v3097_v38 = vadd.f32 %v3060_v14, %v5889_v11 }
 0x2a9   : > { %vm3130_vm6 = vcmp.ge.f32.partialorder %v3097_v38, 0.0  ;;  %v3163_v17 = vmul.f32 %v5858_v58, %v3097_v38 }
 0x2ab   : > { %v3195_v25 = vsel %vm3130_vm6, %v3097_v38, %v3163_v17 }
 0x2ac   : > { %v4118_v32 = vpack.c.bf16 %v3195_v25, %v3193_v60  ;;  %v3062_v21 = vpop.f32.mrf.mxu2 }
 0x2ad   : > { %v3063_v28 = vadd.f32 %v3062_v21, %v3013_v35 }
 0x2ae   : > { %4150 = vst [vmem:[%s4374_s9 + $0x38] sm:$0xff] %v4118_v32   ;;  %v3015_v13 = vpop.f32.mrf.mxu0 }
 0x2af   : > { %v3099_v31 = vadd.f32 %v3063_v28, %v5900_v0 }
 0x2b1   : > { %v3165_v52 = vmul.f32 %v5858_v58, %v3099_v31  ;;  %vm3132_vm7 = vcmp.ge.f32.partialorder %v3099_v31, 0.0 }
 0x2b3   : > { %v3197_v3 = vsel %vm3132_vm7, %v3099_v31, %v3165_v52 }
 0x2b4   : > { %v3064_v55 = vpop.f32.mrf.mxu2 }
 0x2b5   : > { %v3065_v40 = vadd.f32 %v3064_v55, %v3015_v13 }
 0x2b6   : > { %v3018_v47 = vpop.f32.mrf.mxu0 }
 0x2b7   : > { %v3101_v11 = vadd.f32 %v3065_v40, %v5905_v42 }
 0x2b9   : > { %vm3134_vm8 = vcmp.ge.f32.partialorder %v3101_v11, 0.0  ;;  %v3167_v44 = vmul.f32 %v5858_v58, %v3101_v11 }
 0x2bb   : > { %v3199_v49 = vsel %vm3134_vm8, %v3101_v11, %v3167_v44 }
 0x2bc   : > { %v4123_v19 = vpack.c.bf16 %v3199_v49, %v3197_v3  ;;  %v3067_v2 = vpop.f32.mrf.mxu2 }
 0x2bd   : > { %v3068_v24 = vadd.f32 %v3067_v2, %v3018_v47 }
 0x2be   : > { %4151 = vst [vmem:[%s4374_s9 + $0x48] sm:$0xff] %v4123_v19   ;;  %v3020_v54 = vpop.f32.mrf.mxu0 }
 0x2bf   : > { %v3103_v0 = vadd.f32 %v3068_v24, %v5916_v5 }
 0x2c1   : > { %v3169_v1 = vmul.f32 %v5858_v58, %v3103_v0  ;;  %vm3136_vm9 = vcmp.ge.f32.partialorder %v3103_v0, 0.0 }
 0x2c3   : > { %v3201_v16 = vsel %vm3136_vm9, %v3103_v0, %v3169_v1 }
 0x2c4   : > { %v3069_v12 = vpop.f32.mrf.mxu2 }
 0x2c5   : > { %v3070_v61 = vadd.f32 %v3069_v12, %v3020_v54 }
 0x2c6   : > { %v3023_v29 = vpop.f32.mrf.mxu0 }
 0x2c7   : > { %v3105_v42 = vadd.f32 %v3070_v61, %v5921_v4 }
 0x2c9   : > { %vm3138_vm10 = vcmp.ge.f32.partialorder %v3105_v42, 0.0  ;;  %v3171_v36 = vmul.f32 %v5858_v58, %v3105_v42 }
 0x2cb   : > { %v3203_v37 = vsel %vm3138_vm10, %v3105_v42, %v3171_v36 }
 0x2cc   : > { %v4128_v51 = vpack.c.bf16 %v3203_v37, %v3201_v16  ;;  %v3072_v26 = vpop.f32.mrf.mxu2 }
 0x2cd   : > { %v3073_v15 = vadd.f32 %v3072_v26, %v3023_v29 }
 0x2ce   : > { %4152 = vst [vmem:[%s4374_s9 + $0x58] sm:$0xff] %v4128_v51   ;;  %v3025_v30 = vpop.f32.mrf.mxu0 }
 0x2cf   : > { %v3107_v5 = vadd.f32 %v3073_v15, %v5932_v33 }
 0x2d1   : > { %v3173_v27 = vmul.f32 %v5858_v58, %v3107_v5  ;;  %vm3140_vm11 = vcmp.ge.f32.partialorder %v3107_v5, 0.0 }
 0x2d3   : > { %v3205_v57 = vsel %vm3140_vm11, %v3107_v5, %v3173_v27 }
 0x2d4   : > { %v3074_v41 = vpop.f32.mrf.mxu2 }
 0x2d5   : > { %v3075_v8 = vadd.f32 %v3074_v41, %v3025_v30 }
 0x2d6   : > { %v3028_v45 = vpop.f32.mrf.mxu0 }
 0x2d7   : > { %v3109_v4 = vadd.f32 %v3075_v8, %v5937_v50 }
 0x2d9   : > { %vm3142_vm12 = vcmp.ge.f32.partialorder %v3109_v4, 0.0  ;;  %v3175_v59 = vmul.f32 %v5858_v58, %v3109_v4 }
 0x2db   : > { %v3207_v56 = vsel %vm3142_vm12, %v3109_v4, %v3175_v59 }
 0x2dc   : > { %v4133_v46 = vpack.c.bf16 %v3207_v56, %v3205_v57  ;;  %v3077_v43 = vpop.f32.mrf.mxu2 }
 0x2dd   : > { %v3078_v9 = vadd.f32 %v3077_v43, %v3028_v45 }
 0x2de   : > { %4153 = vst [vmem:[%s4374_s9 + $0x68] sm:$0xff] %v4133_v46   ;;  %v3030_v39 = vpop.f32.mrf.mxu0 }
 0x2df   : > { %v3111_v33 = vadd.f32 %v3078_v9, %v5948_v20 }
 0x2e1   : > { %v3177_v6 = vmul.f32 %v5858_v58, %v3111_v33  ;;  %vm3144_vm13 = vcmp.ge.f32.partialorder %v3111_v33, 0.0 }
 0x2e3   : > { %v3209_v62 = vsel %vm3144_vm13, %v3111_v33, %v3177_v6 }
 0x2e4   : > { %v3079_v10 = vpop.f32.mrf.mxu2 }
 0x2e5   : > { %v3080_v22 = vadd.f32 %v3079_v10, %v3030_v39 }
 0x2e7   : > { %v3113_v50 = vadd.f32 %v3080_v22, %v5951_v23 }
 0x2e9   : > { %vm3146_vm14 = vcmp.ge.f32.partialorder %v3113_v50, 0.0  ;;  %v3179_v34 = vmul.f32 %v5858_v58, %v3113_v50 }
 0x2eb   : > { %v3211_v63 = vsel %vm3146_vm14, %v3113_v50, %v3179_v34 }
 0x2ec   : > { %v4138_v53 = vpack.c.bf16 %v3211_v63, %v3209_v62 }
 0x2ee   : > { %4154 = vst [vmem:[%s4374_s9 + $0x78] sm:$0xff] %v4138_v53  }
 0x2ef PF: > { %s16_s24 = sadd.s32 1, %s4238_s24   ;;  %s6099_s20 = smov %s4230_s22 }
 0x2f0   : > { %p13_p13 = scmp.ge.s32.totalorder %s16_s24, 8   ;;  %s6100_s21 = smov %s4234_s23 }
 0x2f1   : > { %s6101_s22 = smov %s6104_s4  ;;  %s6102_s23 = smov %s6108_s25 }
 0x2f2   :  { %15 = sbr.rel (!%p13_p13) target bundleno = 3 (0x3), region = 91 }

</bundles_post_ra>
